<compile_context>
chip_gen: v7x
topology: tpu7x:2x2x1
jax: 0.10.0
libtpu: 0.0.40
codegen_flags: <defaults>
</compile_context>

<pallas_src>
import functools

import jax
import jax.numpy as jnp
from jax.experimental import pallas as pl
from jax.experimental.pallas import tpu as pltpu


def _attention_kernel(x_ref, wqkv_ref, bqkv_ref, wproj_ref, bproj_ref, o_ref, *,
                      bb, n_tokens, n_heads, head_dim, scale, matmul_dtype,
                      approx_recip):
    """One batch-block of self-attention.

    x_ref:     (bb*N, D)  activations (module dtype; cast to matmul_dtype for MXU)
    wqkv_ref:  (D, 3D)    resident QKV weight (matmul_dtype)
    bqkv_ref:  (1, 3D)    QKV bias (f32)
    wproj_ref: (D, D)     resident output-projection weight (matmul_dtype)
    bproj_ref: (1, D)     projection bias (f32)
    o_ref:     (bb*N, D)  output (module dtype)
    """
    N, H, hd = n_tokens, n_heads, head_dim
    D = H * hd

    x = x_ref[...].astype(matmul_dtype)                              # (bb*N, D)

    # Fused QKV projection: one MXU matmul per batch block, f32 accumulation.
    qkv = jnp.dot(x, wqkv_ref[...], preferred_element_type=jnp.float32)
    qkv = qkv + bqkv_ref[...]                                        # (bb*N, 3D) f32

    # Column layout matches torch's reshape(N, 3, H, hd): col = s*D + h*hd + d,
    # so the q/k/v slices are 128-aligned lane slices whenever D % 128 == 0.
    def split_heads(s):
        t = qkv[:, s * D:(s + 1) * D].reshape(bb, N, H, hd)           # (bb, N, H, hd)
        t = jnp.transpose(t, (0, 2, 1, 3))                            # (bb, H, N, hd)
        return t.reshape(bb * H, N, hd).astype(matmul_dtype)          # (bb*H, N, hd)

    q, k, v = split_heads(0), split_heads(1), split_heads(2)

    # All heads in ONE batched matmul (single batch dim, contraction on the last
    # dim — no explicit k.T). Replaces the per-head Python loop + concatenate.
    s = jnp.einsum('bqd,bkd->bqk', q, k,
                   preferred_element_type=jnp.float32) * scale        # (bb*H, N, N)

    # Softmax in f32 (scale applied here, not folded into reduced-precision W_qkv).
    s = s - jnp.max(s, axis=-1, keepdims=True)
    p = jnp.exp(s)
    denom = jnp.sum(p, axis=-1, keepdims=True)
    if approx_recip:
        p = p * pl.reciprocal(denom, approx=True)      # EUP slot, essentially free
    else:
        p = p / denom

    o = jnp.einsum('bqk,bkd->bqd', p.astype(matmul_dtype), v,
                   preferred_element_type=jnp.float32)                # (bb*H, N, hd)

    # transpose(1, 2).flatten(2): (bb,H,N,hd) -> (bb,N,H,hd) -> (bb*N, D); the
    # trailing (H, hd) -> D merge is a layout-preserving reshape (no lane concat).
    heads = jnp.transpose(o.reshape(bb, H, N, hd), (0, 2, 1, 3)).reshape(bb * N, D)

    # Output projection: one MXU matmul per batch block.
    y = jnp.dot(heads.astype(matmul_dtype), wproj_ref[...],
                preferred_element_type=jnp.float32)
    y = y + bproj_ref[...]
    o_ref[...] = y.astype(o_ref.dtype)
    # attn_drop / proj_drop have p=0.0 in this config -> identity (omitted).


def _pick_matmul_dtype(requested):
    """bf16 MXU operands on v6e/v7x, f32 on v5e and older (f32 accumulation always)."""
    if requested is not None:
        return requested
    try:
        kind = jax.devices()[0].device_kind.lower()
    except Exception:
        return jnp.float32
    if ("v6" in kind) or ("v7" in kind) or ("7x" in kind):
        return jnp.bfloat16
    return jnp.float32


def attention_forward(x, w_qkv, b_qkv, w_proj, b_proj, *, n_heads,
                      matmul_dtype=None, batch_block=None, approx_recip=True,
                      vmem_limit_bytes=None):
    """Pallas forward of Attention(cross=False)."""
    B, N, D = x.shape
    assert D % n_heads == 0, "dim must be divisible by n_heads"
    hd = D // n_heads
    scale = hd ** (-0.5)
    matmul_dtype = _pick_matmul_dtype(matmul_dtype)

    if batch_block is None:
        # >= 2 grid steps so the x/out DMAs pipeline against compute and the batch
        # axis can shard across v7x's two TensorCores, while keeping slabs large
        # enough (target ~512 rows) to amortize the ~0.35us per-step overhead.
        bb = min(max(B // 2, 1), max(512 // max(N, 1), 1))
        while B % bb:
            bb -= 1
        batch_block = bb
    assert B % batch_block == 0
    bb = batch_block

    # Activations stay in the module dtype in HBM (cast to matmul_dtype in-kernel);
    # weights are cast once in the wrapper (halves resident-weight DMA/VMEM on bf16).
    x2 = x.reshape(B * N, D)
    wq = w_qkv.astype(matmul_dtype)
    wp = w_proj.astype(matmul_dtype)
    bq = b_qkv.reshape(1, 3 * D).astype(jnp.float32)
    bp = b_proj.reshape(1, D).astype(jnp.float32)

    kernel = functools.partial(
        _attention_kernel, bb=bb, n_tokens=N, n_heads=n_heads, head_dim=hd,
        scale=scale, matmul_dtype=matmul_dtype, approx_recip=approx_recip)

    def call(single_buffer_weights):
        def resident(shape):
            if single_buffer_weights:
                # Constant index_map => never re-fetched; single-buffering halves
                # the resident-weight VMEM footprint (matters for real D on v7x).
                return pl.BlockSpec(shape, lambda i: (0, 0),
                                    pipeline_mode=pl.Buffered(1))
            return pl.BlockSpec(shape, lambda i: (0, 0))

        cp = dict(dimension_semantics=("parallel",))   # megacore-shardable on v7x
        if vmem_limit_bytes is not None:
            cp["vmem_limit_bytes"] = vmem_limit_bytes

        return pl.pallas_call(
            kernel,
            out_shape=jax.ShapeDtypeStruct((B * N, D), x.dtype),
            grid_spec=pltpu.PrefetchScalarGridSpec(
                num_scalar_prefetch=0,
                grid=(B // bb,),
                in_specs=[
                    pl.BlockSpec((bb * N, D), lambda i: (i, 0)),  # x slab (pipelined)
                    resident((D, 3 * D)),                         # W_qkv (resident)
                    resident((1, 3 * D)),                         # b_qkv
                    resident((D, D)),                             # W_proj (resident)
                    resident((1, D)),                             # b_proj
                ],
                out_specs=pl.BlockSpec((bb * N, D), lambda i: (i, 0)),
            ),
            compiler_params=pltpu.CompilerParams(**cp),
        )(x2, wq, bq, wp, bp)

    try:
        out2 = call(True)
    except Exception:
        # pipeline_mode / pl.Buffered not supported by this jax version: fall back
        # to default (double-buffered) resident weights; functionally identical.
        out2 = call(False)

    return out2.reshape(B, N, D)


def attention_reference(x, w_qkv, b_qkv, w_proj, b_proj, *, n_heads):
    """Plain-JAX mirror of the PyTorch forward (cross=False) for verification."""
    B, N, D = x.shape
    hd = D // n_heads
    scale = hd ** (-0.5)
    qkv = x @ w_qkv + b_qkv                                    # (B, N, 3D)
    qkv = qkv.reshape(B, N, 3, n_heads, hd)
    qkv = jnp.transpose(qkv, (2, 0, 3, 1, 4))                  # (3, B, H, N, hd)
    q, k, v = qkv[0], qkv[1], qkv[2]
    dp = jnp.einsum("bhqd,bhkd->bhqk", q, k) * scale
    attn = jax.nn.softmax(dp, axis=-1)
    wav = jnp.einsum("bhqk,bhkd->bhqd", attn, v)               # (B, H, N, hd)
    wav = jnp.transpose(wav, (0, 2, 1, 3)).reshape(B, N, D)
    return wav @ w_proj + b_proj


# TODO(synk): cross-attention path (cross=True, separate q/k/v Linears over a list
# input) is not implemented here; this kernel covers the default self-attention path.

if __name__ == "__main__":
    # Small shapes consistent with the module defaults: n_heads=16 -> head_dim=8
    # with dim=128 (lane-dense), batch=2, tokens=8.
    B, N, D, H = 2, 8, 128, 16

    key = jax.random.PRNGKey(0)
    kx, kw1, kb1, kw2, kb2 = jax.random.split(key, 5)

    x = jax.random.normal(kx, (B, N, D), dtype=jnp.float32)
    # Deterministic synthetic parameters (Linear weights stored as (in, out)).
    w_qkv = jax.random.normal(kw1, (D, 3 * D), dtype=jnp.float32) * 0.05
    b_qkv = jax.random.normal(kb1, (3 * D,), dtype=jnp.float32) * 0.05
    w_proj = jax.random.normal(kw2, (D, D), dtype=jnp.float32) * 0.05
    b_proj = jax.random.normal(kb2, (D,), dtype=jnp.float32) * 0.05

    ref = attention_reference(x, w_qkv, b_qkv, w_proj, b_proj, n_heads=H)

    # f32 MXU operands: tight check (approx reciprocal -> small drift).
    out = attention_forward(x, w_qkv, b_qkv, w_proj, b_proj, n_heads=H,
                            matmul_dtype=jnp.float32)
    out = jax.block_until_ready(out)
    assert out.shape == (B, N, D)
    assert jnp.allclose(out, ref, atol=5e-3, rtol=5e-3), "f32 path mismatch vs reference"

    # Per-generation default (bf16 on v6e/v7x, f32 on v5e/older): loose check.
    out_auto = attention_forward(x, w_qkv, b_qkv, w_proj, b_proj, n_heads=H)
    out_auto = jax.block_until_ready(out_auto)
    assert out_auto.shape == (B, N, D)
    assert jnp.allclose(out_auto, ref, atol=1e-1, rtol=1e-1), "auto path mismatch vs reference"

    # Explicit bf16 MXU operands (exercised regardless of the local TPU generation).
    out_bf16 = attention_forward(x, w_qkv, b_qkv, w_proj, b_proj, n_heads=H,
                                 matmul_dtype=jnp.bfloat16)
    out_bf16 = jax.block_until_ready(out_bf16)
    assert out_bf16.shape == (B, N, D)
    assert jnp.allclose(out_bf16, ref, atol=1e-1, rtol=1e-1), "bf16 path mismatch vs reference"

    print("KERNEL_OK")
</pallas_src>

<mosaic_0001>
module attributes {stable_mosaic.version = 11 : i64} {
  func.func @_attention_kernel(%arg0: i32, %arg1: memref<8x128xf32, #tpu.memory_space<vmem>>, %arg2: memref<128x384xf32, #tpu.memory_space<vmem>>, %arg3: memref<1x384xf32, #tpu.memory_space<vmem>>, %arg4: memref<128x128xf32, #tpu.memory_space<vmem>>, %arg5: memref<1x128xf32, #tpu.memory_space<vmem>>, %arg6: memref<8x128xf32, #tpu.memory_space<vmem>>) attributes {dimension_semantics = [#tpu.dimension_semantics<parallel>], iteration_bounds = array<i64: 2>, scalar_prefetch = 0 : i64, scratch_operands = 0 : i64, tpu.core_type = #tpu.core_type<tc>, window_params = [{transform_indices = @transform_0, window_bounds = array<i64: 8, 128>}, {pipeline_mode = #tpu.pipeline_mode<synchronous>, transform_indices = @transform_1, window_bounds = array<i64: 128, 384>}, {pipeline_mode = #tpu.pipeline_mode<synchronous>, transform_indices = @transform_2, window_bounds = array<i64: 1, 384>}, {pipeline_mode = #tpu.pipeline_mode<synchronous>, transform_indices = @transform_3, window_bounds = array<i64: 128, 128>}, {pipeline_mode = #tpu.pipeline_mode<synchronous>, transform_indices = @transform_4, window_bounds = array<i64: 1, 128>}, {transform_indices = @transform_5, window_bounds = array<i64: 8, 128>}]} {
    %c0 = arith.constant 0 : index
    %c0_0 = arith.constant 0 : index
    %0 = vector.load %arg1[%c0, %c0_0] : memref<8x128xf32, #tpu.memory_space<vmem>>, vector<8x128xf32>
    %c0_1 = arith.constant 0 : index
    %c0_2 = arith.constant 0 : index
    %1 = vector.load %arg2[%c0_1, %c0_2] : memref<128x384xf32, #tpu.memory_space<vmem>>, vector<128x384xf32>
    %cst = arith.constant dense<0.000000e+00> : vector<8x384xf32>
    %2 = tpu.matmul %0, %1, %cst {dimension_numbers = #tpu.dot_dimension_numbers<[1], [0], [0], [1], [0, 0, 1, 1], [], []>} : vector<8x128xf32>, vector<128x384xf32>, vector<8x384xf32> -> vector<8x384xf32>
    %c0_3 = arith.constant 0 : index
    %c0_4 = arith.constant 0 : index
    %3 = vector.load %arg3[%c0_3, %c0_4] : memref<1x384xf32, #tpu.memory_space<vmem>>, vector<1x384xf32>
    %4 = vector.broadcast %3 : vector<1x384xf32> to vector<8x384xf32>
    %5 = arith.addf %2, %4 : vector<8x384xf32>
    %6 = vector.extract_strided_slice %5 {offsets = [0, 0], sizes = [8, 128], strides = [1, 1]} : vector<8x384xf32> to vector<8x128xf32>
    %7 = vector.shape_cast %6 : vector<8x128xf32> to vector<1x8x16x8xf32>
    %8 = tpu.transpose %7, [0, 2, 1, 3] : vector<1x8x16x8xf32> -> vector<1x16x8x8xf32>
    %9 = vector.shape_cast %8 : vector<1x16x8x8xf32> to vector<16x8x8xf32>
    %10 = vector.extract_strided_slice %5 {offsets = [0, 128], sizes = [8, 128], strides = [1, 1]} : vector<8x384xf32> to vector<8x128xf32>
    %11 = vector.shape_cast %10 : vector<8x128xf32> to vector<1x8x16x8xf32>
    %12 = tpu.transpose %11, [0, 2, 1, 3] : vector<1x8x16x8xf32> -> vector<1x16x8x8xf32>
    %13 = vector.shape_cast %12 : vector<1x16x8x8xf32> to vector<16x8x8xf32>
    %14 = vector.extract_strided_slice %5 {offsets = [0, 256], sizes = [8, 128], strides = [1, 1]} : vector<8x384xf32> to vector<8x128xf32>
    %15 = vector.shape_cast %14 : vector<8x128xf32> to vector<1x8x16x8xf32>
    %16 = tpu.transpose %15, [0, 2, 1, 3] : vector<1x8x16x8xf32> -> vector<1x16x8x8xf32>
    %17 = vector.shape_cast %16 : vector<1x16x8x8xf32> to vector<16x8x8xf32>
    "tpu.trace_start"() <{level = 10 : i32, message = "bqd,bkd->bqk"}> : () -> ()
    %cst_5 = arith.constant dense<0.000000e+00> : vector<16x8x8xf32>
    %18 = tpu.matmul %9, %13, %cst_5 {dimension_numbers = #tpu.dot_dimension_numbers<[2], [2], [1], [1], [0, 0, 0, 1, 1, 1], [0], [0]>} : vector<16x8x8xf32>, vector<16x8x8xf32>, vector<16x8x8xf32> -> vector<16x8x8xf32>
    "tpu.trace_stop"() : () -> ()
    %cst_6 = arith.constant 0.353553385 : f32
    %19 = vector.broadcast %cst_6 : f32 to vector<16x8x8xf32>
    %20 = arith.mulf %18, %19 : vector<16x8x8xf32>
    %cst_7 = arith.constant dense<0xFF800000> : vector<16x8xf32>
    %21 = vector.multi_reduction <maximumf>, %20, %cst_7 [2] : vector<16x8x8xf32> to vector<16x8xf32>
    %22 = vector.shape_cast %21 : vector<16x8xf32> to vector<16x8x1xf32>
    %23 = vector.broadcast %22 : vector<16x8x1xf32> to vector<16x8x8xf32>
    %24 = arith.subf %20, %23 : vector<16x8x8xf32>
    %25 = math.exp %24 : vector<16x8x8xf32>
    %cst_8 = arith.constant dense<0.000000e+00> : vector<16x8xf32>
    %26 = vector.multi_reduction <add>, %25, %cst_8 [2] : vector<16x8x8xf32> to vector<16x8xf32>
    %27 = vector.shape_cast %26 : vector<16x8xf32> to vector<16x8x1xf32>
    %28 = tpu.reciprocal %27 {approx = true} : vector<16x8x1xf32> -> vector<16x8x1xf32>
    %29 = vector.broadcast %28 : vector<16x8x1xf32> to vector<16x8x8xf32>
    %30 = arith.mulf %25, %29 : vector<16x8x8xf32>
    "tpu.trace_start"() <{level = 10 : i32, message = "bqk,bkd->bqd"}> : () -> ()
    %cst_9 = arith.constant dense<0.000000e+00> : vector<16x8x8xf32>
    %31 = tpu.matmul %30, %17, %cst_9 {dimension_numbers = #tpu.dot_dimension_numbers<[2], [1], [1], [2], [0, 0, 0, 1, 1, 2], [0], [0]>} : vector<16x8x8xf32>, vector<16x8x8xf32>, vector<16x8x8xf32> -> vector<16x8x8xf32>
    "tpu.trace_stop"() : () -> ()
    %32 = vector.shape_cast %31 : vector<16x8x8xf32> to vector<1x16x8x8xf32>
    %33 = tpu.transpose %32, [0, 2, 1, 3] : vector<1x16x8x8xf32> -> vector<1x8x16x8xf32>
    %34 = vector.shape_cast %33 : vector<1x8x16x8xf32> to vector<8x128xf32>
    %c0_10 = arith.constant 0 : index
    %c0_11 = arith.constant 0 : index
    %35 = vector.load %arg4[%c0_10, %c0_11] : memref<128x128xf32, #tpu.memory_space<vmem>>, vector<128x128xf32>
    %cst_12 = arith.constant dense<0.000000e+00> : vector<8x128xf32>
    %36 = tpu.matmul %34, %35, %cst_12 {dimension_numbers = #tpu.dot_dimension_numbers<[1], [0], [0], [1], [0, 0, 1, 1], [], []>} : vector<8x128xf32>, vector<128x128xf32>, vector<8x128xf32> -> vector<8x128xf32>
    %c0_13 = arith.constant 0 : index
    %c0_14 = arith.constant 0 : index
    %37 = vector.load %arg5[%c0_13, %c0_14] : memref<1x128xf32, #tpu.memory_space<vmem>>, vector<1x128xf32>
    %38 = vector.broadcast %37 : vector<1x128xf32> to vector<8x128xf32>
    %39 = arith.addf %36, %38 : vector<8x128xf32>
    %c0_15 = arith.constant 0 : index
    %c0_16 = arith.constant 0 : index
    %40 = vector.load %arg6[%c0_15, %c0_16] : memref<8x128xf32, #tpu.memory_space<vmem>>, vector<8x128xf32>
    tpu.vector_store %arg6[%c0_15, %c0_16], %39 {strides = array<i32>} : memref<8x128xf32, #tpu.memory_space<vmem>>, vector<8x128xf32>,
    return
  }
  func.func @transform_0(%arg0: i32) -> (i32, i32) {
    %c0_i32 = arith.constant 0 : i32
    %c0_i32_0 = arith.constant 0 : i32
    return %arg0, %c0_i32 : i32, i32
  }
  func.func @transform_1(%arg0: i32) -> (i32, i32) {
    %c0_i32 = arith.constant 0 : i32
    %c0_i32_0 = arith.constant 0 : i32
    %c0_i32_1 = arith.constant 0 : i32
    return %c0_i32, %c0_i32_0 : i32, i32
  }
  func.func @transform_2(%arg0: i32) -> (i32, i32) {
    %c0_i32 = arith.constant 0 : i32
    %c0_i32_0 = arith.constant 0 : i32
    %c0_i32_1 = arith.constant 0 : i32
    return %c0_i32, %c0_i32_0 : i32, i32
  }
  func.func @transform_3(%arg0: i32) -> (i32, i32) {
    %c0_i32 = arith.constant 0 : i32
    %c0_i32_0 = arith.constant 0 : i32
    %c0_i32_1 = arith.constant 0 : i32
    return %c0_i32, %c0_i32_0 : i32, i32
  }
  func.func @transform_4(%arg0: i32) -> (i32, i32) {
    %c0_i32 = arith.constant 0 : i32
    %c0_i32_0 = arith.constant 0 : i32
    %c0_i32_1 = arith.constant 0 : i32
    return %c0_i32, %c0_i32_0 : i32, i32
  }
  func.func @transform_5(%arg0: i32) -> (i32, i32) {
    %c0_i32 = arith.constant 0 : i32
    %c0_i32_0 = arith.constant 0 : i32
    return %arg0, %c0_i32 : i32, i32
  }
}

module attributes {stable_mosaic.version = 11 : i64} {
  func.func @_attention_kernel(%arg0: i32, %arg1: memref<8x128xf32, #tpu.memory_space<vmem>>, %arg2: memref<128x384xf32, #tpu.memory_space<vmem>>, %arg3: memref<1x384xf32, #tpu.memory_space<vmem>>, %arg4: memref<128x128xf32, #tpu.memory_space<vmem>>, %arg5: memref<1x128xf32, #tpu.memory_space<vmem>>, %arg6: memref<8x128xf32, #tpu.memory_space<vmem>>) attributes {dimension_semantics = [#tpu.dimension_semantics<parallel>], iteration_bounds = array<i64: 2>, scalar_prefetch = 0 : i64, scratch_operands = 0 : i64, tpu.core_type = #tpu.core_type<tc>, window_params = [{transform_indices = @transform_0, window_bounds = array<i64: 8, 128>}, {pipeline_mode = #tpu.pipeline_mode<synchronous>, transform_indices = @transform_1, window_bounds = array<i64: 128, 384>}, {pipeline_mode = #tpu.pipeline_mode<synchronous>, transform_indices = @transform_2, window_bounds = array<i64: 1, 384>}, {pipeline_mode = #tpu.pipeline_mode<synchronous>, transform_indices = @transform_3, window_bounds = array<i64: 128, 128>}, {pipeline_mode = #tpu.pipeline_mode<synchronous>, transform_indices = @transform_4, window_bounds = array<i64: 1, 128>}, {transform_indices = @transform_5, window_bounds = array<i64: 8, 128>}]} {
    %c0 = arith.constant 0 : index
    %c0_0 = arith.constant 0 : index
    %0 = vector.load %arg1[%c0, %c0_0] : memref<8x128xf32, #tpu.memory_space<vmem>>, vector<8x128xf32>
    %c0_1 = arith.constant 0 : index
    %c0_2 = arith.constant 0 : index
    %1 = vector.load %arg2[%c0_1, %c0_2] : memref<128x384xf32, #tpu.memory_space<vmem>>, vector<128x384xf32>
    %cst = arith.constant dense<0.000000e+00> : vector<8x384xf32>
    %2 = tpu.matmul %0, %1, %cst {dimension_numbers = #tpu.dot_dimension_numbers<[1], [0], [0], [1], [0, 0, 1, 1], [], []>} : vector<8x128xf32>, vector<128x384xf32>, vector<8x384xf32> -> vector<8x384xf32>
    %c0_3 = arith.constant 0 : index
    %c0_4 = arith.constant 0 : index
    %3 = vector.load %arg3[%c0_3, %c0_4] : memref<1x384xf32, #tpu.memory_space<vmem>>, vector<1x384xf32>
    %4 = vector.broadcast %3 : vector<1x384xf32> to vector<8x384xf32>
    %5 = arith.addf %2, %4 : vector<8x384xf32>
    %6 = vector.extract_strided_slice %5 {offsets = [0, 0], sizes = [8, 128], strides = [1, 1]} : vector<8x384xf32> to vector<8x128xf32>
    %7 = vector.shape_cast %6 : vector<8x128xf32> to vector<1x8x16x8xf32>
    %8 = tpu.transpose %7, [0, 2, 1, 3] : vector<1x8x16x8xf32> -> vector<1x16x8x8xf32>
    %9 = vector.shape_cast %8 : vector<1x16x8x8xf32> to vector<16x8x8xf32>
    %10 = vector.extract_strided_slice %5 {offsets = [0, 128], sizes = [8, 128], strides = [1, 1]} : vector<8x384xf32> to vector<8x128xf32>
    %11 = vector.shape_cast %10 : vector<8x128xf32> to vector<1x8x16x8xf32>
    %12 = tpu.transpose %11, [0, 2, 1, 3] : vector<1x8x16x8xf32> -> vector<1x16x8x8xf32>
    %13 = vector.shape_cast %12 : vector<1x16x8x8xf32> to vector<16x8x8xf32>
    %14 = vector.extract_strided_slice %5 {offsets = [0, 256], sizes = [8, 128], strides = [1, 1]} : vector<8x384xf32> to vector<8x128xf32>
    %15 = vector.shape_cast %14 : vector<8x128xf32> to vector<1x8x16x8xf32>
    %16 = tpu.transpose %15, [0, 2, 1, 3] : vector<1x8x16x8xf32> -> vector<1x16x8x8xf32>
    %17 = vector.shape_cast %16 : vector<1x16x8x8xf32> to vector<16x8x8xf32>
    "tpu.trace_start"() <{level = 10 : i32, message = "bqd,bkd->bqk"}> : () -> ()
    %cst_5 = arith.constant dense<0.000000e+00> : vector<16x8x8xf32>
    %18 = tpu.matmul %9, %13, %cst_5 {dimension_numbers = #tpu.dot_dimension_numbers<[2], [2], [1], [1], [0, 0, 0, 1, 1, 1], [0], [0]>} : vector<16x8x8xf32>, vector<16x8x8xf32>, vector<16x8x8xf32> -> vector<16x8x8xf32>
    "tpu.trace_stop"() : () -> ()
    %cst_6 = arith.constant 0.353553385 : f32
    %19 = vector.broadcast %cst_6 : f32 to vector<16x8x8xf32>
    %20 = arith.mulf %18, %19 : vector<16x8x8xf32>
    %cst_7 = arith.constant dense<0xFF800000> : vector<16x8xf32>
    %21 = vector.multi_reduction <maximumf>, %20, %cst_7 [2] : vector<16x8x8xf32> to vector<16x8xf32>
    %22 = vector.shape_cast %21 : vector<16x8xf32> to vector<16x8x1xf32>
    %23 = vector.broadcast %22 : vector<16x8x1xf32> to vector<16x8x8xf32>
    %24 = arith.subf %20, %23 : vector<16x8x8xf32>
    %25 = math.exp %24 : vector<16x8x8xf32>
    %cst_8 = arith.constant dense<0.000000e+00> : vector<16x8xf32>
    %26 = vector.multi_reduction <add>, %25, %cst_8 [2] : vector<16x8x8xf32> to vector<16x8xf32>
    %27 = vector.shape_cast %26 : vector<16x8xf32> to vector<16x8x1xf32>
    %28 = tpu.reciprocal %27 {approx = true} : vector<16x8x1xf32> -> vector<16x8x1xf32>
    %29 = vector.broadcast %28 : vector<16x8x1xf32> to vector<16x8x8xf32>
    %30 = arith.mulf %25, %29 : vector<16x8x8xf32>
    "tpu.trace_start"() <{level = 10 : i32, message = "bqk,bkd->bqd"}> : () -> ()
    %cst_9 = arith.constant dense<0.000000e+00> : vector<16x8x8xf32>
    %31 = tpu.matmul %30, %17, %cst_9 {dimension_numbers = #tpu.dot_dimension_numbers<[2], [1], [1], [2], [0, 0, 0, 1, 1, 2], [0], [0]>} : vector<16x8x8xf32>, vector<16x8x8xf32>, vector<16x8x8xf32> -> vector<16x8x8xf32>
    "tpu.trace_stop"() : () -> ()
    %32 = vector.shape_cast %31 : vector<16x8x8xf32> to vector<1x16x8x8xf32>
    %33 = tpu.transpose %32, [0, 2, 1, 3] : vector<1x16x8x8xf32> -> vector<1x8x16x8xf32>
    %34 = vector.shape_cast %33 : vector<1x8x16x8xf32> to vector<8x128xf32>
    %c0_10 = arith.constant 0 : index
    %c0_11 = arith.constant 0 : index
    %35 = vector.load %arg4[%c0_10, %c0_11] : memref<128x128xf32, #tpu.memory_space<vmem>>, vector<128x128xf32>
    %cst_12 = arith.constant dense<0.000000e+00> : vector<8x128xf32>
    %36 = tpu.matmul %34, %35, %cst_12 {dimension_numbers = #tpu.dot_dimension_numbers<[1], [0], [0], [1], [0, 0, 1, 1], [], []>} : vector<8x128xf32>, vector<128x128xf32>, vector<8x128xf32> -> vector<8x128xf32>
    %c0_13 = arith.constant 0 : index
    %c0_14 = arith.constant 0 : index
    %37 = vector.load %arg5[%c0_13, %c0_14] : memref<1x128xf32, #tpu.memory_space<vmem>>, vector<1x128xf32>
    %38 = vector.broadcast %37 : vector<1x128xf32> to vector<8x128xf32>
    %39 = arith.addf %36, %38 : vector<8x128xf32>
    %c0_15 = arith.constant 0 : index
    %c0_16 = arith.constant 0 : index
    %40 = vector.load %arg6[%c0_15, %c0_16] : memref<8x128xf32, #tpu.memory_space<vmem>>, vector<8x128xf32>
    tpu.vector_store %arg6[%c0_15, %c0_16], %39 {strides = array<i32>} : memref<8x128xf32, #tpu.memory_space<vmem>>, vector<8x128xf32>,
    return
  }
  func.func @transform_0(%arg0: i32) -> (i32, i32) {
    %c0_i32 = arith.constant 0 : i32
    %c0_i32_0 = arith.constant 0 : i32
    return %arg0, %c0_i32 : i32, i32
  }
  func.func @transform_1(%arg0: i32) -> (i32, i32) {
    %c0_i32 = arith.constant 0 : i32
    %c0_i32_0 = arith.constant 0 : i32
    %c0_i32_1 = arith.constant 0 : i32
    return %c0_i32, %c0_i32_0 : i32, i32
  }
  func.func @transform_2(%arg0: i32) -> (i32, i32) {
    %c0_i32 = arith.constant 0 : i32
    %c0_i32_0 = arith.constant 0 : i32
    %c0_i32_1 = arith.constant 0 : i32
    return %c0_i32, %c0_i32_0 : i32, i32
  }
  func.func @transform_3(%arg0: i32) -> (i32, i32) {
    %c0_i32 = arith.constant 0 : i32
    %c0_i32_0 = arith.constant 0 : i32
    %c0_i32_1 = arith.constant 0 : i32
    return %c0_i32, %c0_i32_0 : i32, i32
  }
  func.func @transform_4(%arg0: i32) -> (i32, i32) {
    %c0_i32 = arith.constant 0 : i32
    %c0_i32_0 = arith.constant 0 : i32
    %c0_i32_1 = arith.constant 0 : i32
    return %c0_i32, %c0_i32_0 : i32, i32
  }
  func.func @transform_5(%arg0: i32) -> (i32, i32) {
    %c0_i32 = arith.constant 0 : i32
    %c0_i32_0 = arith.constant 0 : i32
    return %arg0, %c0_i32 : i32, i32
  }
}

</mosaic_0001>

<bundles_post_ra>
// kernel: tpu_custom_call.1
= control target key start
LH: loop header
LB: loop body
LE: loop exit
PB: predicated region body
PF: predicated region fallthrough
CT: control target
= control target key end

     0   :  { %10 = vsyncpa [#allocation3], 0  ;;  %s7814_s0 = inlined_call_operand.hbm [shape: f32[16,128], index: 0, kind: input, shape index: {}]   ;;  %s7815_s1 = inlined_call_operand.hbm [shape: f32[128,384], index: 1, kind: input, shape index: {}]   ;;  %s7816_s2 = inlined_call_operand.vmem [shape: f32[1,384], index: 2, kind: input, shape index: {}]   ;;  %s7817_s3 = inlined_call_operand.hbm [shape: f32[128,128], index: 3, kind: input, shape index: {}]   ;;  %s7818_s4 = inlined_call_operand.vmem [shape: f32[1,128], index: 4, kind: input, shape index: {}]   ;;  %s7819_s5 = inlined_call_operand.hbm [shape: f32[16,128], index: 5, kind: output, shape index: {}]  }
   0x1   :  { %12 = vsyncpa [#allocation3 + $0x1], 0 }
   0x2   :  { %13 = vsyncpa [#allocation6], 0 }
   0x3   :  { %14 = vsyncpa [#allocation4], 0 }
   0x4   :  { %16 = vsyncpa [#allocation4 + $0x1], 0  ;;  %s6561_s18 = smov 0   ;;  %s6563_s19 = smov 0  }
   0x5   :  { %s6565_s20 = smov 0   ;;  %s6567_s21 = smov 0  }
   0x6 LB: > { %s6582_s22 = sadd.s32 4294967295, %s6501_s21   ;;  %s5653_s23 = sadd.s32 4294967294, %s6501_s21   ;;  %s6501_s21 = sphi %s6567_s21, %s7841_s21   ;;  %s6497_s20 = sphi %s6565_s20, %s7840_s20   ;;  %s6493_s19 = sphi %s6563_s19, %s7839_s19   ;;  %s6489_s18 = sphi %s6561_s18, %s7838_s18  }
   0x7   : > { %p42_p0 = scmp.ne.s32.totalorder %s6493_s19, %s6489_s18  ;;  %p7820_p1 = scmp.eq.s32.totalorder %s6582_s22, 0 }
   0x8   : > { %p156_p3 = scmp.eq.s32.totalorder %s5653_s23, 1  ;;  %p5654_p5 = scmp.ge.s32.totalorder %s6501_s21, 1 }
   0x9   : > { %p6591_p4 = por %p7820_p1, %p42_p0  ;;  %p163_p7 = scmp.lt.s32.totalorder %s6501_s21, 3 }
   0xa   : > { %p6596_p6 = por %p156_p3, %p42_p0  ;;  %s6503_s27 = smov [#allocation5]  }
   0xb   : > { %s7824_s24 = scalar_select %p6591_p4, 1, 0 }
   0xc   : > { %s7825_s25 = scalar_select %p6596_p6, 1, 0 }
   0xd   : > { %p6601_p8 = pnand %p5654_p5, %p163_p7  ;;  %s175_s28 = sshll.u32 %s6503_s27, 4  ;;  %s6605_s28 = int_to_ptr.vmem [resolvable:$true] %s175_s28 }
   0xe   : > { %s6504_s30 = smov [#allocation7]   ;;  %s6345_s9 = scalar_lea.hbm %s7815_s1, 6144 }
   0xf   : > { %p6202_p9 = pneg %p6601_p8  ;;  %s191_s6 = sshll.u32 %s6504_s30, 4  ;;  %s6616_s6 = int_to_ptr.vmem [resolvable:$true] %s191_s6 }
  0x10   : > { %p6346_p12 = scmp.ne.s32.totalorder %s7815_s1, %s6345_s9  ;;  %p6352_p5 = scmp.lt.u32.totalorder %s6345_s9, %s7815_s1 }
  0x11   : > { %p6612_p11 = pnand %p6202_p9, %p7820_p1 }
  0x13   : > { %p6347_p13 = pneg %p6612_p11 }
  0x15   : > { %p6348_p0 = pnand %p6347_p13, %p6346_p12 }
  0x17   : > { %p6349_p3 = pneg %p6348_p0 }
  0x19   : > { %p6354_p7 = pnand %p6352_p5, %p6349_p3 }
  0x1b   : > { %6357 = shalt.err (!%p6354_p7)
}
  0x1c   : > { %s6358_s14 = scalar_lea.vmem %s6605_s28, 6144  ;;  %p6366_p2 = scmp.lt.s32.totalorder %s6605_s28, %s6605_s28 }
  0x1d   : > { %p6359_p9 = scmp.ne.s32.totalorder %s6605_s28, %s6358_s14  ;;  %p6367_p12 = scmp.lt.s32.totalorder %s6358_s14, %s6358_s14 }
  0x1f   : > { %p6361_p10 = pnand %p6359_p9, %p6347_p13  ;;  %p6368_p0 = por %p6367_p12, %p6366_p2 }
  0x21   : > { %p6362_p1 = pneg %p6361_p10 }
  0x23   : > { %p6369_p6 = pnand %p6368_p0, %p6362_p1 }
  0x25   : > { %6372 = shalt.err (!%p6369_p6)
}
  0x26   : > { %s6505_s15 = smov 384   ;;  %s6506_s16 = smov 24  }
  0x27   : > { %6205 = dma.hbm_to_vmem [thread:$0]  (!%p6612_p11), %s7815_s1, 6144, %s6605_s28, [#allocation6], %s6505_s15, %s6505_s15, %s6506_s16  }
  0x28   : > { %s6373_s7 = scalar_lea.hbm %s7817_s3, 2048 }
  0x29   : > { %p6374_p2 = scmp.ne.s32.totalorder %s7817_s3, %s6373_s7  ;;  %p6380_p10 = scmp.lt.u32.totalorder %s6373_s7, %s7817_s3 }
  0x2b   : > { %p6376_p1 = pnand %p6374_p2, %p6347_p13 }
  0x2d   : > { %p6377_p6 = pneg %p6376_p1 }
  0x2f   : > { %p6382_p3 = pnand %p6380_p10, %p6377_p6 }
  0x31   : > { %6385 = shalt.err (!%p6382_p3)
}
  0x32   : > { %s6386_s28 = scalar_lea.vmem %s6616_s6, 2048  ;;  %p6394_p12 = scmp.lt.s32.totalorder %s6616_s6, %s6616_s6 }
  0x33   : > { %p6387_p5 = scmp.ne.s32.totalorder %s6616_s6, %s6386_s28  ;;  %p6395_p0 = scmp.lt.s32.totalorder %s6386_s28, %s6386_s28 }
  0x35   : > { %p6389_p7 = pnand %p6387_p5, %p6347_p13  ;;  %p6396_p2 = por %p6395_p0, %p6394_p12 }
  0x37   : > { %p6390_p9 = pneg %p6389_p7 }
  0x39   : > { %p6397_p1 = pnand %p6396_p2, %p6390_p9 }
  0x3b   : > { %6400 = shalt.err (!%p6397_p1)
}
  0x3c   : > { %s6507_s12 = smov 128   ;;  %s6508_s13 = smov 8  }
  0x3d   : > { %6208 = dma.hbm_to_vmem [thread:$0]  (!%p6612_p11), %s7817_s3, 2048, %s6616_s6, [#allocation6], %s6507_s12, %s6507_s12, %s6508_s13  }
  0x3e   : > { %s6671_s16 = sadd.s32 1, %s6501_s21   ;;  %s29_s23 = sadd.s32 1, %s6497_s20 }
  0x3f   : > { %s26_s17 = ssub.s32 %s6501_s21, %s6671_s16  ;;  %p36_p6 = scmp.ne.s32.totalorder %s6497_s20, %s6493_s19 }
  0x40   : > { %p27_p13 = scmp.eq.s32.totalorder %s26_s17, 0  ;;  %p37_p10 = scmp.eq.s32.totalorder %s6501_s21, 0 }
  0x41   : > { %p7828_p5 = scmp.eq.s32.totalorder %s6582_s22, 1  ;;  %p6219_p9 = scmp.lt.s32.totalorder %s6501_s21, 2 }
  0x42   : > { %s6680_s27 = scalar_select %p27_p13, %s6497_s20, %s29_s23  }
  0x43   : > { %p38_p3 = por %p37_p10, %p36_p6  ;;  %p6684_p7 = por %p7828_p5, %p36_p6 }
  0x44   : > { %s208_s29 = sand.u32 1, %s6497_s20   ;;  %s5659_s6 = sshll.u32 %s6501_s21, 7 }
  0x45   : > { %s7829_s30 = scalar_select %p6684_p7, 1, 0 }
  0x46   : > { %s5658_s7 = sshll.u32 %s208_s29, 3  ;;  %s6694_s10 = scalar_lea.hbm %s7814_s0, %s5659_s6 }
  0x47   : > { %s212_s11 = scalar_lea.vmem [#allocation2], %s5658_s7  ;;  %p6698_p11 = pnand %p6219_p9, %p38_p3 }
  0x48   : > { %s219_s28 = sshll.u32 %s212_s11, 4  ;;  %s209_s13 = scalar_lea.sflag [#allocation3], %s208_s29  ;;  %s6696_s28 = int_to_ptr.vmem [resolvable:$true] %s219_s28 }
  0x49   : > { %s6401_s14 = scalar_lea.hbm %s6694_s10, 128  ;;  %p6403_p0 = pneg %p6698_p11 }
  0x4a   : > { %p6402_p12 = scmp.ne.s32.totalorder %s6694_s10, %s6401_s14  ;;  %s6406_s23 = scalar_lea.hbm %s7814_s0, 256 }
  0x4b   : > { %p6407_p13 = scmp.lt.u32.totalorder %s6694_s10, %s7814_s0  ;;  %p6408_p6 = scmp.lt.u32.totalorder %s6406_s23, %s6401_s14 }
  0x4c   : > { %p6404_p2 = pnand %p6403_p0, %p6402_p12  ;;  %p6410_p3 = scmp.lt.u32.totalorder %s6401_s14, %s6694_s10 }
  0x4d   : > { %p6409_p10 = por %p6408_p6, %p6407_p13 }
  0x4e   : > { %p6405_p1 = pneg %p6404_p2 }
  0x4f   : > { %p6411_p5 = por %p6410_p3, %p6409_p10 }
  0x51   : > { %p6412_p9 = pnand %p6411_p5, %p6405_p1 }
  0x53   : > { %6415 = shalt.err (!%p6412_p9)
}
  0x54   : > { %s6416_s29 = scalar_lea.vmem %s6696_s28, 128  ;;  %s6509_s8 = smov [#allocation2]  }
  0x55   : > { %p6417_p12 = scmp.ne.s32.totalorder %s6696_s28, %s6416_s29  ;;  %s6421_s9 = sshll.u32 %s6509_s8, 4  ;;  %s6422_s9 = int_to_ptr.vmem [resolvable:$false] %s6421_s9 }
  0x56   : > { %s6423_s11 = scalar_lea.vmem %s6422_s9, 256  ;;  %p6424_p4 = scmp.lt.s32.totalorder %s6696_s28, %s6422_s9 }
  0x57   : > { %p6419_p2 = pnand %p6417_p12, %p6403_p0  ;;  %p6425_p13 = scmp.lt.s32.totalorder %s6423_s11, %s6416_s29 }
  0x59   : > { %p6420_p7 = pneg %p6419_p2  ;;  %p6426_p6 = por %p6425_p13, %p6424_p4 }
  0x5b   : > { %p6427_p10 = pnand %p6426_p6, %p6420_p7 }
  0x5d   : > { %6430 = shalt.err (!%p6427_p10)
}
  0x5e   : > { %6212 = dma.hbm_to_vmem [thread:$0]  (!%p6698_p11), %s6694_s10, 128, %s6696_s28, %s209_s13  }
  0x5f   : > { %228 = sbr.rel (%p6601_p8) target bundleno = 1701 (0x6a5), region = 40  ;;  %s6730_s14 = sand.u32 (!%p6601_p8), 1, %s6493_s19  }
  0x60   : > { %s7823_s15 = sshll.u32 (!%p6601_p8), %s6730_s14, 3  ;;  %s231_s17 = scalar_lea.sflag (!%p6601_p8), [#allocation3], %s6730_s14 }
  0x61   : > { %s6736_s23 = scalar_lea.vmem (!%p6601_p8), [#allocation2], %s7823_s15  ;;  %p7831_p4 = scmp.ne.s32.totalorder (!%p6601_p8), %s7824_s24, 0 }
  0x66   : > { %6476 = dma.done.wait (%p7831_p4), %s231_s17, 128  }
  0x67   : > { %6478 = vsyncadd (%p7831_p4), %s231_s17, 4294967168  ;;  %p7832_p7 = scmp.eq.s32.totalorder %s6582_s22, 0 }
  0x69   : > { %6480 = dma.done.wait (%p7832_p7), [#allocation6], 8192   ;;  %p7833_p8 = pmov %p7832_p7 }
  0x6a   : > { %v6510_v0 = vmov 0.0   ;;  %v6511_v1 = vmov 0.0|0.0   ;;  %v271_v2 = vld [vmem:[#allocation5 + $0x8] sm:$0xff]  ;;  %v274_v3 = vld [vmem:[#allocation5 + $0x20] sm:$0xff]  ;;  %v273_v6 = vld [vmem:[#allocation5 + $0x18] sm:$0xff]  ;;  %vm6512_vm0 = vmmov 0  }
  0x6b   : > { %6482 = vsyncadd (%p7833_p8), [#allocation6], 4294959104  ;;  %399 = vmatprep.mubr.f32.mxu0 %v6510_v0  ;;  %6142 = vmatprep.subr.bf16.mxu1 %v6511_v1  ;;  %v270_v4 = vld [vmem:[#allocation5] sm:$0xff]  ;;  %v6110_v5 = vpack.c.bf16 %v274_v3, %v271_v2  ;;  %v277_v7 = vld [vmem:[#allocation5 + $0x38] sm:$0xff]  ;;  %s6513_s10 = smov 112   ;;  %s6514_s28 = smov 120  }
  0x6c   : > { %v280_v8 = vld [vmem:[#allocation5 + $0x50] sm:$0xff]  ;;  %v6112_v9 = vpack.c.bf16 %v273_v6, %v270_v4  ;;  %v279_v12 = vld [vmem:[#allocation5 + $0x48] sm:$0xff]  ;;  %v286_v14 = vld [vmem:[#allocation5 + $0x80] sm:$0xff]  ;;  %5912 = vmatprep.mubr.msk.f32.mxu1 %vm6512_vm0, %v6510_v0  ;;  %s6515_s12 = smov 96   ;;  %s6516_s13 = smov 104   ;;  %vm2246_vm1 = vcmask 64512  }
  0x6d   : > { %v6114_v10 = vpack.c.bf16 %v280_v8, %v277_v7  ;;  %v276_v11 = vld [vmem:[#allocation5 + $0x30] sm:$0xff]  ;;  %v283_v13 = vld [vmem:[#allocation5 + $0x68] sm:$0xff]  ;;  %6111 = vmatprep.subr.bf16.mxu0 %v6110_v5  ;;  %v282_v17 = vld [vmem:[#allocation5 + $0x60] sm:$0xff]  ;;  %s6517_s7 = smov 88   ;;  %s6518_s6 = smov 80   ;;  %vm5428_vm2 = vcmask 130048  }
  0x6e   : > { %6113 = vmatpush1.bf16.msra.mxu0 %v6112_v9  ;;  %v6116_v15 = vpack.c.bf16 %v279_v12, %v276_v11  ;;  %v6118_v16 = vpack.c.bf16 %v286_v14, %v283_v13  ;;  %v285_v18 = vld [vmem:[#allocation5 + $0x78] sm:$0xff]  ;;  %v292_v20 = vld [vmem:[#allocation5 + $0xb0] sm:$0xff]  ;;  %v291_v24 = vld [vmem:[#allocation5 + $0xa8] sm:$0xff]  ;;  %v320_v13 = vlaneseq  ;;  %s6519_s29 = smov 72   ;;  %s6520_s8 = smov 64   ;;  %vm5430_vm3 = vcmask 195584  }
  0x6f   : > { %6115 = vmatprep.subr.bf16.mxu0 %v6114_v10  ;;  %v289_v19 = vld [vmem:[#allocation5 + $0x98] sm:$0xff]  ;;  %v6120_v21 = vpack.c.bf16 %v285_v18, %v282_v17  ;;  %v288_v23 = vld [vmem:[#allocation5 + $0x90] sm:$0xff]  ;;  %v295_v25 = vld [vmem:[#allocation5 + $0xc8] sm:$0xff]  ;;  %s6521_s9 = smov 56   ;;  %s6522_s11 = smov 48   ;;  %vm5432_vm4 = vcmask 261120  }
  0x70   : > { %v6122_v22 = vpack.c.bf16 %v292_v20, %v289_v19  ;;  %v298_v26 = vld [vmem:[#allocation5 + $0xe0] sm:$0xff]  ;;  %v272_v27 = vld [vmem:[#allocation5 + $0x10] sm:$0xff]  ;;  %v275_v28 = vld [vmem:[#allocation5 + $0x28] sm:$0xff]  ;;  %v6124_v30 = vpack.c.bf16 %v291_v24, %v288_v23  ;;  %v6764_v14 = vshrl.u32 %v320_v13, 7  ;;  %s6523_s17 = smov 40   ;;  %s6525_s24 = smov 24  }
  0x71   : > { %v278_v29 = vld [vmem:[#allocation5 + $0x40] sm:$0xff]  ;;  %v6143_v31 = vpack.c.bf16 %v275_v28, %v272_v27  ;;  %v281_v32 = vld [vmem:[#allocation5 + $0x58] sm:$0xff]  ;;  %v6126_v33 = vpack.c.bf16 %v298_v26, %v295_v25  ;;  %v304_v37 = vld [vmem:[#allocation5 + $0x110] sm:$0xff]  ;;  %s6526_s26 = smov 16   ;;  %s6527_s15 = smov 8   ;;  %vm5434_vm5 = vcmask 326656  }
  0x72   : > { %6117 = vmatpush1.bf16.msra.mxu0 %v6116_v15  ;;  %v294_v34 = vld [vmem:[#allocation5 + $0xc0] sm:$0xff]  ;;  %v297_v35 = vld [vmem:[#allocation5 + $0xd8] sm:$0xff]  ;;  %v6146_v38 = vpack.c.bf16 %v281_v32, %v278_v29  ;;  %v284_v39 = vld [vmem:[#allocation5 + $0x70] sm:$0xff]  ;;  %v322_v15 = vsub.s32 0, %v6764_v14  ;;  %v326_v20 = vsub.s32 1, %v6764_v14  ;;  %v330_v24 = vsub.s32 2, %v6764_v14 }
  0x73   : > { %6119 = vmatprep.subr.bf16.mxu0 %v6118_v16  ;;  %v301_v36 = vld [vmem:[#allocation5 + $0xf8] sm:$0xff]  ;;  %6144 = vmatpush3.bf16.msra.mxu1 %v6143_v31  ;;  %v287_v40 = vld [vmem:[#allocation5 + $0x88] sm:$0xff]  ;;  %v6128_v41 = vpack.c.bf16 %v297_v35, %v294_v34  ;;  %v300_v43 = vld [vmem:[#allocation5 + $0xf0] sm:$0xff]  ;;  %v6528_v29 = vmov 1983009808   ;;  %vm5436_vm6 = vcmask 392192  }
  0x74   : > { %6145 = vmatprep.subr.bf16.mxu1 %v6511_v1  ;;  %v6130_v42 = vpack.c.bf16 %v304_v37, %v301_v36  ;;  %v303_v44 = vld [vmem:[#allocation5 + $0x108] sm:$0xff]  ;;  %v310_v46 = vld [vmem:[#allocation5 + $0x140] sm:$0xff]  ;;  %v6149_v47 = vpack.c.bf16 %v287_v40, %v284_v39  ;;  %v293_v49 = vld [vmem:[#allocation5 + $0xb8] sm:$0xff]  ;;  %v6529_v31 = vmov 1934713408   ;;  %vm5438_vm7 = vcmask 457728  }
  0x75   : > { %v307_v45 = vld [vmem:[#allocation5 + $0x128] sm:$0xff]  ;;  %v290_v48 = vld [vmem:[#allocation5 + $0xa0] sm:$0xff]  ;;  %v6132_v50 = vpack.c.bf16 %v303_v44, %v300_v43  ;;  %v309_v53 = vld [vmem:[#allocation5 + $0x138] sm:$0xff]  ;;  %v589_v32 = vunpack.c.l.s4 %v6529_v31  ;;  %vm5440_vm8 = vcmask 523264   ;;  %vm5442_vm9 = vcmask 588800   ;;  %p7835_p0 = scmp.ne.s32.totalorder %s7829_s30, 0 }
  0x76   : > { %6121 = vmatpush1.bf16.msra.mxu0 %v6120_v21  ;;  %v6134_v51 = vpack.c.bf16 %v310_v46, %v307_v45  ;;  %v306_v52 = vld [vmem:[#allocation5 + $0x120] sm:$0xff]  ;;  %v313_v54 = vld [vmem:[#allocation5 + $0x158] sm:$0xff]  ;;  %v316_v55 = vld [vmem:[#allocation5 + $0x170] sm:$0xff]  ;;  %v6152_v56 = vpack.c.bf16 %v293_v49, %v290_v48  ;;  %vm5444_vm10 = vcmask 654336   ;;  %vm5446_vm11 = vcmask 719872  }
  0x77   : > { %6123 = vmatprep.subr.bf16.mxu0 %v6122_v22  ;;  %6147 = vmatpush3.bf16.msra.mxu1 %v6146_v38  ;;  %v296_v57 = vld [vmem:[#allocation5 + $0xd0] sm:$0xff]  ;;  %v299_v58 = vld [vmem:[#allocation5 + $0xe8] sm:$0xff]  ;;  %v6136_v59 = vpack.c.bf16 %v309_v53, %v306_v52  ;;  %v6138_v60 = vpack.c.bf16 %v316_v55, %v313_v54  ;;  %v302_v2 = vld [vmem:[#allocation5 + $0x100] sm:$0xff]  ;;  %v590_v36 = vunpack.c.0.s8 %v589_v32  ;;  %vm5448_vm12 = vcmask 785408  }
  0x78   : > { %6148 = vmatprep.subr.bf16.mxu1 %v6511_v1  ;;  %v312_v61 = vld [vmem:[#allocation5 + $0x150] sm:$0xff]  ;;  %v315_v62 = vld [vmem:[#allocation5 + $0x168] sm:$0xff]  ;;  %v6155_v63 = vpack.c.bf16 %v299_v58, %v296_v57  ;;  %v305_v3 = vld [vmem:[#allocation5 + $0x118] sm:$0xff]  ;;  %vm5450_vm13 = vcmask 850944   ;;  %vm5452_vm14 = vcmask 916480   ;;  %vm5454_vm15 = vcmask 982016  }
  0x79   : > { %v6140_v4 = vpack.c.bf16 %v315_v62, %v312_v61  ;;  %v6158_v5 = vpack.c.bf16 %v305_v3, %v302_v2  ;;  %v269_v6 = vld [vmem:[%s6736_s23] sm:$0xff]  ;;  %v311_v8 = vld [vmem:[#allocation5 + $0x148] sm:$0xff]  ;;  %v314_v10 = vld [vmem:[#allocation5 + $0x160] sm:$0xff]  ;;  %s6524_s23 = smov 32   ;;  %v6866_v44 = vsub.s32 %v590_v36, %v6764_v14 }
  0x7a   : > { %6125 = vmatpush1.bf16.msra.mxu0 %v6124_v30  ;;  %v308_v7 = vld [vmem:[#allocation5 + $0x130] sm:$0xff]  ;;  %v317_v11 = vld [vmem:[#allocation5 + $0x178] sm:$0xff]  ;;  %v525_v30 = vunpack.c.l.s4 %v6528_v29 }
  0x7b   : > { %6127 = vmatprep.subr.bf16.mxu0 %v6126_v33  ;;  %6150 = vmatpush3.bf16.msra.mxu1 %v6149_v47  ;;  %v6161_v9 = vpack.c.bf16 %v311_v8, %v308_v7  ;;  %v6164_v12 = vpack.c.bf16 %v317_v11, %v314_v10  ;;  %v318_v16 = vld [vmem:[%s7816_s2] sm:$0x7] }
  0x7c   : > { %6151 = vmatprep.subr.bf16.mxu1 %v6511_v1  ;;  %v323_v17 = vrot.slane %v318_v16, %v322_v15  ;;  %v327_v22 = vrot.slane %v318_v16, %v326_v20  ;;  %v331_v25 = vrot.slane %v318_v16, %v330_v24  ;;  %v526_v33 = vunpack.c.0.s8 %v525_v30 }
  0x7e   : > { %6129 = vmatpush1.bf16.msra.mxu0 %v6128_v41  ;;  %v6861_v37 = vsub.s32 %v526_v33, %v6764_v14 }
  0x7f   : > { %6131 = vmatprep.subr.bf16.mxu0 %v6130_v42  ;;  %6153 = vmatpush3.bf16.msra.mxu1 %v6152_v56 }
  0x80   : > { %6154 = vmatprep.subr.bf16.mxu1 %v6511_v1 }
  0x82   : > { %6133 = vmatpush1.bf16.msra.mxu0 %v6132_v50 }
  0x83   : > { %6135 = vmatprep.subr.bf16.mxu0 %v6134_v51  ;;  %6156 = vmatpush3.bf16.msra.mxu1 %v6155_v63 }
  0x84   : > { %6157 = vmatprep.subr.bf16.mxu1 %v6511_v1 }
  0x86   : > { %6137 = vmatpush1.bf16.msra.mxu0 %v6136_v59 }
  0x87   : > { %6139 = vmatprep.subr.bf16.mxu0 %v6138_v60  ;;  %6159 = vmatpush3.bf16.msra.mxu1 %v6158_v5 }
  0x88   : > { %6160 = vmatprep.subr.bf16.mxu1 %v6511_v1 }
  0x8a   : > { %6141 = vmatpush1.bf16.msra.mxu0 %v6140_v4 }
  0x8b   : > { %5955 = vmatprep.subr.mxu0 %v6510_v0  ;;  %6162 = vmatpush3.bf16.msra.mxu1 %v6161_v9 }
  0x8c   : > { %6163 = vmatprep.subr.bf16.mxu1 %v6511_v1 }
  0x8d   : > { %400 = vmatmul.mubr.f32.vlgmr.msra.gmra.mrb[0].mxu0 %v269_v6 }
  0x8e   : > { %5957 = vmatprep.mubr.msk.f32.mxu0 %vm6512_vm0, %v6510_v0 }
  0x8f   : > { %6165 = vmatpush3.bf16.msra.mxu1 %v6164_v12 }
  0x90   : > { %5915 = vmatprep.subr.mxu1 %v6510_v0 }
  0x92   : > { %5913 = vmatmul.mubr.f32.vlgmr.msra.gmra.mrb[0].mxu1 %v269_v6 }
  0x93   : > { %5917 = vmatprep.mubr.msk.f32.mxu1 %vm6512_vm0, %v6510_v0 }
 0x160   : > { %v401_v18 = vpop.f32.mrb[0].mxu0 }
 0x161   : > { %v6770_v19 = vadd.f32 %v401_v18, %v323_v17  ;;  %v403_v21 = vpop.f32.mrb[1].mxu0 }
 0x162   : > { %v6781_v23 = vadd.f32 %v403_v21, %v327_v22 }
 0x163   : > { %480 = vrot.lane.b32.xlu0 %v6770_v19, %s6513_s10  ;;  %477 = vrot.lane.b32.xlu1 %v6770_v19, %s6514_s28 }
 0x165   : > { %v472_v26 = vpop.f32.mrb[0].mxu1 }
 0x166   : > { %v6836_v27 = vadd.f32 %v472_v26, %v331_v25  ;;  %v5914_v28 = vpop.f32.mrb[1].mxu1 }
 0x167   : > { %486 = vrot.lane.b32.xlu0 %v6770_v19, %s6515_s12  ;;  %483 = vrot.lane.b32.xlu1 %v6770_v19, %s6516_s13 }
 0x16b   : > { %1067 = vrot.lane.b32.xlu0 %v6781_v23, %s6514_s28  ;;  %489 = vrot.lane.b32.xlu1 %v6770_v19, %s6517_s7 }
 0x16f   : > { %1070 = vrot.lane.b32.xlu0 %v6781_v23, %s6513_s10  ;;  %1073 = vrot.lane.b32.xlu1 %v6781_v23, %s6516_s13 }
 0x173   : > { %492 = vrot.lane.b32.xlu0 %v6770_v19, %s6518_s6  ;;  %495 = vrot.lane.b32.xlu1 %v6770_v19, %s6519_s29 }
 0x177   : > { %498 = vrot.lane.b32.xlu0 %v6770_v19, %s6520_s8  ;;  %501 = vrot.lane.b32.xlu1 %v6770_v19, %s6521_s9 }
 0x17b   : > { %1076 = vrot.lane.b32.xlu0 %v6781_v23, %s6515_s12  ;;  %1079 = vrot.lane.b32.xlu1 %v6781_v23, %s6517_s7 }
 0x17f   : > { %1082 = vrot.lane.b32.xlu0 %v6781_v23, %s6518_s6  ;;  %1085 = vrot.lane.b32.xlu1 %v6781_v23, %s6519_s29 }
 0x183   : > { %504 = vrot.lane.b32.xlu0 %v6770_v19, %s6522_s11  ;;  %507 = vrot.lane.b32.xlu1 %v6770_v19, %s6523_s17 }
 0x187   : > { %510 = vrot.lane.b32.xlu0 %v6770_v19, %s6524_s23  ;;  %513 = vrot.lane.b32.xlu1 %v6770_v19, %s6525_s24 }
 0x18b   : > { %1088 = vrot.lane.b32.xlu0 %v6781_v23, %s6520_s8  ;;  %1091 = vrot.lane.b32.xlu1 %v6781_v23, %s6521_s9 }
 0x18f   : > { %1094 = vrot.lane.b32.xlu0 %v6781_v23, %s6522_s11  ;;  %1097 = vrot.lane.b32.xlu1 %v6781_v23, %s6523_s17 }
 0x193   : > { %1100 = vrot.lane.b32.xlu0 %v6781_v23, %s6524_s23  ;;  %1103 = vrot.lane.b32.xlu1 %v6781_v23, %s6525_s24 }
 0x197   : > { %1106 = vrot.lane.b32.xlu0 %v6781_v23, %s6526_s26  ;;  %1109 = vrot.lane.b32.xlu1 %v6781_v23, %s6527_s15 }
 0x19b   : > { %516 = vrot.lane.b32.xlu0 %v6770_v19, %s6526_s26  ;;  %519 = vrot.lane.b32.xlu1 %v6770_v19, %s6527_s15 }
 0x19f   : > { %1657 = vrot.lane.b32.xlu1 %v6836_v27, %s6514_s28  ;;  %1660 = vrot.lane.b32.xlu0 %v6836_v27, %s6513_s10 }
 0x1a3   : > { %1663 = vrot.lane.b32.xlu1 %v6836_v27, %s6516_s13  ;;  %1666 = vrot.lane.b32.xlu0 %v6836_v27, %s6515_s12 }
 0x1a7   : > { %1675 = vrot.lane.b32.xlu0 %v6836_v27, %s6519_s29  ;;  %1669 = vrot.lane.b32.xlu1 %v6836_v27, %s6517_s7 }
 0x1ab   : > { %1678 = vrot.lane.b32.xlu0 %v6836_v27, %s6520_s8  ;;  %1672 = vrot.lane.b32.xlu1 %v6836_v27, %s6518_s6 }
 0x1af   : > { %1687 = vrot.lane.b32.xlu0 %v6836_v27, %s6523_s17  ;;  %1681 = vrot.lane.b32.xlu1 %v6836_v27, %s6521_s9 }
 0x1b3   : > { %1684 = vrot.lane.b32.xlu1 %v6836_v27, %s6522_s11 }
 0x1d5   : > { %v481_v34 = vpop.permute.xlu0 %480  ;;  %v478_v35 = vpop.permute.xlu1 %477 }
 0x1d6   : > { %v522_v38 = vcombine.low %v6770_v19, %v481_v34  ;;  %v523_v39 = vcombine.high %v6770_v19, %v481_v34 }
 0x1d8   : > { %v530_v45 = vrot.slane %v522_v38, %v6861_v37  ;;  %v537_v46 = vrot.slane %v523_v39, %v6861_v37 }
 0x1d9   : > { %v487_v40 = vpop.permute.xlu0 %486  ;;  %v484_v41 = vpop.permute.xlu1 %483 }
 0x1da   : > { %v538_v42 = vcombine.low %v478_v35, %v484_v41  ;;  %v539_v43 = vcombine.high %v478_v35, %v484_v41 }
 0x1dc   : > { %v546_v47 = vrot.slane %v538_v42, %v6861_v37  ;;  %v553_v48 = vrot.slane %v539_v43, %v6861_v37 }
 0x1dd   : > { %v1068_v49 = vpop.permute.xlu0 %1067  ;;  %v490_v50 = vpop.permute.xlu1 %489 }
 0x1de   : > { %v586_v51 = vcombine.low %v530_v45, %v546_v47  ;;  %v587_v52 = vcombine.high %v530_v45, %v546_v47  ;;  %v602_v53 = vcombine.low %v537_v46, %v553_v48  ;;  %v603_v54 = vcombine.high %v537_v46, %v553_v48 }
 0x1e0   : > { %v594_v55 = vrot.slane %v586_v51, %v6866_v44  ;;  %v601_v56 = vrot.slane %v587_v52, %v6866_v44  ;;  %v610_v57 = vrot.slane %v602_v53, %v6866_v44  ;;  %v617_v58 = vrot.slane %v603_v54, %v6866_v44 }
 0x1e1   : > { %v1071_v59 = vpop.permute.xlu0 %1070  ;;  %v1074_v60 = vpop.permute.xlu1 %1073 }
 0x1e2   : > { %v5665_v61 = vcombine.low %v594_v55, %v601_v56  ;;  %v5667_v62 = vcombine.high %v594_v55, %v601_v56  ;;  %v5669_v63 = vcombine.low %v610_v57, %v617_v58  ;;  %v5671_v2 = vcombine.high %v610_v57, %v617_v58 }
 0x1e3   : > { %v1112_v3 = vcombine.low %v6781_v23, %v1071_v59  ;;  %v1113_v4 = vcombine.high %v6781_v23, %v1071_v59  ;;  %v1128_v5 = vcombine.low %v1068_v49, %v1074_v60  ;;  %v1129_v6 = vcombine.high %v1068_v49, %v1074_v60 }
 0x1e4   : > { %v6879_v7 = vrot.slane %v5665_v61, %v6861_v37  ;;  %v6882_v8 = vrot.slane %v5667_v62, %v6861_v37  ;;  %v6885_v9 = vrot.slane %v5669_v63, %v6861_v37  ;;  %v6888_v10 = vrot.slane %v5671_v2, %v6861_v37 }
 0x1e5   : > { %v1120_v11 = vrot.slane %v1112_v3, %v6861_v37  ;;  %v1127_v12 = vrot.slane %v1113_v4, %v6861_v37  ;;  %v1136_v13 = vrot.slane %v1128_v5, %v6861_v37  ;;  %v1143_v14 = vrot.slane %v1129_v6, %v6861_v37  ;;  %v493_v15 = vpop.permute.xlu0 %492  ;;  %v496_v16 = vpop.permute.xlu1 %495 }
 0x1e6   : > { %v858_v17 = vcombine.low %v6879_v7, %v6882_v8  ;;  %v890_v18 = vcombine.low %v6885_v9, %v6888_v10  ;;  %v554_v23 = vcombine.low %v487_v40, %v493_v15  ;;  %v555_v24 = vcombine.high %v487_v40, %v493_v15 }
 0x1e7   : > { %v1176_v19 = vcombine.low %v1120_v11, %v1136_v13  ;;  %v1177_v20 = vcombine.high %v1120_v11, %v1136_v13  ;;  %v1192_v21 = vcombine.low %v1127_v12, %v1143_v14  ;;  %v1193_v22 = vcombine.high %v1127_v12, %v1143_v14 }
 0x1e8   : > { %v570_v25 = vcombine.low %v490_v50, %v496_v16  ;;  %v571_v26 = vcombine.high %v490_v50, %v496_v16  ;;  %v562_v34 = vrot.slane %v554_v23, %v6861_v37  ;;  %v569_v35 = vrot.slane %v555_v24, %v6861_v37 }
 0x1e9   : > { %v1184_v28 = vrot.slane %v1176_v19, %v6866_v44  ;;  %v1191_v29 = vrot.slane %v1177_v20, %v6866_v44  ;;  %v1200_v30 = vrot.slane %v1192_v21, %v6866_v44  ;;  %v1207_v31 = vrot.slane %v1193_v22, %v6866_v44  ;;  %v6902_v32 = vpop.permute.xlu0 %498  ;;  %v6904_v33 = vpop.permute.xlu1 %501 }
 0x1ea   : > { %v578_v36 = vrot.slane %v570_v25, %v6861_v37  ;;  %v585_v38 = vrot.slane %v571_v26, %v6861_v37  ;;  %v859_v58 = vcombine.high %v6879_v7, %v6882_v8  ;;  %v891_v59 = vcombine.high %v6885_v9, %v6888_v10 }
 0x1eb   : > { %v5681_v39 = vcombine.low %v1184_v28, %v1191_v29  ;;  %v5683_v40 = vcombine.high %v1184_v28, %v1191_v29  ;;  %v5685_v41 = vcombine.low %v1200_v30, %v1207_v31  ;;  %v5687_v42 = vcombine.high %v1200_v30, %v1207_v31 }
 0x1ec   : > { %v618_v43 = vcombine.low %v562_v34, %v578_v36  ;;  %v619_v45 = vcombine.high %v562_v34, %v578_v36  ;;  %v634_v46 = vcombine.low %v569_v35, %v585_v38  ;;  %v635_v47 = vcombine.high %v569_v35, %v585_v38 }
 0x1ed   : > { %v6911_v48 = vrot.slane %v5681_v39, %v6861_v37  ;;  %v6914_v49 = vrot.slane %v5683_v40, %v6861_v37  ;;  %v6917_v50 = vrot.slane %v5685_v41, %v6861_v37  ;;  %v6920_v51 = vrot.slane %v5687_v42, %v6861_v37  ;;  %v1077_v52 = vpop.permute.xlu0 %1076  ;;  %v1080_v53 = vpop.permute.xlu1 %1079 }
 0x1ee   : > { %v626_v54 = vrot.slane %v618_v43, %v6866_v44  ;;  %v633_v55 = vrot.slane %v619_v45, %v6866_v44  ;;  %v642_v56 = vrot.slane %v634_v46, %v6866_v44  ;;  %v649_v57 = vrot.slane %v635_v47, %v6866_v44 }
 0x1ef   : > { %v1448_v60 = vcombine.low %v6911_v48, %v6914_v49  ;;  %v1480_v61 = vcombine.low %v6917_v50, %v6920_v51  ;;  %v1449_v4 = vcombine.high %v6911_v48, %v6914_v49  ;;  %v1481_v5 = vcombine.high %v6917_v50, %v6920_v51 }
 0x1f0   : > { %v5666_v62 = vcombine.low %v626_v54, %v633_v55  ;;  %v5668_v63 = vcombine.high %v626_v54, %v633_v55  ;;  %v5670_v2 = vcombine.low %v642_v56, %v649_v57  ;;  %v5672_v3 = vcombine.high %v642_v56, %v649_v57 }
 0x1f1   : > { %v1083_v6 = vpop.permute.xlu0 %1082  ;;  %v1086_v11 = vpop.permute.xlu1 %1085  ;;  %v6939_v12 = vrot.slane %v1448_v60, %v6866_v44  ;;  %v6942_v13 = vrot.slane %v1480_v61, %v6866_v44  ;;  %v6951_v16 = vrot.slane %v858_v17, %v6866_v44  ;;  %v6954_v19 = vrot.slane %v890_v18, %v6866_v44 }
 0x1f2   : > { %v6945_v14 = vrot.slane %v5666_v62, %v6861_v37  ;;  %v6948_v15 = vrot.slane %v5668_v63, %v6861_v37  ;;  %v1144_v20 = vcombine.low %v1077_v52, %v1083_v6  ;;  %v1145_v21 = vcombine.high %v1077_v52, %v1083_v6 }
 0x1f3   : > { %v1160_v22 = vcombine.low %v1080_v53, %v1086_v11  ;;  %v1161_v23 = vcombine.high %v1080_v53, %v1086_v11  ;;  %v6957_v24 = vrot.slane %v5670_v2, %v6861_v37  ;;  %v6960_v25 = vrot.slane %v5672_v3, %v6861_v37 }
 0x1f4   : > { %v874_v26 = vcombine.low %v6945_v14, %v6948_v15  ;;  %v875_v17 = vcombine.high %v6945_v14, %v6948_v15  ;;  %v1152_v28 = vrot.slane %v1144_v20, %v6861_v37  ;;  %v1159_v18 = vrot.slane %v1145_v21, %v6861_v37 }
 0x1f5   : > { %v1168_v29 = vrot.slane %v1160_v22, %v6861_v37  ;;  %v1175_v30 = vrot.slane %v1161_v23, %v6861_v37  ;;  %v505_v31 = vpop.permute.xlu0 %504  ;;  %v508_v34 = vpop.permute.xlu1 %507  ;;  %v1512_v35 = vcombine.low %v6939_v12, %v6942_v13  ;;  %v922_v62 = vcombine.low %v6951_v16, %v6954_v19 }
 0x1f6   : > { %v658_v36 = vcombine.low %v6902_v32, %v505_v31  ;;  %v659_v38 = vcombine.high %v6902_v32, %v505_v31  ;;  %v674_v39 = vcombine.low %v6904_v33, %v508_v34  ;;  %v675_v47 = vcombine.high %v6904_v33, %v508_v34 }
 0x1f7   : > { %v1208_v40 = vcombine.low %v1152_v28, %v1168_v29  ;;  %v1209_v41 = vcombine.high %v1152_v28, %v1168_v29  ;;  %v1224_v42 = vcombine.low %v1159_v18, %v1175_v30  ;;  %v1225_v43 = vcombine.high %v1159_v18, %v1175_v30  ;;  %5916 = vmatpush3.xpose.msk.msra.mxu1 %vm2246_vm1, %v1512_v35 }
 0x1f8   : > { %v666_v45 = vrot.slane %v658_v36, %v6861_v37  ;;  %v673_v46 = vrot.slane %v659_v38, %v6861_v37  ;;  %v682_v52 = vrot.slane %v674_v39, %v6861_v37  ;;  %5920 = vmatprep.subr.mxu1 %v6510_v0  ;;  %v689_v60 = vrot.slane %v675_v47, %v6861_v37 }
 0x1f9   : > { %v1216_v53 = vrot.slane %v1208_v40, %v6866_v44  ;;  %v1223_v32 = vrot.slane %v1209_v41, %v6866_v44  ;;  %v1232_v54 = vrot.slane %v1224_v42, %v6866_v44  ;;  %v1239_v55 = vrot.slane %v1225_v43, %v6866_v44  ;;  %v6985_v56 = vpop.permute.xlu0 %510  ;;  %v6987_v57 = vpop.permute.xlu1 %513 }
 0x1fa   : > { %v722_v61 = vcombine.low %v666_v45, %v682_v52  ;;  %v723_v33 = vcombine.high %v666_v45, %v682_v52  ;;  %v738_v21 = vcombine.low %v673_v46, %v689_v60  ;;  %v739_v22 = vcombine.high %v673_v46, %v689_v60  ;;  %5918 = vmatmul.mubr.msk.f32.vlgmr.msra.gmra.mrb[2].mxu1 %vm2246_vm1, %v922_v62 }
 0x1fb   : > { %v5682_v63 = vcombine.low %v1216_v53, %v1223_v32  ;;  %v5684_v2 = vcombine.high %v1216_v53, %v1223_v32  ;;  %v5686_v3 = vcombine.low %v1232_v54, %v1239_v55  ;;  %v5688_v6 = vcombine.high %v1232_v54, %v1239_v55  ;;  %5922 = vmatprep.mubr.msk.f32.mxu1 %vm6512_vm0, %v6510_v0 }
 0x1fc   : > { %v730_v11 = vrot.slane %v722_v61, %v6866_v44  ;;  %v737_v20 = vrot.slane %v723_v33, %v6866_v44  ;;  %v746_v34 = vrot.slane %v738_v21, %v6866_v44  ;;  %v753_v35 = vrot.slane %v739_v22, %v6866_v44 }
 0x1fd   : > { %v6996_v23 = vrot.slane %v5682_v63, %v6861_v37  ;;  %v6999_v28 = vrot.slane %v5684_v2, %v6861_v37  ;;  %v7002_v18 = vrot.slane %v5686_v3, %v6861_v37  ;;  %v7005_v29 = vrot.slane %v5688_v6, %v6861_v37  ;;  %v1089_v30 = vpop.permute.xlu0 %1088  ;;  %v1092_v31 = vpop.permute.xlu1 %1091 }
 0x1fe   : > { %v5673_v36 = vcombine.low %v730_v11, %v737_v20  ;;  %v5675_v38 = vcombine.high %v730_v11, %v737_v20  ;;  %v906_v39 = vcombine.low %v6957_v24, %v6960_v25  ;;  %v907_v40 = vcombine.high %v6957_v24, %v6960_v25 }
 0x1ff   : > { %v1464_v41 = vcombine.low %v6996_v23, %v6999_v28  ;;  %v1465_v42 = vcombine.high %v6996_v23, %v6999_v28  ;;  %v5677_v46 = vcombine.low %v746_v34, %v753_v35  ;;  %v5679_v47 = vcombine.high %v746_v34, %v753_v35 }
 0x200   : > { %v7020_v43 = vrot.slane %v5673_v36, %v6861_v37  ;;  %v7023_v45 = vrot.slane %v5675_v38, %v6861_v37  ;;  %v1496_v52 = vcombine.low %v7002_v18, %v7005_v29  ;;  %v1513_v53 = vcombine.high %v6939_v12, %v6942_v13 }
 0x201   : > { %v1463_v32 = vrot.slane %v1449_v4, %v6866_v44  ;;  %v1495_v54 = vrot.slane %v1481_v5, %v6866_v44  ;;  %v1095_v55 = vpop.permute.xlu0 %1094  ;;  %v1098_v60 = vpop.permute.xlu1 %1097  ;;  %v1497_v61 = vcombine.high %v7002_v18, %v7005_v29  ;;  %v7040_v33 = vrot.slane %v5677_v46, %v6861_v37 }
 0x202   : > { %v7043_v12 = vrot.slane %v5679_v47, %v6861_v37  ;;  %v923_v48 = vcombine.high %v6951_v16, %v6954_v19  ;;  %v994_v49 = vcombine.low %v7020_v43, %v7023_v45  ;;  %v995_v50 = vcombine.high %v7020_v43, %v7023_v45  ;;  %5921 = vmatpush3.xpose.msk.msra.mxu1 %vm2246_vm1, %v1513_v53 }
 0x203   : > { %v873_v51 = vrot.slane %v859_v58, %v6866_v44  ;;  %v905_v4 = vrot.slane %v891_v59, %v6866_v44  ;;  %5925 = vmatprep.subr.mxu1 %v6510_v0  ;;  %v1514_v5 = vcombine.low %v1463_v32, %v1495_v54  ;;  %v1515_v13 = vcombine.high %v1463_v32, %v1495_v54 }
 0x204   : > { %v1248_v16 = vcombine.low %v1089_v30, %v1095_v55  ;;  %v1249_v19 = vcombine.high %v1089_v30, %v1095_v55  ;;  %v1026_v62 = vcombine.low %v7040_v33, %v7043_v12  ;;  %v1027_v63 = vcombine.high %v7040_v33, %v7043_v12 }
 0x205   : > { %v1264_v2 = vcombine.low %v1092_v31, %v1098_v60  ;;  %v1265_v7 = vcombine.high %v1092_v31, %v1098_v60  ;;  %v1101_v8 = vpop.permute.xlu0 %1100  ;;  %v1104_v58 = vpop.permute.xlu1 %1103  ;;  %5923 = vmatmul.mubr.msk.f32.vlgmr.msra.gmra.mrb[4].mxu1 %vm2246_vm1, %v923_v48  ;;  %v7069_v59 = vrot.slane %v1464_v41, %v6866_v44  ;;  %v7072_v3 = vrot.slane %v1496_v52, %v6866_v44 }
 0x206   : > { %v1256_v9 = vrot.slane %v1248_v16, %v6861_v37  ;;  %v1263_v10 = vrot.slane %v1249_v19, %v6861_v37  ;;  %5926 = vmatpush3.xpose.msk.msra.mxu1 %vm2246_vm1, %v1514_v5  ;;  %5927 = vmatprep.mubr.msk.f32.mxu1 %vm6512_vm0, %v6510_v0  ;;  %v924_v6 = vcombine.low %v873_v51, %v905_v4 }
 0x207   : > { %v1272_v11 = vrot.slane %v1264_v2, %v6861_v37  ;;  %v1279_v20 = vrot.slane %v1265_v7, %v6861_v37  ;;  %5930 = vmatprep.subr.mxu1 %v6510_v0  ;;  %v925_v21 = vcombine.high %v873_v51, %v905_v4  ;;  %v1516_v22 = vcombine.low %v7069_v59, %v7072_v3 }
 0x208   : > { %v7086_v30 = vrot.slane %v874_v26, %v6866_v44  ;;  %v7089_v31 = vrot.slane %v906_v39, %v6866_v44  ;;  %v1517_v47 = vcombine.high %v7069_v59, %v7072_v3  ;;  %v7128_v59 = vrot.slane %v1497_v61, %v6866_v44 }
 0x209   : > { %v1312_v34 = vcombine.low %v1256_v9, %v1272_v11  ;;  %v1313_v35 = vcombine.high %v1256_v9, %v1272_v11  ;;  %v1328_v36 = vcombine.low %v1263_v10, %v1279_v20  ;;  %v1329_v38 = vcombine.high %v1263_v10, %v1279_v20  ;;  %v1107_v41 = vpop.permute.xlu0 %1106  ;;  %v1110_v46 = vpop.permute.xlu1 %1109  ;;  %5928 = vmatmul.mubr.msk.f32.vlgmr.msra.gmra.mrb[6].mxu1 %vm2246_vm1, %v924_v6 }
 0x20a   : > { %v1280_v52 = vcombine.low %v1101_v8, %v1107_v41  ;;  %v1281_v53 = vcombine.high %v1101_v8, %v1107_v41  ;;  %v1296_v32 = vcombine.low %v1104_v58, %v1110_v46  ;;  %5931 = vmatpush3.xpose.msk.msra.mxu1 %vm2246_vm1, %v1515_v13  ;;  %5932 = vmatprep.mubr.msk.f32.mxu1 %vm6512_vm0, %v6510_v0 }
 0x20b   : > { %v1320_v26 = vrot.slane %v1312_v34, %v6866_v44  ;;  %v1327_v39 = vrot.slane %v1313_v35, %v6866_v44  ;;  %v1336_v54 = vrot.slane %v1328_v36, %v6866_v44  ;;  %v1343_v55 = vrot.slane %v1329_v38, %v6866_v44  ;;  %5935 = vmatprep.subr.mxu1 %v6510_v0 }
 0x20c   : > { %v1288_v60 = vrot.slane %v1280_v52, %v6861_v37  ;;  %v1295_v48 = vrot.slane %v1281_v53, %v6861_v37  ;;  %v1297_v51 = vcombine.high %v1104_v58, %v1110_v46  ;;  %v926_v19 = vcombine.low %v7086_v30, %v7089_v31 }
 0x20d   : > { %v5689_v4 = vcombine.low %v1320_v26, %v1327_v39  ;;  %v5691_v5 = vcombine.high %v1320_v26, %v1327_v39  ;;  %v5693_v13 = vcombine.low %v1336_v54, %v1343_v55  ;;  %v5695_v16 = vcombine.high %v1336_v54, %v1343_v55  ;;  %5933 = vmatmul.mubr.msk.f32.vlgmr.msra.gmra.mrb[8].mxu1 %vm2246_vm1, %v925_v21  ;;  %v517_v3 = vpop.permute.xlu0 %516  ;;  %v520_v61 = vpop.permute.xlu1 %519 }
 0x20e   : > { %v1304_v2 = vrot.slane %v1296_v32, %v6861_v37  ;;  %v1311_v7 = vrot.slane %v1297_v51, %v6861_v37  ;;  %v7113_v8 = vrot.slane %v1465_v42, %v6866_v44  ;;  %5936 = vmatpush3.xpose.msk.msra.mxu1 %vm2246_vm1, %v1516_v22  ;;  %v927_v10 = vcombine.high %v7086_v30, %v7089_v31 }
 0x20f   : > { %v7116_v58 = vrot.slane %v5689_v4, %v6861_v37  ;;  %v7119_v9 = vrot.slane %v5691_v5, %v6861_v37  ;;  %5937 = vmatprep.mubr.msk.f32.mxu1 %vm6512_vm0, %v6510_v0  ;;  %5940 = vmatprep.subr.mxu1 %v6510_v0  ;;  %v7134_v6 = vrot.slane %v5693_v13, %v6861_v37 }
 0x210   : > { %v1344_v23 = vcombine.low %v1288_v60, %v1304_v2  ;;  %v1345_v28 = vcombine.high %v1288_v60, %v1304_v2  ;;  %v1360_v42 = vcombine.low %v1295_v48, %v1311_v7  ;;  %v7137_v11 = vrot.slane %v5695_v16, %v6861_v37 }
 0x211   : > { %v1584_v18 = vcombine.low %v7116_v58, %v7119_v9  ;;  %v1585_v29 = vcombine.high %v7116_v58, %v7119_v9  ;;  %5938 = vmatmul.mubr.msk.f32.vlgmr.msra.gmra.mrb[10].mxu1 %vm2246_vm1, %v926_v19  ;;  %v1361_v22 = vcombine.high %v1295_v48, %v1311_v7  ;;  %v1518_v31 = vcombine.low %v7113_v8, %v7128_v59 }
 0x212   : > { %v1352_v20 = vrot.slane %v1344_v23, %v6866_v44  ;;  %v1359_v21 = vrot.slane %v1345_v28, %v6866_v44  ;;  %v1368_v30 = vrot.slane %v1360_v42, %v6866_v44  ;;  %5941 = vmatpush3.xpose.msk.msra.mxu1 %vm2246_vm1, %v1517_v47  ;;  %5942 = vmatprep.mubr.msk.f32.mxu1 %vm6512_vm0, %v6510_v0 }
 0x213   : > { %v690_v34 = vcombine.low %v6985_v56, %v517_v3  ;;  %v691_v35 = vcombine.high %v6985_v56, %v517_v3  ;;  %v1375_v36 = vrot.slane %v1361_v22, %v6866_v44  ;;  %5945 = vmatprep.subr.mxu1 %v6510_v0  ;;  %v706_v46 = vcombine.low %v6987_v57, %v520_v61 }
 0x214   : > { %v5690_v38 = vcombine.low %v1352_v20, %v1359_v21  ;;  %v5692_v41 = vcombine.high %v1352_v20, %v1359_v21  ;;  %v707_v53 = vcombine.high %v6987_v57, %v520_v61  ;;  %v889_v32 = vrot.slane %v875_v17, %v6866_v44 }
 0x215   : > { %v698_v47 = vrot.slane %v690_v34, %v6861_v37  ;;  %v705_v52 = vrot.slane %v691_v35, %v6861_v37  ;;  %v5694_v39 = vcombine.low %v1368_v30, %v1375_v36  ;;  %v5696_v54 = vcombine.high %v1368_v30, %v1375_v36  ;;  %5943 = vmatmul.mubr.msk.f32.vlgmr.msra.gmra.mrb[12].mxu1 %vm2246_vm1, %v927_v10 }
 0x216   : > { %v7165_v56 = vrot.slane %v5690_v38, %v6861_v37  ;;  %v7168_v26 = vrot.slane %v5692_v41, %v6861_v37  ;;  %5946 = vmatpush3.xpose.msk.msra.mxu1 %vm2246_vm1, %v1518_v31  ;;  %v714_v55 = vrot.slane %v706_v46, %v6861_v37  ;;  %v721_v57 = vrot.slane %v707_v53, %v6861_v37 }
 0x217   : > { %5947 = vmatprep.mubr.msk.f32.mxu1 %vm6512_vm0, %v6510_v0  ;;  %v921_v14 = vrot.slane %v907_v40, %v6866_v44  ;;  %v1616_v15 = vcombine.low %v7134_v6, %v7137_v11  ;;  %v1617_v17 = vcombine.high %v7134_v6, %v7137_v11  ;;  %v7185_v60 = vrot.slane %v5694_v39, %v6861_v37 }
 0x218   : > { %v7188_v48 = vrot.slane %v5696_v54, %v6861_v37  ;;  %5950 = vmatprep.subr.mxu1 %v6510_v0  ;;  %v754_v51 = vcombine.low %v698_v47, %v714_v55  ;;  %v755_v4 = vcombine.high %v698_v47, %v714_v55  ;;  %v770_v5 = vcombine.low %v705_v52, %v721_v57 }
 0x219   : > { %v771_v13 = vcombine.high %v705_v52, %v721_v57  ;;  %v1600_v24 = vcombine.low %v7165_v56, %v7168_v26  ;;  %v928_v40 = vcombine.low %v889_v32, %v921_v14  ;;  %v1519_v16 = vcombine.high %v7113_v8, %v7128_v59 }
 0x21a   : > { %v1632_v25 = vcombine.low %v7185_v60, %v7188_v48  ;;  %v762_v19 = vrot.slane %v754_v51, %v6866_v44  ;;  %v769_v2 = vrot.slane %v755_v4, %v6866_v44  ;;  %v778_v7 = vrot.slane %v770_v5, %v6866_v44  ;;  %v1658_v51 = vpop.permute.xlu1 %1657  ;;  %v1661_v4 = vpop.permute.xlu0 %1660 }
 0x21b   : > { %v785_v10 = vrot.slane %v771_v13, %v6866_v44  ;;  %5948 = vmatmul.mubr.msk.f32.vlgmr.msra.gmra.mrb[14].mxu1 %vm2246_vm1, %v928_v40  ;;  %v929_v23 = vcombine.high %v889_v32, %v921_v14  ;;  %v1592_v28 = vrot.slane %v1584_v18, %v6866_v44  ;;  %v1624_v42 = vrot.slane %v1616_v15, %v6866_v44 }
 0x21c   : > { %v1002_v8 = vrot.slane %v994_v49, %v6866_v44  ;;  %v5674_v59 = vcombine.low %v762_v19, %v769_v2  ;;  %v5676_v3 = vcombine.high %v762_v19, %v769_v2  ;;  %5951 = vmatpush3.xpose.msk.msra.mxu1 %vm2246_vm1, %v1519_v16  ;;  %5952 = vmatprep.mubr.msk.f32.mxu1 %vm6512_vm0, %v6510_v0 }
 0x21d   : > { %v5678_v6 = vcombine.low %v778_v7, %v785_v10  ;;  %v5680_v11 = vcombine.high %v778_v7, %v785_v10  ;;  %5960 = vmatprep.subr.mxu1 %v6510_v0  ;;  %v1648_v61 = vcombine.low %v1592_v28, %v1624_v42  ;;  %v1649_v18 = vcombine.high %v1592_v28, %v1624_v42 }
 0x21e   : > { %v1034_v20 = vrot.slane %v1026_v62, %v6866_v44  ;;  %v945_v49 = vrot.slane %v5674_v59, %v6861_v37  ;;  %v961_v21 = vrot.slane %v5676_v3, %v6861_v37  ;;  %v1599_v31 = vrot.slane %v1585_v29, %v6866_v44 }
 0x21f   : > { %v977_v22 = vrot.slane %v5678_v6, %v6861_v37  ;;  %v993_v30 = vrot.slane %v5680_v11, %v6861_v37  ;;  %5953 = vmatmul.mubr.msk.f32.vlgmr.msra.gmra.mrb[16].mxu1 %vm2246_vm1, %v929_v23  ;;  %5956 = vmatpush3.xpose.msk.msra.mxu0 %vm2246_vm1, %v1648_v61  ;;  %v1601_v62 = vcombine.high %v7165_v56, %v7168_v26 }
 0x220   : > { %v1010_v34 = vcombine.low %v945_v49, %v961_v21  ;;  %5961 = vmatpush3.xpose.msk.msra.mxu1 %vm2246_vm1, %v1649_v18  ;;  %v1058_v36 = vcombine.low %v1002_v8, %v1034_v20  ;;  %5962 = vmatprep.mubr.msk.f32.mxu1 %vm6512_vm0, %v6510_v0  ;;  %v1059_v38 = vcombine.high %v1002_v8, %v1034_v20 }
 0x221   : > { %v1042_v35 = vcombine.low %v977_v22, %v993_v30  ;;  %5965 = vmatprep.subr.mxu0 %v6510_v0  ;;  %v1631_v41 = vrot.slane %v1617_v17, %v6866_v44  ;;  %v1009_v58 = vrot.slane %v995_v50, %v6866_v44  ;;  %5970 = vmatprep.subr.mxu1 %v6510_v0 }
 0x222   : > { %5958 = vmatmul.mubr.msk.f32.vlgmr.msra.gmra.mrb[2].mxu0 %vm2246_vm1, %v1058_v36  ;;  %v1041_v9 = vrot.slane %v1027_v63, %v6866_v44  ;;  %v1608_v29 = vrot.slane %v1600_v24, %v6866_v44  ;;  %v1640_v46 = vrot.slane %v1632_v25, %v6866_v44  ;;  %v1633_v47 = vcombine.high %v7185_v60, %v7188_v48  ;;  %v1664_v24 = vpop.permute.xlu1 %1663 }
 0x223   : > { %5963 = vmatmul.mubr.msk.f32.vlgmr.msra.gmra.mrb[18].mxu1 %vm2246_vm1, %v1059_v38  ;;  %v1650_v43 = vcombine.low %v1599_v31, %v1631_v41  ;;  %v1651_v45 = vcombine.high %v1599_v31, %v1631_v41  ;;  %5967 = vmatprep.mubr.msk.f32.mxu0 %vm6512_vm0, %v6510_v0  ;;  %v1018_v33 = vrot.slane %v1010_v34, %v6866_v44 }
 0x224   : > { %5972 = vmatprep.mubr.msk.f32.mxu1 %vm6512_vm0, %v6510_v0  ;;  %v1050_v12 = vrot.slane %v1042_v35, %v6866_v44  ;;  %v1011_v50 = vcombine.high %v945_v49, %v961_v21  ;;  %v1652_v63 = vcombine.low %v1608_v29, %v1640_v46  ;;  %v1653_v52 = vcombine.high %v1608_v29, %v1640_v46 }
 0x225   : > { %5966 = vmatpush3.xpose.msk.msra.mxu0 %vm2246_vm1, %v1650_v43  ;;  %5971 = vmatpush3.xpose.msk.msra.mxu1 %vm2246_vm1, %v1651_v45  ;;  %v1043_v53 = vcombine.high %v977_v22, %v993_v30  ;;  %v1060_v32 = vcombine.low %v1009_v58, %v1041_v9  ;;  %v1061_v56 = vcombine.high %v1009_v58, %v1041_v9  ;;  %v1667_v43 = vpop.permute.xlu0 %1666 }
 0x226   : > { %5975 = vmatprep.subr.mxu0 %v6510_v0  ;;  %5980 = vmatprep.subr.mxu1 %v6510_v0  ;;  %v1615_v26 = vrot.slane %v1601_v62, %v6866_v44  ;;  %v1647_v39 = vrot.slane %v1633_v47, %v6866_v44  ;;  %v1062_v54 = vcombine.low %v1018_v33, %v1050_v12  ;;  %v1670_v45 = vpop.permute.xlu1 %1669 }
 0x227   : > { %v1063_v55 = vcombine.high %v1018_v33, %v1050_v12  ;;  %v1025_v57 = vrot.slane %v1011_v50, %v6866_v44  ;;  %v1057_v14 = vrot.slane %v1043_v53, %v6866_v44  ;;  %v1702_v5 = vcombine.low %v6836_v27, %v1661_v4 }
 0x228   : > { %5968 = vmatmul.mubr.msk.f32.vlgmr.msra.gmra.mrb[4].mxu0 %vm2246_vm1, %v1060_v32  ;;  %5973 = vmatmul.mubr.msk.f32.vlgmr.msra.gmra.mrb[20].mxu1 %vm2246_vm1, %v1061_v56  ;;  %v1654_v15 = vcombine.low %v1615_v26, %v1647_v39  ;;  %v1655_v17 = vcombine.high %v1615_v26, %v1647_v39  ;;  %v1703_v13 = vcombine.high %v6836_v27, %v1661_v4 }
 0x229   : > { %5976 = vmatpush3.xpose.msk.msra.mxu0 %vm2246_vm1, %v1652_v63  ;;  %5981 = vmatpush3.xpose.msk.msra.mxu1 %vm2246_vm1, %v1653_v52  ;;  %v1064_v60 = vcombine.low %v1025_v57, %v1057_v14  ;;  %v1065_v48 = vcombine.high %v1025_v57, %v1057_v14  ;;  %v1710_v25 = vrot.slane %v1702_v5, %v6861_v37  ;;  %v1676_v33 = vpop.permute.xlu0 %1675 }
 0x22a   : > { %5977 = vmatprep.mubr.msk.f32.mxu0 %vm6512_vm0, %v6510_v0  ;;  %5982 = vmatprep.mubr.msk.f32.mxu1 %vm6512_vm0, %v6510_v0  ;;  %v1717_v40 = vrot.slane %v1703_v13, %v6861_v37  ;;  %v1718_v16 = vcombine.low %v1658_v51, %v1664_v24  ;;  %v1719_v19 = vcombine.high %v1658_v51, %v1664_v24  ;;  %v1673_v12 = vpop.permute.xlu1 %1672 }
 0x22b   : > { %5985 = vmatprep.subr.mxu0 %v6510_v0  ;;  %5990 = vmatprep.subr.mxu1 %v6510_v0  ;;  %v1750_v50 = vcombine.low %v1670_v45, %v1676_v33  ;;  %v1751_v63 = vcombine.high %v1670_v45, %v1676_v33  ;;  %v1734_v52 = vcombine.low %v1667_v43, %v1673_v12 }
 0x22c   : > { %5978 = vmatmul.mubr.msk.f32.vlgmr.msra.gmra.mrb[6].mxu0 %vm2246_vm1, %v1062_v54  ;;  %5983 = vmatmul.mubr.msk.f32.vlgmr.msra.gmra.mrb[22].mxu1 %vm2246_vm1, %v1063_v55  ;;  %v1726_v2 = vrot.slane %v1718_v16, %v6861_v37  ;;  %v1733_v7 = vrot.slane %v1719_v19, %v6861_v37  ;;  %v1735_v53 = vcombine.high %v1667_v43, %v1673_v12 }
 0x22d   : > { %5986 = vmatpush3.xpose.msk.msra.mxu0 %vm2246_vm1, %v1654_v15  ;;  %5991 = vmatpush3.xpose.msk.msra.mxu1 %vm2246_vm1, %v1655_v17  ;;  %v1758_v32 = vrot.slane %v1750_v50, %v6861_v37  ;;  %v1765_v56 = vrot.slane %v1751_v63, %v6861_v37  ;;  %v1742_v26 = vrot.slane %v1734_v52, %v6861_v37  ;;  %v1679_v54 = vpop.permute.xlu0 %1678 }
 0x22e   : > { %5987 = vmatprep.mubr.msk.f32.mxu0 %vm6512_vm0, %v6510_v0  ;;  %5992 = vmatprep.mubr.msk.f32.mxu1 %vm6512_vm0, %v6510_v0  ;;  %v1766_v10 = vcombine.low %v1710_v25, %v1726_v2  ;;  %v1767_v23 = vcombine.high %v1710_v25, %v1726_v2  ;;  %v1782_v28 = vcombine.low %v1717_v40, %v1733_v7  ;;  %v1682_v55 = vpop.permute.xlu1 %1681 }
 0x22f   : > { %5995 = vmatprep.subr.mxu0 %v6510_v0  ;;  %6000 = vmatprep.subr.mxu1 %v6510_v0  ;;  %v1783_v42 = vcombine.high %v1717_v40, %v1733_v7  ;;  %v1749_v39 = vrot.slane %v1735_v53, %v6861_v37  ;;  %v1798_v57 = vcombine.low %v1742_v26, %v1758_v32 }
 0x230   : > { %5988 = vmatmul.mubr.msk.f32.vlgmr.msra.gmra.mrb[8].mxu0 %vm2246_vm1, %v1064_v60  ;;  %5993 = vmatmul.mubr.msk.f32.vlgmr.msra.gmra.mrb[24].mxu1 %vm2246_vm1, %v1065_v48  ;;  %v1774_v8 = vrot.slane %v1766_v10, %v6866_v44  ;;  %v1781_v59 = vrot.slane %v1767_v23, %v6866_v44  ;;  %v1790_v3 = vrot.slane %v1782_v28, %v6866_v44 }
 0x231   : > { %5997 = vmatprep.mubr.msk.f32.mxu0 %vm6512_vm0, %v6510_v0  ;;  %6002 = vmatprep.mubr.msk.f32.mxu1 %vm6512_vm0, %v6510_v0  ;;  %v1797_v6 = vrot.slane %v1783_v42, %v6866_v44  ;;  %v1799_v14 = vcombine.high %v1742_v26, %v1758_v32  ;;  %v1814_v15 = vcombine.low %v1749_v39, %v1765_v56  ;;  %v1688_v5 = vpop.permute.xlu0 %1687 }
 0x232   : > { %v5697_v11 = vcombine.low %v1774_v8, %v1781_v59  ;;  %v5699_v61 = vcombine.high %v1774_v8, %v1781_v59  ;;  %v1815_v17 = vcombine.high %v1749_v39, %v1765_v56  ;;  %v1806_v60 = vrot.slane %v1798_v57, %v6866_v44  ;;  %v1685_v13 = vpop.permute.xlu1 %1684 }
 0x233   : > { %v5701_v18 = vcombine.low %v1790_v3, %v1797_v6  ;;  %v5703_v20 = vcombine.high %v1790_v3, %v1797_v6  ;;  %v1813_v48 = vrot.slane %v1799_v14, %v6866_v44  ;;  %v1822_v51 = vrot.slane %v1814_v15, %v6866_v44 }
 0x234   : > { %v1982_v49 = vrot.slane %v5697_v11, %v6861_v37  ;;  %v1998_v21 = vrot.slane %v5699_v61, %v6861_v37  ;;  %v1829_v4 = vrot.slane %v1815_v17, %v6866_v44  ;;  %v1854_v19 = vcombine.low %v1682_v55, %v1688_v5 }
 0x235   : > { %v2014_v22 = vrot.slane %v5701_v18, %v6861_v37  ;;  %v2030_v30 = vrot.slane %v5703_v20, %v6861_v37  ;;  %v5698_v24 = vcombine.low %v1806_v60, %v1813_v48  ;;  %v5700_v25 = vcombine.high %v1806_v60, %v1813_v48 }
 0x236   : > { %v2038_v31 = vcombine.low %v1982_v49, %v1998_v21  ;;  %v2039_v41 = vcombine.high %v1982_v49, %v1998_v21  ;;  %v5702_v40 = vcombine.low %v1822_v51, %v1829_v4  ;;  %v5704_v16 = vcombine.high %v1822_v51, %v1829_v4 }
 0x237   : > { %v2070_v62 = vcombine.low %v2014_v22, %v2030_v30  ;;  %v2071_v58 = vcombine.high %v2014_v22, %v2030_v30  ;;  %v1855_v2 = vcombine.high %v1682_v55, %v1688_v5  ;;  %v1838_v7 = vcombine.low %v1679_v54, %v1685_v13 }
 0x238   : > { %v2046_v34 = vrot.slane %v2038_v31, %v6866_v44  ;;  %v7307_v9 = vrot.slane %v2039_v41, %v6866_v44  ;;  %v1839_v10 = vcombine.high %v1679_v54, %v1685_v13  ;;  %v1862_v23 = vrot.slane %v1854_v19, %v6861_v37 }
 0x239   : > { %v2078_v35 = vrot.slane %v2070_v62, %v6866_v44  ;;  %v7310_v29 = vrot.slane %v2071_v58, %v6866_v44  ;;  %v1869_v28 = vrot.slane %v1855_v2, %v6861_v37  ;;  %v1846_v42 = vrot.slane %v1838_v7, %v6861_v37 }
 0x23a   : > { %v1853_v8 = vrot.slane %v1839_v10, %v6861_v37  ;;  %v2005_v41 = vrot.slane %v5700_v25, %v6861_v37  ;;  %v2021_v58 = vrot.slane %v5702_v40, %v6861_v37  ;;  %v2037_v43 = vrot.slane %v5704_v16, %v6861_v37 }
 0x23b   : > { %v2102_v36 = vcombine.low %v2046_v34, %v2078_v35  ;;  %v2103_v38 = vcombine.high %v2046_v34, %v2078_v35  ;;  %v2104_v46 = vcombine.low %v7307_v9, %v7310_v29  ;;  %v2105_v47 = vcombine.high %v7307_v9, %v7310_v29 }
 0x23c   : > { %v1902_v59 = vcombine.low %v1846_v42, %v1862_v23  ;;  %v1903_v3 = vcombine.high %v1846_v42, %v1862_v23  ;;  %v1918_v6 = vcombine.low %v1853_v8, %v1869_v28  ;;  %v1919_v11 = vcombine.high %v1853_v8, %v1869_v28 }
 0x23d   : > { %5996 = vmatpush3.msra.mxu0 %v2102_v36  ;;  %6001 = vmatpush3.msra.mxu1 %v2103_v38  ;;  %v1989_v38 = vrot.slane %v5698_v24, %v6861_v37  ;;  %v2086_v32 = vcombine.low %v2021_v58, %v2037_v43  ;;  %v2087_v26 = vcombine.high %v2021_v58, %v2037_v43 }
 0x23e   : > { %6005 = vmatprep.subr.mxu0 %v6510_v0  ;;  %6010 = vmatprep.subr.mxu1 %v6510_v0  ;;  %v1910_v61 = vrot.slane %v1902_v59, %v6866_v44  ;;  %v1917_v18 = vrot.slane %v1903_v3, %v6866_v44  ;;  %v1926_v20 = vrot.slane %v1918_v6, %v6866_v44 }
 0x23f   : > { %v1933_v49 = vrot.slane %v1919_v11, %v6866_v44  ;;  %v2054_v53 = vcombine.low %v1989_v38, %v2005_v41  ;;  %v2055_v56 = vcombine.high %v1989_v38, %v2005_v41  ;;  %v7348_v15 = vrot.slane %v2086_v32, %v6866_v44 }
 0x240   : > { %v5705_v21 = vcombine.low %v1910_v61, %v1917_v18  ;;  %v5707_v22 = vcombine.high %v1910_v61, %v1917_v18  ;;  %v7354_v60 = vrot.slane %v2087_v26, %v6866_v44 }
 0x241   : > { %v5709_v30 = vcombine.low %v1926_v20, %v1933_v49  ;;  %v5711_v31 = vcombine.high %v1926_v20, %v1933_v49  ;;  %v7345_v14 = vrot.slane %v2054_v53, %v6866_v44  ;;  %v7351_v17 = vrot.slane %v2055_v56, %v6866_v44 }
 0x242   : > { %v2118_v45 = vrot.slane %v5705_v21, %v6861_v37  ;;  %v2134_v33 = vrot.slane %v5707_v22, %v6861_v37 }
 0x243   : > { %v2150_v12 = vrot.slane %v5709_v30, %v6861_v37  ;;  %v2166_v50 = vrot.slane %v5711_v31, %v6861_v37  ;;  %v2106_v24 = vcombine.low %v7345_v14, %v7348_v15  ;;  %v2107_v25 = vcombine.high %v7345_v14, %v7348_v15 }
 0x244   : > { %v2174_v39 = vcombine.low %v2118_v45, %v2134_v33  ;;  %v2175_v55 = vcombine.high %v2118_v45, %v2134_v33  ;;  %v2108_v40 = vcombine.low %v7351_v17, %v7354_v60  ;;  %v2109_v16 = vcombine.high %v7351_v17, %v7354_v60 }
 0x245   : > { %v2206_v54 = vcombine.low %v2150_v12, %v2166_v50  ;;  %v2207_v10 = vcombine.high %v2150_v12, %v2166_v50 }
 0x246   : > { %v7359_v4 = vrot.slane %v2174_v39, %v6866_v44  ;;  %v7365_v13 = vrot.slane %v2175_v55, %v6866_v44 }
 0x247   : > { %v7362_v5 = vrot.slane %v2206_v54, %v6866_v44  ;;  %v7384_v8 = vrot.slane %v2207_v10, %v6866_v44 }
 0x249   : > { %v2238_v2 = vcombine.low %v7359_v4, %v7362_v5  ;;  %v2239_v7 = vcombine.high %v7359_v4, %v7362_v5  ;;  %v2240_v3 = vcombine.low %v7365_v13, %v7384_v8  ;;  %v2241_v6 = vcombine.high %v7365_v13, %v7384_v8 }
 0x2cd   : > { %v2319_v62 = vpop.f32.mrb[2].mxu1 }
 0x2ce   : > { %v7332_v34 = vmul.f32 0.35355338, %v2319_v62  ;;  %v5919_v35 = vpop.f32.mrb[3].mxu1 }
 0x2d0   : > { %v3479_v36 = vsel %vm2246_vm1, %v7332_v34, -inf }
 0x2d1   : > { %3480 = vmax.xlane.f32.xlu0 %v3479_v36 }
 0x2d8   : > { %v2395_v63 = vpop.f32.mrb[4].mxu1 }
 0x2d9   : > { %v5924_v52 = vpop.f32.mrb[5].mxu1  ;;  %v7402_v45 = vmul.f32 0.35355338, %v2395_v63 }
 0x2db   : > { %v3482_v56 = vsel %vm2246_vm1, %v7402_v45, -inf }
 0x2dc   : > { %v2471_v57 = vpop.f32.mrb[6].mxu1 }
 0x2dd   : > { %v7356_v48 = vmul.f32 0.35355338, %v2471_v57  ;;  %v5929_v51 = vpop.f32.mrb[7].mxu1 }
 0x2df   : > { %v3485_v19 = vsel %vm2246_vm1, %v7356_v48, -inf }
 0x2e0   : > { %3486 = vmax.xlane.f32.xlu0 %v3485_v19  ;;  %v2547_v23 = vpop.f32.mrb[8].mxu1 }
 0x2e1   : > { %v7381_v28 = vmul.f32 0.35355338, %v2547_v23  ;;  %v5934_v42 = vpop.f32.mrb[9].mxu1 }
 0x2e3   : > { %v3488_v59 = vsel %vm2246_vm1, %v7381_v28, -inf }
 0x2e4   : > { %3489 = vmax.xlane.f32.xlu0 %v3488_v59  ;;  %v2623_v11 = vpop.f32.mrb[10].mxu1 }
 0x2e5   : > { %v5939_v61 = vpop.f32.mrb[11].mxu1 }
 0x2e8   : > { %v2699_v18 = vpop.f32.mrb[12].mxu1 }
 0x2e9   : > { %v7392_v20 = vmul.f32 0.35355338, %v2699_v18  ;;  %v5944_v49 = vpop.f32.mrb[13].mxu1 }
 0x2eb   : > { %v3494_v21 = vsel %vm2246_vm1, %v7392_v20, -inf }
 0x2ec   : > { %3495 = vmax.xlane.f32.xlu0 %v3494_v21 }
 0x2ee   : > { %v2775_v22 = vpop.f32.mrb[14].mxu1 }
 0x2ef   : > { %v5949_v30 = vpop.f32.mrb[15].mxu1 }
 0x2f2   : > { %v2851_v31 = vpop.f32.mrb[16].mxu1 }
 0x2f3   : > { %v7396_v62 = vmul.f32 0.35355338, %v2851_v31  ;;  %v5954_v35 = vpop.f32.mrb[17].mxu1 }
 0x2f5   : > { %v3500_v36 = vsel %vm2246_vm1, %v7396_v62, -inf  ;;  %v2927_v38 = vpop.f32.mrb[2].mxu0 }
 0x2f6   : > { %3501 = vmax.xlane.f32.xlu0 %v3500_v36  ;;  %v7400_v41 = vmul.f32 0.35355338, %v2927_v38  ;;  %v3003_v58 = vpop.f32.mrb[18].mxu1  ;;  %v5959_v43 = vpop.f32.mrb[3].mxu0 }
 0x2f7   : > { %v7404_v33 = vmul.f32 0.35355338, %v3003_v58  ;;  %v5964_v12 = vpop.f32.mrb[19].mxu1  ;;  %v7431_v58 = vmul.f32 0.35355338, %v2623_v11 }
 0x2f8   : > { %v3503_v50 = vsel %vm2246_vm1, %v7400_v41, -inf  ;;  %v7435_v12 = vmul.f32 0.35355338, %v2775_v22 }
 0x2f9   : > { %v3506_v52 = vsel %vm2246_vm1, %v7404_v33, -inf  ;;  %3504 = vmax.xlane.f32.xlu1 %v3503_v50  ;;  %v3491_v50 = vsel %vm2246_vm1, %v7431_v58, -inf }
 0x2fa   : > { %3507 = vmax.xlane.f32.xlu0 %v3506_v52  ;;  %v3497_v52 = vsel %vm2246_vm1, %v7435_v12, -inf }
 0x2fb   : > { %v3155_v53 = vpop.f32.mrb[20].mxu1  ;;  %v3079_v32 = vpop.f32.mrb[4].mxu0 }
 0x2fc   : > { %v7412_v26 = vmul.f32 0.35355338, %v3155_v53  ;;  %v7414_v63 = vmul.f32 0.35355338, %v3079_v32  ;;  %v5969_v39 = vpop.f32.mrb[5].mxu0  ;;  %v5974_v54 = vpop.f32.mrb[21].mxu1 }
 0x2fd   : > { %3483 = vmax.xlane.f32.xlu1 %v3482_v56 }
 0x2fe   : > { %v3512_v55 = vsel %vm2246_vm1, %v7412_v26, -inf  ;;  %v3509_v19 = vsel %vm2246_vm1, %v7414_v63, -inf }
 0x2ff   : > { %3513 = vmax.xlane.f32.xlu0 %v3512_v55  ;;  %v3231_v57 = vpop.f32.mrb[6].mxu0  ;;  %v3307_v51 = vpop.f32.mrb[22].mxu1 }
 0x300   : > { %v3475_v10 = vmul.f32 0.35355338, %v3231_v57  ;;  %v7420_v23 = vmul.f32 0.35355338, %v3307_v51  ;;  %v5979_v42 = vpop.f32.mrb[7].mxu0  ;;  %v5984_v59 = vpop.f32.mrb[23].mxu1 }
 0x301   : > { %3510 = vmax.xlane.f32.xlu1 %v3509_v19 }
 0x302   : > { %v3518_v61 = vsel %vm2246_vm1, %v7420_v23, -inf  ;;  %v3515_v21 = vsel %vm2246_vm1, %v3475_v10, -inf }
 0x303   : > { %3519 = vmax.xlane.f32.xlu0 %v3518_v61  ;;  %v3383_v18 = vpop.f32.mrb[8].mxu0  ;;  %v3459_v49 = vpop.f32.mrb[24].mxu1 }
 0x304   : > { %v7425_v30 = vmul.f32 0.35355338, %v3383_v18  ;;  %v7427_v31 = vmul.f32 0.35355338, %v3459_v49  ;;  %v5989_v35 = vpop.f32.mrb[9].mxu0  ;;  %v5994_v36 = vpop.f32.mrb[25].mxu1 }
 0x305   : > { %3516 = vmax.xlane.f32.xlu1 %v3515_v21 }
 0x306   : > { %v3524_v38 = vsel %vm2246_vm1, %v7427_v31, -inf  ;;  %v3521_v43 = vsel %vm2246_vm1, %v7425_v30, -inf }
 0x307   : > { %3525 = vmax.xlane.f32.xlu0 %v3524_v38 }
 0x309   : > { %3522 = vmax.xlane.f32.xlu1 %v3521_v43 }
 0x30d   : > { %3492 = vmax.xlane.f32.xlu1 %v3491_v50 }
 0x311   : > { %3498 = vmax.xlane.f32.xlu1 %v3497_v52 }
 0x31d   : > { %1690 = vrot.lane.b32.xlu0 %v6836_v27, %s6524_s23 }
 0x322   : > { %1693 = vrot.lane.b32.xlu1 %v6836_v27, %s6525_s24 }
 0x35e   : > { %v3481_v11 = vpop.xlane.xlu0 %3480 }
 0x35f   : > { %v3527_v53 = vsub.f32 %v7332_v34, %v3481_v11 }
 0x361   : > { %v3543_v32 = vmul.f32 1.442695, %v3527_v53 }
 0x363   : > { %6281 = vpow2.f32 %v3543_v32 }
 0x36d   : > { %v7446_v22 = vpop.eup %6281  ;;  %v3487_v39 = vpop.xlane.xlu0 %3486 }
 0x36e   : > { %v3575_v56 = vsel %vm2246_vm1, %v7446_v22, 0.0  ;;  %v3529_v57 = vsub.f32 %v7356_v48, %v3487_v39 }
 0x36f   : > { %3576 = vadd.xlane.f32.xlu1 %v3575_v56 }
 0x370   : > { %v3547_v59 = vmul.f32 1.442695, %v3529_v57 }
 0x371   : > { %v3490_v54 = vpop.xlane.xlu0 %3489 }
 0x372   : > { %v3530_v21 = vsub.f32 %v7381_v28, %v3490_v54 }
 0x374   : > { %v3549_v48 = vmul.f32 1.442695, %v3530_v21 }
 0x379   : > { %v3496_v55 = vpop.xlane.xlu0 %3495 }
 0x383   : > { %v3502_v51 = vpop.xlane.xlu0 %3501 }
 0x384   : > { %v3534_v57 = vsub.f32 %v7396_v62, %v3502_v51 }
 0x386   : > { %v3505_v19 = vpop.xlane.xlu1 %3504 }
 0x387   : > { %v3535_v42 = vsub.f32 %v7400_v41, %v3505_v19  ;;  %v3508_v49 = vpop.xlane.xlu0 %3507 }
 0x389   : > { %v3559_v61 = vmul.f32 1.442695, %v3535_v42 }
 0x38a   : > { %v3484_v34 = vpop.xlane.xlu1 %3483 }
 0x38b   : > { %6283 = vpow2.f32 %v3559_v61  ;;  %v3528_v18 = vsub.f32 %v7402_v45, %v3484_v34  ;;  %v3532_v45 = vsub.f32 %v7392_v20, %v3496_v55  ;;  %v3557_v34 = vmul.f32 1.442695, %v3534_v57 }
 0x38c   : > { %6285 = vpow2.f32 %v3547_v59  ;;  %v3514_v50 = vpop.xlane.xlu0 %3513 }
 0x38d   : > { %v3545_v35 = vmul.f32 1.442695, %v3528_v18  ;;  %v3538_v62 = vsub.f32 %v7412_v26, %v3514_v50 }
 0x38e   : > { %v3511_v36 = vpop.xlane.xlu1 %3510 }
 0x38f   : > { %6287 = vpow2.f32 %v3545_v35  ;;  %v3537_v38 = vsub.f32 %v7414_v63, %v3511_v36 }
 0x390   : > { %v3520_v39 = vpop.xlane.xlu0 %3519 }
 0x391   : > { %v3563_v43 = vmul.f32 1.442695, %v3537_v38 }
 0x392   : > { %v3517_v52 = vpop.xlane.xlu1 %3516 }
 0x393   : > { %6289 = vpow2.f32 %v3563_v43  ;;  %v3539_v41 = vsub.f32 %v3475_v10, %v3517_v52  ;;  %v3553_v10 = vmul.f32 1.442695, %v3532_v45 }
 0x394   : > { %6291 = vpow2.f32 %v3549_v48  ;;  %v3526_v18 = vpop.xlane.xlu0 %3525  ;;  %v3565_v48 = vmul.f32 1.442695, %v3538_v62 }
 0x395   : > { %v7455_v11 = vpop.eup %6283  ;;  %v3567_v53 = vmul.f32 1.442695, %v3539_v41  ;;  %v3542_v26 = vsub.f32 %v7427_v31, %v3526_v18 }
 0x396   : > { %v3523_v32 = vpop.xlane.xlu1 %3522  ;;  %v3599_v28 = vsel %vm2246_vm1, %v7455_v11, 0.0  ;;  %v7460_v56 = vpop.eup %6285 }
 0x397   : > { %6293 = vpow2.f32 %v3567_v53  ;;  %v3541_v63 = vsub.f32 %v7425_v30, %v3523_v32  ;;  %3600 = vadd.xlane.f32.xlu1 %v3599_v28  ;;  %v3581_v20 = vsel %vm2246_vm1, %v7460_v56, 0.0  ;;  %v3536_v30 = vsub.f32 %v7404_v33, %v3508_v49 }
 0x398   : > { %v3540_v33 = vsub.f32 %v7420_v23, %v3520_v39  ;;  %v3573_v23 = vmul.f32 1.442695, %v3542_v26 }
 0x399   : > { %v7463_v54 = vpop.eup %6287  ;;  %v3571_v19 = vmul.f32 1.442695, %v3541_v63  ;;  %v3561_v38 = vmul.f32 1.442695, %v3536_v30 }
 0x39a   : > { %v3493_v42 = vpop.xlane.xlu1 %3492  ;;  %v3578_v55 = vsel %vm2246_vm1, %v7463_v54, 0.0 }
 0x39b   : > { %6295 = vpow2.f32 %v3571_v19  ;;  %v3531_v59 = vsub.f32 %v7431_v58, %v3493_v42  ;;  %3582 = vadd.xlane.f32.xlu1 %v3581_v20  ;;  %3579 = vadd.xlane.f32.xlu0 %v3578_v55 }
 0x39c   : > { %6297 = vpow2.f32 %v3553_v10 }
 0x39d   : > { %v7472_v61 = vpop.eup %6289  ;;  %v3551_v51 = vmul.f32 1.442695, %v3531_v59 }
 0x39e   : > { %v3499_v21 = vpop.xlane.xlu1 %3498  ;;  %v3605_v35 = vsel %vm2246_vm1, %v7472_v61, 0.0  ;;  %v7477_v36 = vpop.eup %6291 }
 0x39f   : > { %6299 = vpow2.f32 %v3551_v51  ;;  %v3533_v58 = vsub.f32 %v7435_v12, %v3499_v21  ;;  %3606 = vadd.xlane.f32.xlu0 %v3605_v35  ;;  %v3584_v50 = vsel %vm2246_vm1, %v7477_v36, 0.0  ;;  %v3569_v12 = vmul.f32 1.442695, %v3540_v33 }
 0x3a0   : > { %6301 = vpow2.f32 %v3557_v34 }
 0x3a1   : > { %v7481_v49 = vpop.eup %6293  ;;  %v3555_v43 = vmul.f32 1.442695, %v3533_v58  ;;  %v7538_v58 = vpop.permute.xlu0 %1690 }
 0x3a2   : > { %v3611_v52 = vsel %vm2246_vm1, %v7481_v49, 0.0  ;;  %v7528_v51 = vpop.permute.xlu1 %1693 }
 0x3a3   : > { %6303 = vpow2.f32 %v3555_v43  ;;  %3585 = vadd.xlane.f32.xlu0 %v3584_v50  ;;  %3612 = vadd.xlane.f32.xlu1 %v3611_v52 }
 0x3a4   : > { %6305 = vpow2.f32 %v3561_v38 }
 0x3a5   : > { %v7488_v41 = vpop.eup %6295  ;;  %6307 = vpow2.f32 %v3565_v48 }
 0x3a6   : > { %v3617_v45 = vsel %vm2246_vm1, %v7488_v41, 0.0  ;;  %v7492_v31 = vpop.eup %6297  ;;  %6309 = vpow2.f32 %v3569_v12 }
 0x3a7   : > { %3618 = vadd.xlane.f32.xlu0 %v3617_v45  ;;  %6311 = vpow2.f32 %v3573_v23  ;;  %v3590_v32 = vsel %vm2246_vm1, %v7492_v31, 0.0 }
 0x3a9   : > { %v7494_v53 = vpop.eup %6299 }
 0x3aa   : > { %v3587_v28 = vsel %vm2246_vm1, %v7494_v53, 0.0  ;;  %v7500_v63 = vpop.eup %6301 }
 0x3ab   : > { %3591 = vadd.xlane.f32.xlu0 %v3590_v32  ;;  %3588 = vadd.xlane.f32.xlu1 %v3587_v28  ;;  %v3596_v57 = vsel %vm2246_vm1, %v7500_v63, 0.0 }
 0x3ad   : > { %v7502_v39 = vpop.eup %6303 }
 0x3ae   : > { %v7504_v10 = vpop.eup %6305  ;;  %v3593_v19 = vsel %vm2246_vm1, %v7502_v39, 0.0 }
 0x3af   : > { %v7510_v42 = vpop.eup %6307  ;;  %3597 = vadd.xlane.f32.xlu1 %v3596_v57  ;;  %3594 = vadd.xlane.f32.xlu0 %v3593_v19  ;;  %v3602_v59 = vsel %vm2246_vm1, %v7504_v10, 0.0 }
 0x3b0   : > { %v7512_v20 = vpop.eup %6309  ;;  %v3608_v55 = vsel %vm2246_vm1, %v7510_v42, 0.0 }
 0x3b1   : > { %v7518_v30 = vpop.eup %6311  ;;  %v3614_v62 = vsel %vm2246_vm1, %v7512_v20, 0.0 }
 0x3b2   : > { %v3620_v34 = vsel %vm2246_vm1, %v7518_v30, 0.0 }
 0x3b3   : > { %3609 = vadd.xlane.f32.xlu1 %v3608_v55  ;;  %3603 = vadd.xlane.f32.xlu0 %v3602_v59 }
 0x3b7   : > { %3621 = vadd.xlane.f32.xlu1 %v3620_v34  ;;  %3615 = vadd.xlane.f32.xlu0 %v3614_v62 }
 0x3c8   : > { %1696 = vrot.lane.b32.xlu1 %v6836_v27, %s6526_s26 }
 0x3cd   : > { %1699 = vrot.lane.b32.xlu0 %v6836_v27, %s6527_s15 }
 0x3fc   : > { %v3577_v18 = vpop.xlane.xlu1 %3576 }
 0x3fd   : > { %6313 = vrcp.f32 %v3577_v18 }
 0x407   : > { %v6314_v21 = vpop.eup %6313 }
 0x408   : > { %v3639_v35 = vmul.f32 %v6314_v21, %v7446_v22 }
 0x40a   : > { %5998 = vmatmul.mubr.msk.f32.vlgmr.msra.gmra.mrb[10].mxu0 %vm2246_vm1, %v3639_v35 }
 0x40b   : > { %6006 = vmatpush3.msra.mxu0 %v2104_v46  ;;  %6007 = vmatprep.mubr.msk.f32.mxu0 %vm6512_vm0, %v6510_v0 }
 0x40c   : > { %6015 = vmatprep.subr.mxu0 %v6510_v0 }
 0x424   : > { %v3601_v27 = vpop.xlane.xlu1 %3600 }
 0x428   : > { %v3580_v38 = vpop.xlane.xlu0 %3579  ;;  %v3583_v33 = vpop.xlane.xlu1 %3582 }
 0x429   : > { %6315 = vrcp.f32 %v3580_v38 }
 0x42a   : > { %6317 = vrcp.f32 %v3583_v33 }
 0x42c   : > { %v3607_v48 = vpop.xlane.xlu0 %3606 }
 0x430   : > { %v3586_v22 = vpop.xlane.xlu0 %3585  ;;  %v7541_v46 = vpop.xlane.xlu1 %3612 }
 0x431   : > { %6319 = vrcp.f32 %v3586_v22 }
 0x433   : > { %v6316_v26 = vpop.eup %6315 }
 0x434   : > { %v6318_v43 = vpop.eup %6317  ;;  %v3640_v50 = vmul.f32 %v6316_v26, %v7463_v54  ;;  %v7543_v52 = vpop.xlane.xlu0 %3618 }
 0x435   : > { %v3641_v12 = vmul.f32 %v6318_v43, %v7460_v56 }
 0x436   : > { %6003 = vmatmul.mubr.msk.f32.vlgmr.msra.gmra.mrb[26].mxu1 %vm2246_vm1, %v3640_v50 }
 0x437   : > { %6008 = vmatmul.mubr.msk.f32.vlgmr.msra.gmra.mrb[12].mxu0 %vm2246_vm1, %v3641_v12  ;;  %6011 = vmatpush3.msra.mxu1 %v2105_v47 }
 0x438   : > { %6016 = vmatpush3.msra.mxu0 %v2106_v24  ;;  %v3592_v23 = vpop.xlane.xlu0 %3591  ;;  %v3589_v54 = vpop.xlane.xlu1 %3588  ;;  %6012 = vmatprep.mubr.msk.f32.mxu1 %vm6512_vm0, %v6510_v0 }
 0x439   : > { %6321 = vrcp.f32 %v3592_v23  ;;  %6020 = vmatprep.subr.mxu1 %v6510_v0  ;;  %6017 = vmatprep.mubr.msk.f32.mxu0 %vm6512_vm0, %v6510_v0 }
 0x43a   : > { %6323 = vrcp.f32 %v3589_v54  ;;  %6025 = vmatprep.subr.mxu0 %v6510_v0 }
 0x43b   : > { %v6320_v9 = vpop.eup %6319 }
 0x43c   : > { %v3642_v29 = vmul.f32 %v6320_v9, %v7477_v36  ;;  %v3595_v47 = vpop.xlane.xlu0 %3594  ;;  %v3598_v56 = vpop.xlane.xlu1 %3597 }
 0x43d   : > { %6325 = vrcp.f32 %v3595_v47 }
 0x43e   : > { %6327 = vrcp.f32 %v3598_v56  ;;  %6013 = vmatmul.mubr.msk.f32.vlgmr.msra.gmra.mrb[28].mxu1 %vm2246_vm1, %v3642_v29 }
 0x43f   : > { %6021 = vmatpush3.msra.mxu1 %v2107_v25  ;;  %6022 = vmatprep.mubr.msk.f32.mxu1 %vm6512_vm0, %v6510_v0  ;;  %6329 = vrcp.f32 %v3601_v27 }
 0x440   : > { %v3604_v24 = vpop.xlane.xlu0 %3603  ;;  %v3610_v45 = vpop.xlane.xlu1 %3609  ;;  %6030 = vmatprep.subr.mxu1 %v6510_v0 }
 0x441   : > { %6331 = vrcp.f32 %v3604_v24 }
 0x442   : > { %6333 = vrcp.f32 %v3607_v48 }
 0x443   : > { %v6322_v36 = vpop.eup %6321  ;;  %6335 = vrcp.f32 %v3610_v45 }
 0x444   : > { %v6324_v32 = vpop.eup %6323  ;;  %v3644_v28 = vmul.f32 %v6322_v36, %v7492_v31  ;;  %v3616_v57 = vpop.xlane.xlu0 %3615  ;;  %6337 = vrcp.f32 %v7541_v46 }
 0x445   : > { %v3622_v19 = vpop.xlane.xlu1 %3621  ;;  %v3643_v14 = vmul.f32 %v6324_v32, %v7494_v53  ;;  %6339 = vrcp.f32 %v3616_v57 }
 0x446   : > { %6023 = vmatmul.mubr.msk.f32.vlgmr.msra.gmra.mrb[30].mxu1 %vm2246_vm1, %v3644_v28  ;;  %6341 = vrcp.f32 %v7543_v52 }
 0x447   : > { %v6326_v15 = vpop.eup %6325  ;;  %6018 = vmatmul.mubr.msk.f32.vlgmr.msra.gmra.mrb[14].mxu0 %vm2246_vm1, %v3643_v14  ;;  %6031 = vmatpush3.msra.mxu1 %v2109_v16  ;;  %6343 = vrcp.f32 %v3622_v19 }
 0x448   : > { %v6328_v25 = vpop.eup %6327  ;;  %v3645_v55 = vmul.f32 %v6326_v15, %v7502_v39  ;;  %6026 = vmatpush3.msra.mxu0 %v2108_v40  ;;  %v1700_v31 = vpop.permute.xlu0 %1699  ;;  %6027 = vmatprep.mubr.msk.f32.mxu0 %vm6512_vm0, %v6510_v0 }
 0x449   : > { %v1697_v59 = vpop.permute.xlu1 %1696  ;;  %v3646_v53 = vmul.f32 %v6328_v25, %v7500_v63  ;;  %v1886_v34 = vcombine.low %v7528_v51, %v1700_v31  ;;  %v1887_v62 = vcombine.high %v7528_v51, %v1700_v31  ;;  %6032 = vmatprep.mubr.msk.f32.mxu1 %vm6512_vm0, %v6510_v0  ;;  %v6330_v39 = vpop.eup %6329  ;;  %6035 = vmatprep.subr.mxu0 %v6510_v0 }
 0x44a   : > { %v1870_v16 = vcombine.low %v7538_v58, %v1697_v59  ;;  %v1871_v17 = vcombine.high %v7538_v58, %v1697_v59  ;;  %6040 = vmatprep.subr.mxu1 %v6510_v0  ;;  %v3647_v58 = vmul.f32 %v6330_v39, %v7455_v11 }
 0x44b   : > { %v6332_v60 = vpop.eup %6331  ;;  %v1894_v40 = vrot.slane %v1886_v34, %v6861_v37  ;;  %v1901_v63 = vrot.slane %v1887_v62, %v6861_v37  ;;  %6028 = vmatmul.mubr.msk.f32.vlgmr.msra.gmra.mrb[16].mxu0 %vm2246_vm1, %v3645_v55  ;;  %6033 = vmatmul.mubr.msk.f32.vlgmr.msra.gmra.mrb[32].mxu1 %vm2246_vm1, %v3646_v53 }
 0x44c   : > { %v1878_v18 = vrot.slane %v1870_v16, %v6861_v37  ;;  %v3648_v51 = vmul.f32 %v6332_v60, %v7504_v10  ;;  %v1885_v21 = vrot.slane %v1871_v17, %v6861_v37  ;;  %6036 = vmatpush3.msra.mxu0 %v2238_v2  ;;  %6041 = vmatpush3.msra.mxu1 %v2239_v7  ;;  %v6334_v35 = vpop.eup %6333 }
 0x44d   : > { %6037 = vmatprep.mubr.msk.f32.mxu0 %vm6512_vm0, %v6510_v0  ;;  %6042 = vmatprep.mubr.msk.f32.mxu1 %vm6512_vm0, %v6510_v0  ;;  %v6336_v10 = vpop.eup %6335  ;;  %v3649_v7 = vmul.f32 %v6334_v35, %v7472_v61 }
 0x44e   : > { %v1934_v27 = vcombine.low %v1878_v18, %v1894_v40  ;;  %v1935_v38 = vcombine.high %v1878_v18, %v1894_v40  ;;  %v1950_v2 = vcombine.low %v1885_v21, %v1901_v63  ;;  %v1951_v33 = vcombine.high %v1885_v21, %v1901_v63  ;;  %6045 = vmatprep.subr.mxu0 %v6510_v0  ;;  %v6338_v23 = vpop.eup %6337 }
 0x44f   : > { %6050 = vmatprep.subr.mxu1 %v6510_v0  ;;  %6038 = vmatmul.mubr.msk.f32.vlgmr.msra.gmra.mrb[18].mxu0 %vm2246_vm1, %v3647_v58  ;;  %v3650_v22 = vmul.f32 %v6336_v10, %v7510_v42  ;;  %v6340_v9 = vpop.eup %6339  ;;  %v3651_v32 = vmul.f32 %v6338_v23, %v7481_v49 }
 0x450   : > { %v1942_v4 = vrot.slane %v1934_v27, %v6866_v44  ;;  %v1949_v5 = vrot.slane %v1935_v38, %v6866_v44  ;;  %6043 = vmatmul.mubr.msk.f32.vlgmr.msra.gmra.mrb[34].mxu1 %vm2246_vm1, %v3648_v51  ;;  %v1958_v11 = vrot.slane %v1950_v2, %v6866_v44  ;;  %v1965_v48 = vrot.slane %v1951_v33, %v6866_v44  ;;  %v6342_v36 = vpop.eup %6341 }
 0x451   : > { %6046 = vmatpush3.msra.mxu0 %v2240_v3  ;;  %6051 = vmatpush3.msra.mxu1 %v2241_v6  ;;  %v3652_v28 = vmul.f32 %v6340_v9, %v7512_v20  ;;  %v6344_v57 = vpop.eup %6343  ;;  %v3653_v15 = vmul.f32 %v6342_v36, %v7488_v41 }
 0x452   : > { %v5706_v26 = vcombine.low %v1942_v4, %v1949_v5  ;;  %v5708_v43 = vcombine.high %v1942_v4, %v1949_v5  ;;  %6047 = vmatprep.mubr.msk.f32.mxu0 %vm6512_vm0, %v6510_v0  ;;  %6052 = vmatprep.mubr.msk.f32.mxu1 %vm6512_vm0, %v6510_v0  ;;  %v5710_v61 = vcombine.low %v1958_v11, %v1965_v48 }
 0x453   : > { %v5712_v50 = vcombine.high %v1958_v11, %v1965_v48  ;;  %6055 = vmatprep.subr.mxu0 %v6510_v0  ;;  %6060 = vmatprep.subr.mxu1 %v6510_v0  ;;  %v3654_v25 = vmul.f32 %v6344_v57, %v7518_v30 }
 0x454   : > { %v2125_v13 = vrot.slane %v5706_v26, %v6861_v37  ;;  %v2141_v8 = vrot.slane %v5708_v43, %v6861_v37  ;;  %6048 = vmatmul.mubr.msk.f32.vlgmr.msra.gmra.mrb[20].mxu0 %vm2246_vm1, %v3649_v7  ;;  %6053 = vmatmul.mubr.msk.f32.vlgmr.msra.gmra.mrb[36].mxu1 %vm2246_vm1, %v3650_v22  ;;  %v2157_v3 = vrot.slane %v5710_v61, %v6861_v37  ;;  %v5456_v22 = vld [vmem:[#allocation7] sm:$0xff]  ;;  %v5457_v26 = vld [vmem:[#allocation7 + $0x8] sm:$0xff] }
 0x455   : > { %v2173_v6 = vrot.slane %v5712_v50, %v6861_v37  ;;  %6057 = vmatprep.mubr.msk.f32.mxu0 %vm6512_vm0, %v6510_v0  ;;  %6062 = vmatprep.mubr.msk.f32.mxu1 %vm6512_vm0, %v6510_v0 }
 0x456   : > { %v2190_v42 = vcombine.low %v2125_v13, %v2141_v8  ;;  %v2191_v46 = vcombine.high %v2125_v13, %v2141_v8  ;;  %v6167_v8 = vpack.c.bf16 %v5457_v26, %v5456_v22 }
 0x457   : > { %v2222_v52 = vcombine.low %v2157_v3, %v2173_v6  ;;  %v2223_v12 = vcombine.high %v2157_v3, %v2173_v6 }
 0x458   : > { %v2198_v54 = vrot.slane %v2190_v42, %v6866_v44  ;;  %v2205_v47 = vrot.slane %v2191_v46, %v6866_v44 }
 0x459   : > { %v2230_v29 = vrot.slane %v2222_v52, %v6866_v44  ;;  %v2237_v56 = vrot.slane %v2223_v12, %v6866_v44 }
 0x45b   : > { %v2242_v24 = vcombine.low %v2198_v54, %v2230_v29  ;;  %v2243_v45 = vcombine.high %v2198_v54, %v2230_v29  ;;  %v2244_v19 = vcombine.low %v2205_v47, %v2237_v56  ;;  %v2245_v14 = vcombine.high %v2205_v47, %v2237_v56 }
 0x45d   : > { %6056 = vmatpush3.msra.mxu0 %v2242_v24  ;;  %6061 = vmatpush3.msra.mxu1 %v2243_v45 }
 0x45e   : > { %6058 = vmatmul.mubr.msk.f32.vlgmr.msra.gmra.mrb[22].mxu0 %vm2246_vm1, %v3651_v32  ;;  %6063 = vmatmul.mubr.msk.f32.vlgmr.msra.gmra.mrb[38].mxu1 %vm2246_vm1, %v3652_v28 }
 0x45f   : > { %6065 = vmatprep.subr.mxu0 %v6510_v0  ;;  %6070 = vmatprep.subr.mxu1 %v6510_v0 }
 0x460   : > { %6066 = vmatpush3.msra.mxu0 %v2244_v19  ;;  %6071 = vmatpush3.msra.mxu1 %v2245_v14 }
 0x461   : > { %6067 = vmatprep.mubr.msk.f32.mxu0 %vm6512_vm0, %v6510_v0  ;;  %6072 = vmatprep.mubr.msk.f32.mxu1 %vm6512_vm0, %v6510_v0 }
 0x462   : > { %6068 = vmatmul.mubr.msk.f32.vlgmr.msra.gmra.mrb[24].mxu0 %vm2246_vm1, %v3653_v15  ;;  %6073 = vmatmul.mubr.msk.f32.vlgmr.msra.gmra.mrb[40].mxu1 %vm2246_vm1, %v3654_v25 }
 0x463   : > { %6166 = vmatprep.subr.bf16.mxu0 %v6511_v1  ;;  %6107 = vmatprep.mubr.msk.f32.mxu0 %vm6512_vm0, %v6510_v0 }
 0x464   : > { %6168 = vmatpush3.bf16.msra.mxu0 %v6167_v8 }
 0x465   : > { %6169 = vmatprep.subr.bf16.mxu0 %v6511_v1 }
 0x4dd   : > { %v3724_v49 = vpop.f32.mrb[10].mxu0 }
 0x4de   : > { %v5999_v41 = vpop.f32.mrb[11].mxu0 }
 0x509   : > { %v3797_v20 = vpop.f32.mrb[26].mxu1 }
 0x50a   : > { %v3870_v30 = vpop.f32.mrb[12].mxu0  ;;  %v6004_v55 = vpop.f32.mrb[27].mxu1 }
 0x50b   : > { %v4823_v31 = vcombine.low %v3724_v49, %v3870_v30  ;;  %v4824_v59 = vcombine.high %v3724_v49, %v3870_v30  ;;  %v6009_v53 = vpop.f32.mrb[13].mxu0 }
 0x50d   : > { %v4831_v17 = vrot.slane %v4823_v31, %v6861_v37  ;;  %v4838_v60 = vrot.slane %v4824_v59, %v6861_v37 }
 0x511   : > { %v3943_v34 = vpop.f32.mrb[28].mxu1 }
 0x512   : > { %v4839_v62 = vcombine.low %v3797_v20, %v3943_v34  ;;  %v4840_v16 = vcombine.high %v3797_v20, %v3943_v34  ;;  %v6014_v39 = vpop.f32.mrb[29].mxu1 }
 0x514   : > { %v4847_v40 = vrot.slane %v4839_v62, %v6861_v37  ;;  %v4854_v0 = vrot.slane %v4840_v16, %v6861_v37 }
 0x516   : > { %v4887_v63 = vcombine.low %v4831_v17, %v4847_v40  ;;  %v4888_v18 = vcombine.high %v4831_v17, %v4847_v40  ;;  %v4903_v51 = vcombine.low %v4838_v60, %v4854_v0  ;;  %v4904_v21 = vcombine.high %v4838_v60, %v4854_v0  ;;  %v5458_v40 = vld [vmem:[#allocation7 + $0x10] sm:$0xff]  ;;  %v5459_v0 = vld [vmem:[#allocation7 + $0x18] sm:$0xff] }
 0x518   : > { %v4895_v35 = vrot.slane %v4887_v63, %v6866_v44  ;;  %v4902_v58 = vrot.slane %v4888_v18, %v6866_v44  ;;  %v4911_v27 = vrot.slane %v4903_v51, %v6866_v44  ;;  %v4918_v38 = vrot.slane %v4904_v21, %v6866_v44 }
 0x519   : > { %v4089_v10 = vpop.f32.mrb[30].mxu1  ;;  %v6170_v51 = vpack.c.bf16 %v5459_v0, %v5458_v40 }
 0x51a   : > { %v5761_v2 = vcombine.low %v4895_v35, %v4902_v58  ;;  %v5763_v33 = vcombine.high %v4895_v35, %v4902_v58  ;;  %v5765_v4 = vcombine.low %v4911_v27, %v4918_v38  ;;  %v5767_v5 = vcombine.high %v4911_v27, %v4918_v38  ;;  %v4016_v7 = vpop.f32.mrb[14].mxu0  ;;  %v6024_v11 = vpop.f32.mrb[31].mxu1 }
 0x51b   : > { %v6019_v48 = vpop.f32.mrb[15].mxu0  ;;  %6171 = vmatpush3.bf16.msra.mxu0 %v6170_v51 }
 0x51c   : > { %v5103_v43 = vrot.slane %v5761_v2, %v6861_v37  ;;  %v5119_v61 = vrot.slane %v5763_v33, %v6861_v37  ;;  %v5135_v50 = vrot.slane %v5765_v4, %v6861_v37  ;;  %v5151_v13 = vrot.slane %v5767_v5, %v6861_v37  ;;  %6172 = vmatprep.subr.bf16.mxu0 %v6511_v1 }
 0x51e   : > { %v4162_v3 = vpop.f32.mrb[16].mxu0  ;;  %v4235_v6 = vpop.f32.mrb[32].mxu1  ;;  %v5160_v42 = vcombine.high %v5103_v43, %v5119_v61  ;;  %v5192_v46 = vcombine.high %v5135_v50, %v5151_v13  ;;  %v5159_v52 = vcombine.low %v5103_v43, %v5119_v61  ;;  %v5191_v12 = vcombine.low %v5135_v50, %v5151_v13 }
 0x51f   : > { %v4855_v23 = vcombine.low %v4016_v7, %v4162_v3  ;;  %v4856_v54 = vcombine.high %v4016_v7, %v4162_v3  ;;  %v4871_v9 = vcombine.low %v4089_v10, %v4235_v6  ;;  %v4872_v29 = vcombine.high %v4089_v10, %v4235_v6  ;;  %v6029_v47 = vpop.f32.mrb[17].mxu0  ;;  %v6034_v56 = vpop.f32.mrb[33].mxu1 }
 0x520   : > { %v5174_v24 = vrot.slane %v5160_v42, %v6866_v44  ;;  %v5206_v45 = vrot.slane %v5192_v46, %v6866_v44  ;;  %v7678_v36 = vrot.slane %v5159_v52, %v6866_v44  ;;  %v7681_v32 = vrot.slane %v5191_v12, %v6866_v44 }
 0x521   : > { %v4863_v28 = vrot.slane %v4855_v23, %v6861_v37  ;;  %v4870_v57 = vrot.slane %v4856_v54, %v6861_v37  ;;  %v4879_v19 = vrot.slane %v4871_v9, %v6861_v37  ;;  %v4886_v14 = vrot.slane %v4872_v29, %v6861_v37 }
 0x522   : > { %v4308_v15 = vpop.f32.mrb[18].mxu0  ;;  %v5225_v49 = vcombine.low %v5174_v24, %v5206_v45  ;;  %v5224_v41 = vcombine.high %v7678_v36, %v7681_v32  ;;  %v5226_v20 = vcombine.high %v5174_v24, %v5206_v45  ;;  %v5223_v30 = vcombine.low %v7678_v36, %v7681_v32 }
 0x523   : > { %v4381_v25 = vpop.f32.mrb[34].mxu1  ;;  %v4919_v55 = vcombine.low %v4863_v28, %v4879_v19  ;;  %v4920_v31 = vcombine.high %v4863_v28, %v4879_v19  ;;  %v4935_v59 = vcombine.low %v4870_v57, %v4886_v14  ;;  %v4936_v53 = vcombine.high %v4870_v57, %v4886_v14  ;;  %v6039_v34 = vpop.f32.mrb[19].mxu0  ;;  %v5460_v28 = vld [vmem:[#allocation7 + $0x20] sm:$0xff]  ;;  %v5461_v57 = vld [vmem:[#allocation7 + $0x28] sm:$0xff] }
 0x524   : > { %v6044_v62 = vpop.f32.mrb[35].mxu1  ;;  %5372 = vrot.lane.b32.xlu0 %v5225_v49, %s6526_s26  ;;  %5368 = vrot.lane.b32.xlu1 %v5224_v41, %s6527_s15  ;;  %v5463_v34 = vld [vmem:[#allocation7 + $0x38] sm:$0xff] }
 0x525   : > { %v4927_v16 = vrot.slane %v4919_v55, %v6866_v44  ;;  %v4934_v39 = vrot.slane %v4920_v31, %v6866_v44  ;;  %v4943_v17 = vrot.slane %v4935_v59, %v6866_v44  ;;  %v4950_v60 = vrot.slane %v4936_v53, %v6866_v44  ;;  %v5462_v53 = vld [vmem:[#allocation7 + $0x30] sm:$0xff] }
 0x526   : > { %v6176_v51 = vpack.c.bf16 %v5463_v34, %v5462_v53 }
 0x527   : > { %v4454_v63 = vpop.f32.mrb[20].mxu0  ;;  %v4527_v18 = vpop.f32.mrb[36].mxu1  ;;  %v5762_v21 = vcombine.low %v4927_v16, %v4934_v39  ;;  %v5764_v35 = vcombine.high %v4927_v16, %v4934_v39  ;;  %v5766_v58 = vcombine.low %v4943_v17, %v4950_v60  ;;  %v5768_v27 = vcombine.high %v4943_v17, %v4950_v60 }
 0x528   : > { %v6049_v38 = vpop.f32.mrb[21].mxu0  ;;  %v6054_v10 = vpop.f32.mrb[37].mxu1  ;;  %v4959_v2 = vcombine.low %v4308_v15, %v4454_v63  ;;  %v4960_v33 = vcombine.high %v4308_v15, %v4454_v63  ;;  %v4975_v4 = vcombine.low %v4381_v25, %v4527_v18  ;;  %v4976_v5 = vcombine.high %v4381_v25, %v4527_v18  ;;  %5376 = vrot.lane.b32.xlu1 %v5226_v20, %s6525_s24  ;;  %v5464_v63 = vld [vmem:[#allocation7 + $0x40] sm:$0xff]  ;;  %v5465_v18 = vld [vmem:[#allocation7 + $0x48] sm:$0xff] }
 0x529   : > { %v5110_v7 = vrot.slane %v5762_v21, %v6861_v37  ;;  %v5126_v11 = vrot.slane %v5764_v35, %v6861_v37  ;;  %v5142_v48 = vrot.slane %v5766_v58, %v6861_v37  ;;  %v5158_v22 = vrot.slane %v5768_v27, %v6861_v37 }
 0x52a   : > { %v4967_v26 = vrot.slane %v4959_v2, %v6861_v37  ;;  %v4974_v43 = vrot.slane %v4960_v33, %v6861_v37  ;;  %v4983_v61 = vrot.slane %v4975_v4, %v6861_v37  ;;  %v4990_v50 = vrot.slane %v4976_v5, %v6861_v37 }
 0x52b   : > { %v5175_v13 = vcombine.low %v5110_v7, %v5126_v11  ;;  %v5207_v8 = vcombine.low %v5142_v48, %v5158_v22  ;;  %v5176_v3 = vcombine.high %v5110_v7, %v5126_v11  ;;  %v5208_v6 = vcombine.high %v5142_v48, %v5158_v22 }
 0x52c   : > { %v5023_v42 = vcombine.low %v4967_v26, %v4983_v61  ;;  %v5024_v46 = vcombine.high %v4967_v26, %v4983_v61  ;;  %v5039_v52 = vcombine.low %v4974_v43, %v4990_v50  ;;  %v5040_v12 = vcombine.high %v4974_v43, %v4990_v50 }
 0x52d   : > { %v5183_v23 = vrot.slane %v5175_v13, %v6866_v44  ;;  %v5215_v54 = vrot.slane %v5207_v8, %v6866_v44  ;;  %v5190_v9 = vrot.slane %v5176_v3, %v6866_v44  ;;  %v5222_v29 = vrot.slane %v5208_v6, %v6866_v44  ;;  %v5466_v6 = vld [vmem:[#allocation7 + $0x50] sm:$0xff] }
 0x52e   : > { %v5031_v47 = vrot.slane %v5023_v42, %v6866_v44  ;;  %v5038_v56 = vrot.slane %v5024_v46, %v6866_v44  ;;  %v5047_v24 = vrot.slane %v5039_v52, %v6866_v44  ;;  %v5054_v45 = vrot.slane %v5040_v12, %v6866_v44  ;;  %v5467_v42 = vld [vmem:[#allocation7 + $0x58] sm:$0xff] }
 0x52f   : > { %v5228_v19 = vcombine.high %v5183_v23, %v5215_v54  ;;  %v5227_v14 = vcombine.low %v5183_v23, %v5215_v54  ;;  %v5230_v15 = vcombine.high %v5190_v9, %v5222_v29  ;;  %v5229_v25 = vcombine.low %v5190_v9, %v5222_v29 }
 0x530   : > { %v5769_v49 = vcombine.low %v5031_v47, %v5038_v56  ;;  %v5771_v41 = vcombine.high %v5031_v47, %v5038_v56  ;;  %v5773_v20 = vcombine.low %v5047_v24, %v5054_v45  ;;  %v5775_v55 = vcombine.high %v5047_v24, %v5054_v45 }
 0x531   : > { %v4600_v31 = vpop.f32.mrb[22].mxu0  ;;  %v4673_v59 = vpop.f32.mrb[38].mxu1  ;;  %5384 = vrot.lane.b32.xlu1 %v5228_v19, %s6523_s17  ;;  %5380 = vrot.lane.b32.xlu0 %v5227_v14, %s6524_s23  ;;  %v6173_v39 = vpack.c.bf16 %v5461_v57, %v5460_v28  ;;  %v6179_v21 = vpack.c.bf16 %v5465_v18, %v5464_v63  ;;  %v6182_v56 = vpack.c.bf16 %v5467_v42, %v5466_v6  ;;  %v5468_v19 = vld [vmem:[#allocation7 + $0x60] sm:$0xff]  ;;  %v5469_v14 = vld [vmem:[#allocation7 + $0x68] sm:$0xff] }
 0x532   : > { %v6059_v62 = vpop.f32.mrb[23].mxu0  ;;  %v6064_v16 = vpop.f32.mrb[39].mxu1  ;;  %v5239_v17 = vrot.slane %v5769_v49, %v6861_v37  ;;  %v5255_v60 = vrot.slane %v5771_v41, %v6861_v37  ;;  %v5271_v40 = vrot.slane %v5773_v20, %v6861_v37  ;;  %v5287_v0 = vrot.slane %v5775_v55, %v6861_v37 }
 0x533   : > { %6174 = vmatpush3.bf16.msra.mxu0 %v6173_v39  ;;  %v6185_v20 = vpack.c.bf16 %v5469_v14, %v5468_v19 }
 0x534   : > { %v5295_v27 = vcombine.low %v5239_v17, %v5255_v60  ;;  %v5327_v38 = vcombine.low %v5271_v40, %v5287_v0  ;;  %v5296_v10 = vcombine.high %v5239_v17, %v5255_v60  ;;  %v5328_v2 = vcombine.high %v5271_v40, %v5287_v0  ;;  %6175 = vmatprep.subr.bf16.mxu0 %v6511_v1  ;;  %v5470_v17 = vld [vmem:[#allocation7 + $0x70] sm:$0xff]  ;;  %v5471_v60 = vld [vmem:[#allocation7 + $0x78] sm:$0xff] }
 0x535   : > { %v4746_v35 = vpop.f32.mrb[24].mxu0  ;;  %v4819_v58 = vpop.f32.mrb[40].mxu1  ;;  %5392 = vrot.lane.b32.xlu1 %v5230_v15, %s6521_s9  ;;  %5388 = vrot.lane.b32.xlu0 %v5229_v25, %s6522_s11  ;;  %s5551_s9 = scalar_lea.sflag [#allocation4], %s6730_s14 }
 0x536   : > { %v4991_v33 = vcombine.low %v4600_v31, %v4746_v35  ;;  %v4992_v4 = vcombine.high %v4600_v31, %v4746_v35  ;;  %v5007_v5 = vcombine.low %v4673_v59, %v4819_v58  ;;  %v5008_v7 = vcombine.high %v4673_v59, %v4819_v58  ;;  %v6069_v11 = vpop.f32.mrb[25].mxu0  ;;  %v6074_v48 = vpop.f32.mrb[41].mxu1 }
 0x537   : > { %v5303_v22 = vrot.slane %v5295_v27, %v6866_v44  ;;  %v5335_v26 = vrot.slane %v5327_v38, %v6866_v44  ;;  %v5310_v43 = vrot.slane %v5296_v10, %v6866_v44  ;;  %v5342_v61 = vrot.slane %v5328_v2, %v6866_v44  ;;  %6177 = vmatpush3.bf16.msra.mxu0 %v6176_v51 }
 0x538   : > { %v4999_v50 = vrot.slane %v4991_v33, %v6861_v37  ;;  %v5006_v13 = vrot.slane %v4992_v4, %v6861_v37  ;;  %v5015_v8 = vrot.slane %v5007_v5, %v6861_v37  ;;  %v5022_v3 = vrot.slane %v5008_v7, %v6861_v37  ;;  %6178 = vmatprep.subr.bf16.mxu0 %v6511_v1 }
 0x539   : > { %v5360_v46 = vcombine.high %v5303_v22, %v5335_v26  ;;  %v5359_v52 = vcombine.low %v5303_v22, %v5335_v26  ;;  %v5362_v12 = vcombine.high %v5310_v43, %v5342_v61  ;;  %v5361_v23 = vcombine.low %v5310_v43, %v5342_v61 }
 0x53a   : > { %v5055_v54 = vcombine.low %v4999_v50, %v5015_v8  ;;  %v5056_v9 = vcombine.high %v4999_v50, %v5015_v8  ;;  %v5071_v29 = vcombine.low %v5006_v13, %v5022_v3  ;;  %v5072_v47 = vcombine.high %v5006_v13, %v5022_v3 }
 0x53b   : > { %5400 = vrot.lane.b32.xlu1 %v5360_v46, %s6519_s29  ;;  %5396 = vrot.lane.b32.xlu0 %v5359_v52, %s6520_s8 }
 0x53c   : > { %v5063_v24 = vrot.slane %v5055_v54, %v6866_v44  ;;  %v5070_v45 = vrot.slane %v5056_v9, %v6866_v44  ;;  %v5079_v28 = vrot.slane %v5071_v29, %v6866_v44  ;;  %v5086_v57 = vrot.slane %v5072_v47, %v6866_v44  ;;  %6180 = vmatpush3.bf16.msra.mxu0 %v6179_v21  ;;  %v5777_v9 = vld [vmem:[%s7818_s4] ss:$0 sm:$0xff] }
 0x53d   : > { %6181 = vmatprep.subr.bf16.mxu0 %v6511_v1 }
 0x53e   : > { %v5770_v15 = vcombine.low %v5063_v24, %v5070_v45  ;;  %v5772_v25 = vcombine.high %v5063_v24, %v5070_v45  ;;  %v5774_v49 = vcombine.low %v5079_v28, %v5086_v57  ;;  %v5776_v41 = vcombine.high %v5079_v28, %v5086_v57 }
 0x53f   : > { %5408 = vrot.lane.b32.xlu1 %v5362_v12, %s6517_s7  ;;  %5404 = vrot.lane.b32.xlu0 %v5361_v23, %s6518_s6 }
 0x540   : > { %v5246_v55 = vrot.slane %v5770_v15, %v6861_v37  ;;  %v5262_v31 = vrot.slane %v5772_v25, %v6861_v37  ;;  %v5278_v59 = vrot.slane %v5774_v49, %v6861_v37  ;;  %v5294_v53 = vrot.slane %v5776_v41, %v6861_v37  ;;  %6183 = vmatpush3.bf16.msra.mxu0 %v6182_v56 }
 0x541   : > { %6184 = vmatprep.subr.bf16.mxu0 %v6511_v1  ;;  %v6188_v37 = vpack.c.bf16 %v5471_v60, %v5470_v17 }
 0x542   : > { %v5311_v34 = vcombine.low %v5246_v55, %v5262_v31  ;;  %v5343_v62 = vcombine.low %v5278_v59, %v5294_v53  ;;  %v5312_v16 = vcombine.high %v5246_v55, %v5262_v31  ;;  %v5344_v39 = vcombine.high %v5278_v59, %v5294_v53 }
 0x544   : > { %v5319_v40 = vrot.slane %v5311_v34, %v6866_v44  ;;  %v5351_v0 = vrot.slane %v5343_v62, %v6866_v44  ;;  %v5326_v63 = vrot.slane %v5312_v16, %v6866_v44  ;;  %v5358_v18 = vrot.slane %v5344_v39, %v6866_v44  ;;  %6186 = vmatpush3.bf16.msra.mxu0 %v6185_v20 }
 0x545   : > { %6187 = vmatprep.subr.bf16.mxu0 %v6511_v1 }
 0x546   : > { %v5364_v51 = vcombine.high %v5319_v40, %v5351_v0  ;;  %v5363_v21 = vcombine.low %v5319_v40, %v5351_v0  ;;  %v5366_v35 = vcombine.high %v5326_v63, %v5358_v18  ;;  %v5365_v58 = vcombine.low %v5326_v63, %v5358_v18 }
 0x548   : > { %5416 = vrot.lane.b32.xlu1 %v5364_v51, %s6516_s13  ;;  %5412 = vrot.lane.b32.xlu0 %v5363_v21, %s6515_s12  ;;  %s7834_s12 = sshll.u32 %s6730_s14, 3 }
 0x549   : > { %6189 = vmatpush3.bf16.msra.mxu0 %v6188_v37  ;;  %s268_s13 = scalar_lea.vmem [#allocation8], %s7834_s12 }
 0x54a   : > { %s5564_s7 = sshll.u32 %s268_s13, 4  ;;  %s7772_s7 = int_to_ptr.vmem [resolvable:$true] %s5564_s7 }
 0x54b   : > { %s6431_s11 = scalar_lea.vmem %s7772_s7, 128 }
 0x54c   : > { %5424 = vrot.lane.b32.xlu1 %v5366_v35, %s6514_s28  ;;  %5420 = vrot.lane.b32.xlu0 %v5365_v58, %s6513_s10  ;;  %s5779_s28 = sshll.u32 %s6582_s22, 7  ;;  %p6432_p11 = scmp.ne.s32.totalorder %s7772_s7, %s6431_s11 }
 0x54d   : > { %s7770_s8 = scalar_lea.hbm %s7819_s5, %s5779_s28  ;;  %s6530_s22 = smov [#allocation8]  }
 0x54e   : > { %p6433_p1 = pnand %p6432_p11, %p7835_p0  ;;  %s6435_s17 = sshll.u32 %s6530_s22, 4  ;;  %s6436_s17 = int_to_ptr.vmem [resolvable:$false] %s6435_s17 }
 0x54f   : > { %s6437_s23 = scalar_lea.vmem %s6436_s17, 256  ;;  %p6438_p5 = scmp.lt.s32.totalorder %s7772_s7, %s6436_s17 }
 0x550   : > { %p6434_p3 = pneg %p6433_p1  ;;  %p6439_p9 = scmp.lt.s32.totalorder %s6437_s23, %s6431_s11 }
 0x552   : > { %p6440_p12 = por %p6439_p9, %p6438_p5 }
 0x554   : > { %p6441_p2 = pnand %p6440_p12, %p6434_p3 }
 0x596   : > { %v5369_v27 = vpop.permute.xlu1 %5368  ;;  %v5373_v38 = vpop.permute.xlu0 %5372 }
 0x597   : > { %v5427_v1 = vsel %vm2246_vm1, %v5223_v30, %v5369_v27 }
 0x598   : > { %v5429_v33 = vsel %vm5428_vm2, %v5427_v1, %v5373_v38 }
 0x59a   : > { %v5377_v44 = vpop.permute.xlu1 %5376 }
 0x59b   : > { %v5431_v5 = vsel %vm5430_vm3, %v5429_v33, %v5377_v44 }
 0x5a3   : > { %v5381_v10 = vpop.permute.xlu0 %5380  ;;  %v5385_v2 = vpop.permute.xlu1 %5384 }
 0x5a4   : > { %v5433_v11 = vsel %vm5432_vm4, %v5431_v5, %v5381_v10 }
 0x5a5   : > { %v5435_v48 = vsel %vm5434_vm5, %v5433_v11, %v5385_v2 }
 0x5a7   : > { %v5389_v4 = vpop.permute.xlu0 %5388  ;;  %v5393_v7 = vpop.permute.xlu1 %5392 }
 0x5a8   : > { %v5437_v26 = vsel %vm5436_vm6, %v5435_v48, %v5389_v4 }
 0x5a9   : > { %v5439_v61 = vsel %vm5438_vm7, %v5437_v26, %v5393_v7 }
 0x5ad   : > { %v5397_v22 = vpop.permute.xlu0 %5396  ;;  %v5401_v43 = vpop.permute.xlu1 %5400 }
 0x5ae   : > { %v5441_v36 = vsel %vm5440_vm8, %v5439_v61, %v5397_v22 }
 0x5af   : > { %v5443_v30 = vsel %vm5442_vm9, %v5441_v36, %v5401_v43 }
 0x5b1   : > { %v5405_v32 = vpop.permute.xlu0 %5404  ;;  %v5409_v50 = vpop.permute.xlu1 %5408 }
 0x5b2   : > { %v5445_v13 = vsel %vm5444_vm10, %v5443_v30, %v5405_v32 }
 0x5b3   : > { %v5447_v8 = vsel %vm5446_vm11, %v5445_v13, %v5409_v50 }
 0x5ba   : > { %v5413_v3 = vpop.permute.xlu0 %5412  ;;  %v5417_v6 = vpop.permute.xlu1 %5416 }
 0x5bb   : > { %v5449_v42 = vsel %vm5448_vm12, %v5447_v8, %v5413_v3 }
 0x5bc   : > { %v5451_v46 = vsel %vm5450_vm13, %v5449_v42, %v5417_v6 }
 0x5be   : > { %v5421_v52 = vpop.permute.xlu0 %5420  ;;  %v5425_v12 = vpop.permute.xlu1 %5424 }
 0x5bf   : > { %v5453_v23 = vsel %vm5452_vm14, %v5451_v46, %v5421_v52 }
 0x5c0   : > { %v5455_v54 = vsel %vm5454_vm15, %v5453_v23, %v5425_v12 }
 0x5c1   : > { %6108 = vmatmul.mubr.f32.vlgmr.msra.gmra.mrb[26].mxu0 %v5455_v54 }
 0x694   : > { %v5545_v29 = vpop.f32.mrb[26].mxu0 }
 0x695   : > { %v5546_v47 = vadd.f32 %v5777_v9, %v5545_v29  ;;  %v6109_v56 = vpop.f32.mrb[27].mxu0 }
 0x697   : > { %5549 = vst [vmem:[%s268_s13] sm:$0xff] %v5546_v47 }
 0x698   : > { %6444 = shalt.err (!%p6441_p2)
}
 0x699   : > { %s6445_s14 = scalar_lea.hbm %s7770_s8, 128  ;;  %s6449_s15 = scalar_lea.hbm %s7819_s5, 256 }
 0x69a   : > { %p6446_p13 = scmp.ne.s32.totalorder %s7770_s8, %s6445_s14  ;;  %p6450_p4 = scmp.lt.u32.totalorder %s7770_s8, %s7819_s5 }
 0x69b   : > { %p6451_p7 = scmp.lt.u32.totalorder %s6449_s15, %s6445_s14  ;;  %p6453_p11 = scmp.lt.u32.totalorder %s6445_s14, %s7770_s8 }
 0x69c   : > { %p6447_p6 = pnand %p6446_p13, %p7835_p0 }
 0x69d   : > { %p6452_p8 = por %p6451_p7, %p6450_p4 }
 0x69e   : > { %p6448_p10 = pneg %p6447_p6 }
 0x69f   : > { %p6454_p1 = por %p6453_p11, %p6452_p8 }
 0x6a1   : > { %p6455_p3 = pnand %p6454_p1, %p6448_p10 }
 0x6a3   : > { %6458 = shalt.err (!%p6455_p3)
}
 0x6a4   : > { %6200 = dma.vmem_to_hbm [thread:$0]  (%p7835_p0), %s7772_s7, 128, %s7770_s8, %s5551_s9  }
 0x6a5 PF: > { %s5576_s12 = sand.u32 1, %s6489_s18   ;;  %p7836_p5 = scmp.ne.s32.totalorder %s7825_s25, 0 }
 0x6a6   : > { %p7837_p9 = scmp.ge.s32.totalorder %s6501_s21, 2  ;;  %s5577_s13 = scalar_lea.sflag [#allocation4], %s5576_s12 }
 0x6a8   : > { %p6214_p12 = pnand %p7837_p9, %p7836_p5 }
 0x6aa   : > { %6484 = dma.done.wait (!%p6214_p12), %s5577_s13, 128  }
 0x6ab   : > { %6486 = vsyncadd (!%p6214_p12), %s5577_s13, 4294967168  ;;  %p19_p2 = scmp.ge.s32.totalorder %s6671_s16, 4   ;;  %s7838_s18 = smov %s6493_s19 }
 0x6ac   : > { %s7839_s19 = smov %s6497_s20  ;;  %s7840_s20 = smov %s6680_s27 }
 0x6ad   : > { %s7841_s21 = smov %s6671_s16  ;;  %21 = sbr.rel (!%p19_p2) target bundleno = 6 (0x6), region = 93 }
 0x6b4   :  { %5582 = vsyncpa [#allocation3], 1 }
 0x6b5   :  { %5584 = vsyncpa [#allocation3 + $0x1], 1 }
 0x6b6   :  { %5585 = vsyncpa [#allocation6], 1 }
 0x6b7   :  { %5586 = vsyncpa [#allocation4], 1 }
 0x6b8   :  { %5588 = vsyncpa [#allocation4 + $0x1], 1 }

// kernel: tpu_custom_call.1
= control target key start
LH: loop header
LB: loop body
LE: loop exit
PB: predicated region body
PF: predicated region fallthrough
CT: control target
= control target key end

     0   :  { %10 = vsyncpa [#allocation3], 0  ;;  %s7814_s0 = inlined_call_operand.hbm [shape: f32[16,128], index: 0, kind: input, shape index: {}]   ;;  %s7815_s1 = inlined_call_operand.hbm [shape: f32[128,384], index: 1, kind: input, shape index: {}]   ;;  %s7816_s2 = inlined_call_operand.vmem [shape: f32[1,384], index: 2, kind: input, shape index: {}]   ;;  %s7817_s3 = inlined_call_operand.hbm [shape: f32[128,128], index: 3, kind: input, shape index: {}]   ;;  %s7818_s4 = inlined_call_operand.vmem [shape: f32[1,128], index: 4, kind: input, shape index: {}]   ;;  %s7819_s5 = inlined_call_operand.hbm [shape: f32[16,128], index: 5, kind: output, shape index: {}]  }
   0x1   :  { %12 = vsyncpa [#allocation3 + $0x1], 0 }
   0x2   :  { %13 = vsyncpa [#allocation6], 0 }
   0x3   :  { %14 = vsyncpa [#allocation4], 0 }
   0x4   :  { %16 = vsyncpa [#allocation4 + $0x1], 0  ;;  %s6561_s18 = smov 0   ;;  %s6563_s19 = smov 0  }
   0x5   :  { %s6565_s20 = smov 0   ;;  %s6567_s21 = smov 0  }
   0x6 LB: > { %s6582_s22 = sadd.s32 4294967295, %s6501_s21   ;;  %s5653_s23 = sadd.s32 4294967294, %s6501_s21   ;;  %s6501_s21 = sphi %s6567_s21, %s7841_s21   ;;  %s6497_s20 = sphi %s6565_s20, %s7840_s20   ;;  %s6493_s19 = sphi %s6563_s19, %s7839_s19   ;;  %s6489_s18 = sphi %s6561_s18, %s7838_s18  }
   0x7   : > { %p42_p0 = scmp.ne.s32.totalorder %s6493_s19, %s6489_s18  ;;  %p7820_p1 = scmp.eq.s32.totalorder %s6582_s22, 0 }
   0x8   : > { %p156_p3 = scmp.eq.s32.totalorder %s5653_s23, 1  ;;  %p5654_p5 = scmp.ge.s32.totalorder %s6501_s21, 1 }
   0x9   : > { %p6591_p4 = por %p7820_p1, %p42_p0  ;;  %p163_p7 = scmp.lt.s32.totalorder %s6501_s21, 3 }
   0xa   : > { %p6596_p6 = por %p156_p3, %p42_p0  ;;  %s6503_s27 = smov [#allocation5]  }
   0xb   : > { %s7824_s24 = scalar_select %p6591_p4, 1, 0 }
   0xc   : > { %s7825_s25 = scalar_select %p6596_p6, 1, 0 }
   0xd   : > { %p6601_p8 = pnand %p5654_p5, %p163_p7  ;;  %s175_s28 = sshll.u32 %s6503_s27, 4  ;;  %s6605_s28 = int_to_ptr.vmem [resolvable:$true] %s175_s28 }
   0xe   : > { %s6504_s30 = smov [#allocation7]   ;;  %s6345_s9 = scalar_lea.hbm %s7815_s1, 6144 }
   0xf   : > { %p6202_p9 = pneg %p6601_p8  ;;  %s191_s6 = sshll.u32 %s6504_s30, 4  ;;  %s6616_s6 = int_to_ptr.vmem [resolvable:$true] %s191_s6 }
  0x10   : > { %p6346_p12 = scmp.ne.s32.totalorder %s7815_s1, %s6345_s9  ;;  %p6352_p5 = scmp.lt.u32.totalorder %s6345_s9, %s7815_s1 }
  0x11   : > { %p6612_p11 = pnand %p6202_p9, %p7820_p1 }
  0x13   : > { %p6347_p13 = pneg %p6612_p11 }
  0x15   : > { %p6348_p0 = pnand %p6347_p13, %p6346_p12 }
  0x17   : > { %p6349_p3 = pneg %p6348_p0 }
  0x19   : > { %p6354_p7 = pnand %p6352_p5, %p6349_p3 }
  0x1b   : > { %6357 = shalt.err (!%p6354_p7)
}
  0x1c   : > { %s6358_s14 = scalar_lea.vmem %s6605_s28, 6144  ;;  %p6366_p2 = scmp.lt.s32.totalorder %s6605_s28, %s6605_s28 }
  0x1d   : > { %p6359_p9 = scmp.ne.s32.totalorder %s6605_s28, %s6358_s14  ;;  %p6367_p12 = scmp.lt.s32.totalorder %s6358_s14, %s6358_s14 }
  0x1f   : > { %p6361_p10 = pnand %p6359_p9, %p6347_p13  ;;  %p6368_p0 = por %p6367_p12, %p6366_p2 }
  0x21   : > { %p6362_p1 = pneg %p6361_p10 }
  0x23   : > { %p6369_p6 = pnand %p6368_p0, %p6362_p1 }
  0x25   : > { %6372 = shalt.err (!%p6369_p6)
}
  0x26   : > { %s6505_s15 = smov 384   ;;  %s6506_s16 = smov 24  }
  0x27   : > { %6205 = dma.hbm_to_vmem [thread:$0]  (!%p6612_p11), %s7815_s1, 6144, %s6605_s28, [#allocation6], %s6505_s15, %s6505_s15, %s6506_s16  }
  0x28   : > { %s6373_s7 = scalar_lea.hbm %s7817_s3, 2048 }
  0x29   : > { %p6374_p2 = scmp.ne.s32.totalorder %s7817_s3, %s6373_s7  ;;  %p6380_p10 = scmp.lt.u32.totalorder %s6373_s7, %s7817_s3 }
  0x2b   : > { %p6376_p1 = pnand %p6374_p2, %p6347_p13 }
  0x2d   : > { %p6377_p6 = pneg %p6376_p1 }
  0x2f   : > { %p6382_p3 = pnand %p6380_p10, %p6377_p6 }
  0x31   : > { %6385 = shalt.err (!%p6382_p3)
}
  0x32   : > { %s6386_s28 = scalar_lea.vmem %s6616_s6, 2048  ;;  %p6394_p12 = scmp.lt.s32.totalorder %s6616_s6, %s6616_s6 }
  0x33   : > { %p6387_p5 = scmp.ne.s32.totalorder %s6616_s6, %s6386_s28  ;;  %p6395_p0 = scmp.lt.s32.totalorder %s6386_s28, %s6386_s28 }
  0x35   : > { %p6389_p7 = pnand %p6387_p5, %p6347_p13  ;;  %p6396_p2 = por %p6395_p0, %p6394_p12 }
  0x37   : > { %p6390_p9 = pneg %p6389_p7 }
  0x39   : > { %p6397_p1 = pnand %p6396_p2, %p6390_p9 }
  0x3b   : > { %6400 = shalt.err (!%p6397_p1)
}
  0x3c   : > { %s6507_s12 = smov 128   ;;  %s6508_s13 = smov 8  }
  0x3d   : > { %6208 = dma.hbm_to_vmem [thread:$0]  (!%p6612_p11), %s7817_s3, 2048, %s6616_s6, [#allocation6], %s6507_s12, %s6507_s12, %s6508_s13  }
  0x3e   : > { %s6671_s16 = sadd.s32 1, %s6501_s21   ;;  %s29_s23 = sadd.s32 1, %s6497_s20 }
  0x3f   : > { %s26_s17 = ssub.s32 %s6501_s21, %s6671_s16  ;;  %p36_p6 = scmp.ne.s32.totalorder %s6497_s20, %s6493_s19 }
  0x40   : > { %p27_p13 = scmp.eq.s32.totalorder %s26_s17, 0  ;;  %p37_p10 = scmp.eq.s32.totalorder %s6501_s21, 0 }
  0x41   : > { %p7828_p5 = scmp.eq.s32.totalorder %s6582_s22, 1  ;;  %p6219_p9 = scmp.lt.s32.totalorder %s6501_s21, 2 }
  0x42   : > { %s6680_s27 = scalar_select %p27_p13, %s6497_s20, %s29_s23  }
  0x43   : > { %p38_p3 = por %p37_p10, %p36_p6  ;;  %p6684_p7 = por %p7828_p5, %p36_p6 }
  0x44   : > { %s208_s29 = sand.u32 1, %s6497_s20   ;;  %s5659_s6 = sshll.u32 %s6501_s21, 7 }
  0x45   : > { %s7829_s30 = scalar_select %p6684_p7, 1, 0 }
  0x46   : > { %s5658_s7 = sshll.u32 %s208_s29, 3  ;;  %s6694_s10 = scalar_lea.hbm %s7814_s0, %s5659_s6 }
  0x47   : > { %s212_s11 = scalar_lea.vmem [#allocation2], %s5658_s7  ;;  %p6698_p11 = pnand %p6219_p9, %p38_p3 }
  0x48   : > { %s219_s28 = sshll.u32 %s212_s11, 4  ;;  %s209_s13 = scalar_lea.sflag [#allocation3], %s208_s29  ;;  %s6696_s28 = int_to_ptr.vmem [resolvable:$true] %s219_s28 }
  0x49   : > { %s6401_s14 = scalar_lea.hbm %s6694_s10, 128  ;;  %p6403_p0 = pneg %p6698_p11 }
  0x4a   : > { %p6402_p12 = scmp.ne.s32.totalorder %s6694_s10, %s6401_s14  ;;  %s6406_s23 = scalar_lea.hbm %s7814_s0, 256 }
  0x4b   : > { %p6407_p13 = scmp.lt.u32.totalorder %s6694_s10, %s7814_s0  ;;  %p6408_p6 = scmp.lt.u32.totalorder %s6406_s23, %s6401_s14 }
  0x4c   : > { %p6404_p2 = pnand %p6403_p0, %p6402_p12  ;;  %p6410_p3 = scmp.lt.u32.totalorder %s6401_s14, %s6694_s10 }
  0x4d   : > { %p6409_p10 = por %p6408_p6, %p6407_p13 }
  0x4e   : > { %p6405_p1 = pneg %p6404_p2 }
  0x4f   : > { %p6411_p5 = por %p6410_p3, %p6409_p10 }
  0x51   : > { %p6412_p9 = pnand %p6411_p5, %p6405_p1 }
  0x53   : > { %6415 = shalt.err (!%p6412_p9)
}
  0x54   : > { %s6416_s29 = scalar_lea.vmem %s6696_s28, 128  ;;  %s6509_s8 = smov [#allocation2]  }
  0x55   : > { %p6417_p12 = scmp.ne.s32.totalorder %s6696_s28, %s6416_s29  ;;  %s6421_s9 = sshll.u32 %s6509_s8, 4  ;;  %s6422_s9 = int_to_ptr.vmem [resolvable:$false] %s6421_s9 }
  0x56   : > { %s6423_s11 = scalar_lea.vmem %s6422_s9, 256  ;;  %p6424_p4 = scmp.lt.s32.totalorder %s6696_s28, %s6422_s9 }
  0x57   : > { %p6419_p2 = pnand %p6417_p12, %p6403_p0  ;;  %p6425_p13 = scmp.lt.s32.totalorder %s6423_s11, %s6416_s29 }
  0x59   : > { %p6420_p7 = pneg %p6419_p2  ;;  %p6426_p6 = por %p6425_p13, %p6424_p4 }
  0x5b   : > { %p6427_p10 = pnand %p6426_p6, %p6420_p7 }
  0x5d   : > { %6430 = shalt.err (!%p6427_p10)
}
  0x5e   : > { %6212 = dma.hbm_to_vmem [thread:$0]  (!%p6698_p11), %s6694_s10, 128, %s6696_s28, %s209_s13  }
  0x5f   : > { %228 = sbr.rel (%p6601_p8) target bundleno = 1701 (0x6a5), region = 40  ;;  %s6730_s14 = sand.u32 (!%p6601_p8), 1, %s6493_s19  }
  0x60   : > { %s7823_s15 = sshll.u32 (!%p6601_p8), %s6730_s14, 3  ;;  %s231_s17 = scalar_lea.sflag (!%p6601_p8), [#allocation3], %s6730_s14 }
  0x61   : > { %s6736_s23 = scalar_lea.vmem (!%p6601_p8), [#allocation2], %s7823_s15  ;;  %p7831_p4 = scmp.ne.s32.totalorder (!%p6601_p8), %s7824_s24, 0 }
  0x66   : > { %6476 = dma.done.wait (%p7831_p4), %s231_s17, 128  }
  0x67   : > { %6478 = vsyncadd (%p7831_p4), %s231_s17, 4294967168  ;;  %p7832_p7 = scmp.eq.s32.totalorder %s6582_s22, 0 }
  0x69   : > { %6480 = dma.done.wait (%p7832_p7), [#allocation6], 8192   ;;  %p7833_p8 = pmov %p7832_p7 }
  0x6a   : > { %v6510_v0 = vmov 0.0   ;;  %v6511_v1 = vmov 0.0|0.0   ;;  %v271_v2 = vld [vmem:[#allocation5 + $0x8] sm:$0xff]  ;;  %v274_v3 = vld [vmem:[#allocation5 + $0x20] sm:$0xff]  ;;  %v273_v6 = vld [vmem:[#allocation5 + $0x18] sm:$0xff]  ;;  %vm6512_vm0 = vmmov 0  }
  0x6b   : > { %6482 = vsyncadd (%p7833_p8), [#allocation6], 4294959104  ;;  %399 = vmatprep.mubr.f32.mxu0 %v6510_v0  ;;  %6142 = vmatprep.subr.bf16.mxu1 %v6511_v1  ;;  %v270_v4 = vld [vmem:[#allocation5] sm:$0xff]  ;;  %v6110_v5 = vpack.c.bf16 %v274_v3, %v271_v2  ;;  %v277_v7 = vld [vmem:[#allocation5 + $0x38] sm:$0xff]  ;;  %s6513_s10 = smov 112   ;;  %s6514_s28 = smov 120  }
  0x6c   : > { %v280_v8 = vld [vmem:[#allocation5 + $0x50] sm:$0xff]  ;;  %v6112_v9 = vpack.c.bf16 %v273_v6, %v270_v4  ;;  %v279_v12 = vld [vmem:[#allocation5 + $0x48] sm:$0xff]  ;;  %v286_v14 = vld [vmem:[#allocation5 + $0x80] sm:$0xff]  ;;  %5912 = vmatprep.mubr.msk.f32.mxu1 %vm6512_vm0, %v6510_v0  ;;  %s6515_s12 = smov 96   ;;  %s6516_s13 = smov 104   ;;  %vm2246_vm1 = vcmask 64512  }
  0x6d   : > { %v6114_v10 = vpack.c.bf16 %v280_v8, %v277_v7  ;;  %v276_v11 = vld [vmem:[#allocation5 + $0x30] sm:$0xff]  ;;  %v283_v13 = vld [vmem:[#allocation5 + $0x68] sm:$0xff]  ;;  %6111 = vmatprep.subr.bf16.mxu0 %v6110_v5  ;;  %v282_v17 = vld [vmem:[#allocation5 + $0x60] sm:$0xff]  ;;  %s6517_s7 = smov 88   ;;  %s6518_s6 = smov 80   ;;  %vm5428_vm2 = vcmask 130048  }
  0x6e   : > { %6113 = vmatpush1.bf16.msra.mxu0 %v6112_v9  ;;  %v6116_v15 = vpack.c.bf16 %v279_v12, %v276_v11  ;;  %v6118_v16 = vpack.c.bf16 %v286_v14, %v283_v13  ;;  %v285_v18 = vld [vmem:[#allocation5 + $0x78] sm:$0xff]  ;;  %v292_v20 = vld [vmem:[#allocation5 + $0xb0] sm:$0xff]  ;;  %v291_v24 = vld [vmem:[#allocation5 + $0xa8] sm:$0xff]  ;;  %v320_v13 = vlaneseq  ;;  %s6519_s29 = smov 72   ;;  %s6520_s8 = smov 64   ;;  %vm5430_vm3 = vcmask 195584  }
  0x6f   : > { %6115 = vmatprep.subr.bf16.mxu0 %v6114_v10  ;;  %v289_v19 = vld [vmem:[#allocation5 + $0x98] sm:$0xff]  ;;  %v6120_v21 = vpack.c.bf16 %v285_v18, %v282_v17  ;;  %v288_v23 = vld [vmem:[#allocation5 + $0x90] sm:$0xff]  ;;  %v295_v25 = vld [vmem:[#allocation5 + $0xc8] sm:$0xff]  ;;  %s6521_s9 = smov 56   ;;  %s6522_s11 = smov 48   ;;  %vm5432_vm4 = vcmask 261120  }
  0x70   : > { %v6122_v22 = vpack.c.bf16 %v292_v20, %v289_v19  ;;  %v298_v26 = vld [vmem:[#allocation5 + $0xe0] sm:$0xff]  ;;  %v272_v27 = vld [vmem:[#allocation5 + $0x10] sm:$0xff]  ;;  %v275_v28 = vld [vmem:[#allocation5 + $0x28] sm:$0xff]  ;;  %v6124_v30 = vpack.c.bf16 %v291_v24, %v288_v23  ;;  %v6764_v14 = vshrl.u32 %v320_v13, 7  ;;  %s6523_s17 = smov 40   ;;  %s6525_s24 = smov 24  }
  0x71   : > { %v278_v29 = vld [vmem:[#allocation5 + $0x40] sm:$0xff]  ;;  %v6143_v31 = vpack.c.bf16 %v275_v28, %v272_v27  ;;  %v281_v32 = vld [vmem:[#allocation5 + $0x58] sm:$0xff]  ;;  %v6126_v33 = vpack.c.bf16 %v298_v26, %v295_v25  ;;  %v304_v37 = vld [vmem:[#allocation5 + $0x110] sm:$0xff]  ;;  %s6526_s26 = smov 16   ;;  %s6527_s15 = smov 8   ;;  %vm5434_vm5 = vcmask 326656  }
  0x72   : > { %6117 = vmatpush1.bf16.msra.mxu0 %v6116_v15  ;;  %v294_v34 = vld [vmem:[#allocation5 + $0xc0] sm:$0xff]  ;;  %v297_v35 = vld [vmem:[#allocation5 + $0xd8] sm:$0xff]  ;;  %v6146_v38 = vpack.c.bf16 %v281_v32, %v278_v29  ;;  %v284_v39 = vld [vmem:[#allocation5 + $0x70] sm:$0xff]  ;;  %v322_v15 = vsub.s32 0, %v6764_v14  ;;  %v326_v20 = vsub.s32 1, %v6764_v14  ;;  %v330_v24 = vsub.s32 2, %v6764_v14 }
  0x73   : > { %6119 = vmatprep.subr.bf16.mxu0 %v6118_v16  ;;  %v301_v36 = vld [vmem:[#allocation5 + $0xf8] sm:$0xff]  ;;  %6144 = vmatpush3.bf16.msra.mxu1 %v6143_v31  ;;  %v287_v40 = vld [vmem:[#allocation5 + $0x88] sm:$0xff]  ;;  %v6128_v41 = vpack.c.bf16 %v297_v35, %v294_v34  ;;  %v300_v43 = vld [vmem:[#allocation5 + $0xf0] sm:$0xff]  ;;  %v6528_v29 = vmov 1983009808   ;;  %vm5436_vm6 = vcmask 392192  }
  0x74   : > { %6145 = vmatprep.subr.bf16.mxu1 %v6511_v1  ;;  %v6130_v42 = vpack.c.bf16 %v304_v37, %v301_v36  ;;  %v303_v44 = vld [vmem:[#allocation5 + $0x108] sm:$0xff]  ;;  %v310_v46 = vld [vmem:[#allocation5 + $0x140] sm:$0xff]  ;;  %v6149_v47 = vpack.c.bf16 %v287_v40, %v284_v39  ;;  %v293_v49 = vld [vmem:[#allocation5 + $0xb8] sm:$0xff]  ;;  %v6529_v31 = vmov 1934713408   ;;  %vm5438_vm7 = vcmask 457728  }
  0x75   : > { %v307_v45 = vld [vmem:[#allocation5 + $0x128] sm:$0xff]  ;;  %v290_v48 = vld [vmem:[#allocation5 + $0xa0] sm:$0xff]  ;;  %v6132_v50 = vpack.c.bf16 %v303_v44, %v300_v43  ;;  %v309_v53 = vld [vmem:[#allocation5 + $0x138] sm:$0xff]  ;;  %v589_v32 = vunpack.c.l.s4 %v6529_v31  ;;  %vm5440_vm8 = vcmask 523264   ;;  %vm5442_vm9 = vcmask 588800   ;;  %p7835_p0 = scmp.ne.s32.totalorder %s7829_s30, 0 }
  0x76   : > { %6121 = vmatpush1.bf16.msra.mxu0 %v6120_v21  ;;  %v6134_v51 = vpack.c.bf16 %v310_v46, %v307_v45  ;;  %v306_v52 = vld [vmem:[#allocation5 + $0x120] sm:$0xff]  ;;  %v313_v54 = vld [vmem:[#allocation5 + $0x158] sm:$0xff]  ;;  %v316_v55 = vld [vmem:[#allocation5 + $0x170] sm:$0xff]  ;;  %v6152_v56 = vpack.c.bf16 %v293_v49, %v290_v48  ;;  %vm5444_vm10 = vcmask 654336   ;;  %vm5446_vm11 = vcmask 719872  }
  0x77   : > { %6123 = vmatprep.subr.bf16.mxu0 %v6122_v22  ;;  %6147 = vmatpush3.bf16.msra.mxu1 %v6146_v38  ;;  %v296_v57 = vld [vmem:[#allocation5 + $0xd0] sm:$0xff]  ;;  %v299_v58 = vld [vmem:[#allocation5 + $0xe8] sm:$0xff]  ;;  %v6136_v59 = vpack.c.bf16 %v309_v53, %v306_v52  ;;  %v6138_v60 = vpack.c.bf16 %v316_v55, %v313_v54  ;;  %v302_v2 = vld [vmem:[#allocation5 + $0x100] sm:$0xff]  ;;  %v590_v36 = vunpack.c.0.s8 %v589_v32  ;;  %vm5448_vm12 = vcmask 785408  }
  0x78   : > { %6148 = vmatprep.subr.bf16.mxu1 %v6511_v1  ;;  %v312_v61 = vld [vmem:[#allocation5 + $0x150] sm:$0xff]  ;;  %v315_v62 = vld [vmem:[#allocation5 + $0x168] sm:$0xff]  ;;  %v6155_v63 = vpack.c.bf16 %v299_v58, %v296_v57  ;;  %v305_v3 = vld [vmem:[#allocation5 + $0x118] sm:$0xff]  ;;  %vm5450_vm13 = vcmask 850944   ;;  %vm5452_vm14 = vcmask 916480   ;;  %vm5454_vm15 = vcmask 982016  }
  0x79   : > { %v6140_v4 = vpack.c.bf16 %v315_v62, %v312_v61  ;;  %v6158_v5 = vpack.c.bf16 %v305_v3, %v302_v2  ;;  %v269_v6 = vld [vmem:[%s6736_s23] sm:$0xff]  ;;  %v311_v8 = vld [vmem:[#allocation5 + $0x148] sm:$0xff]  ;;  %v314_v10 = vld [vmem:[#allocation5 + $0x160] sm:$0xff]  ;;  %s6524_s23 = smov 32   ;;  %v6866_v44 = vsub.s32 %v590_v36, %v6764_v14 }
  0x7a   : > { %6125 = vmatpush1.bf16.msra.mxu0 %v6124_v30  ;;  %v308_v7 = vld [vmem:[#allocation5 + $0x130] sm:$0xff]  ;;  %v317_v11 = vld [vmem:[#allocation5 + $0x178] sm:$0xff]  ;;  %v525_v30 = vunpack.c.l.s4 %v6528_v29 }
  0x7b   : > { %6127 = vmatprep.subr.bf16.mxu0 %v6126_v33  ;;  %6150 = vmatpush3.bf16.msra.mxu1 %v6149_v47  ;;  %v6161_v9 = vpack.c.bf16 %v311_v8, %v308_v7  ;;  %v6164_v12 = vpack.c.bf16 %v317_v11, %v314_v10  ;;  %v318_v16 = vld [vmem:[%s7816_s2] sm:$0x7] }
  0x7c   : > { %6151 = vmatprep.subr.bf16.mxu1 %v6511_v1  ;;  %v323_v17 = vrot.slane %v318_v16, %v322_v15  ;;  %v327_v22 = vrot.slane %v318_v16, %v326_v20  ;;  %v331_v25 = vrot.slane %v318_v16, %v330_v24  ;;  %v526_v33 = vunpack.c.0.s8 %v525_v30 }
  0x7e   : > { %6129 = vmatpush1.bf16.msra.mxu0 %v6128_v41  ;;  %v6861_v37 = vsub.s32 %v526_v33, %v6764_v14 }
  0x7f   : > { %6131 = vmatprep.subr.bf16.mxu0 %v6130_v42  ;;  %6153 = vmatpush3.bf16.msra.mxu1 %v6152_v56 }
  0x80   : > { %6154 = vmatprep.subr.bf16.mxu1 %v6511_v1 }
  0x82   : > { %6133 = vmatpush1.bf16.msra.mxu0 %v6132_v50 }
  0x83   : > { %6135 = vmatprep.subr.bf16.mxu0 %v6134_v51  ;;  %6156 = vmatpush3.bf16.msra.mxu1 %v6155_v63 }
  0x84   : > { %6157 = vmatprep.subr.bf16.mxu1 %v6511_v1 }
  0x86   : > { %6137 = vmatpush1.bf16.msra.mxu0 %v6136_v59 }
  0x87   : > { %6139 = vmatprep.subr.bf16.mxu0 %v6138_v60  ;;  %6159 = vmatpush3.bf16.msra.mxu1 %v6158_v5 }
  0x88   : > { %6160 = vmatprep.subr.bf16.mxu1 %v6511_v1 }
  0x8a   : > { %6141 = vmatpush1.bf16.msra.mxu0 %v6140_v4 }
  0x8b   : > { %5955 = vmatprep.subr.mxu0 %v6510_v0  ;;  %6162 = vmatpush3.bf16.msra.mxu1 %v6161_v9 }
  0x8c   : > { %6163 = vmatprep.subr.bf16.mxu1 %v6511_v1 }
  0x8d   : > { %400 = vmatmul.mubr.f32.vlgmr.msra.gmra.mrb[0].mxu0 %v269_v6 }
  0x8e   : > { %5957 = vmatprep.mubr.msk.f32.mxu0 %vm6512_vm0, %v6510_v0 }
  0x8f   : > { %6165 = vmatpush3.bf16.msra.mxu1 %v6164_v12 }
  0x90   : > { %5915 = vmatprep.subr.mxu1 %v6510_v0 }
  0x92   : > { %5913 = vmatmul.mubr.f32.vlgmr.msra.gmra.mrb[0].mxu1 %v269_v6 }
  0x93   : > { %5917 = vmatprep.mubr.msk.f32.mxu1 %vm6512_vm0, %v6510_v0 }
 0x160   : > { %v401_v18 = vpop.f32.mrb[0].mxu0 }
 0x161   : > { %v6770_v19 = vadd.f32 %v401_v18, %v323_v17  ;;  %v403_v21 = vpop.f32.mrb[1].mxu0 }
 0x162   : > { %v6781_v23 = vadd.f32 %v403_v21, %v327_v22 }
 0x163   : > { %480 = vrot.lane.b32.xlu0 %v6770_v19, %s6513_s10  ;;  %477 = vrot.lane.b32.xlu1 %v6770_v19, %s6514_s28 }
 0x165   : > { %v472_v26 = vpop.f32.mrb[0].mxu1 }
 0x166   : > { %v6836_v27 = vadd.f32 %v472_v26, %v331_v25  ;;  %v5914_v28 = vpop.f32.mrb[1].mxu1 }
 0x167   : > { %486 = vrot.lane.b32.xlu0 %v6770_v19, %s6515_s12  ;;  %483 = vrot.lane.b32.xlu1 %v6770_v19, %s6516_s13 }
 0x16b   : > { %1067 = vrot.lane.b32.xlu0 %v6781_v23, %s6514_s28  ;;  %489 = vrot.lane.b32.xlu1 %v6770_v19, %s6517_s7 }
 0x16f   : > { %1070 = vrot.lane.b32.xlu0 %v6781_v23, %s6513_s10  ;;  %1073 = vrot.lane.b32.xlu1 %v6781_v23, %s6516_s13 }
 0x173   : > { %492 = vrot.lane.b32.xlu0 %v6770_v19, %s6518_s6  ;;  %495 = vrot.lane.b32.xlu1 %v6770_v19, %s6519_s29 }
 0x177   : > { %498 = vrot.lane.b32.xlu0 %v6770_v19, %s6520_s8  ;;  %501 = vrot.lane.b32.xlu1 %v6770_v19, %s6521_s9 }
 0x17b   : > { %1076 = vrot.lane.b32.xlu0 %v6781_v23, %s6515_s12  ;;  %1079 = vrot.lane.b32.xlu1 %v6781_v23, %s6517_s7 }
 0x17f   : > { %1082 = vrot.lane.b32.xlu0 %v6781_v23, %s6518_s6  ;;  %1085 = vrot.lane.b32.xlu1 %v6781_v23, %s6519_s29 }
 0x183   : > { %504 = vrot.lane.b32.xlu0 %v6770_v19, %s6522_s11  ;;  %507 = vrot.lane.b32.xlu1 %v6770_v19, %s6523_s17 }
 0x187   : > { %510 = vrot.lane.b32.xlu0 %v6770_v19, %s6524_s23  ;;  %513 = vrot.lane.b32.xlu1 %v6770_v19, %s6525_s24 }
 0x18b   : > { %1088 = vrot.lane.b32.xlu0 %v6781_v23, %s6520_s8  ;;  %1091 = vrot.lane.b32.xlu1 %v6781_v23, %s6521_s9 }
 0x18f   : > { %1094 = vrot.lane.b32.xlu0 %v6781_v23, %s6522_s11  ;;  %1097 = vrot.lane.b32.xlu1 %v6781_v23, %s6523_s17 }
 0x193   : > { %1100 = vrot.lane.b32.xlu0 %v6781_v23, %s6524_s23  ;;  %1103 = vrot.lane.b32.xlu1 %v6781_v23, %s6525_s24 }
 0x197   : > { %1106 = vrot.lane.b32.xlu0 %v6781_v23, %s6526_s26  ;;  %1109 = vrot.lane.b32.xlu1 %v6781_v23, %s6527_s15 }
 0x19b   : > { %516 = vrot.lane.b32.xlu0 %v6770_v19, %s6526_s26  ;;  %519 = vrot.lane.b32.xlu1 %v6770_v19, %s6527_s15 }
 0x19f   : > { %1657 = vrot.lane.b32.xlu1 %v6836_v27, %s6514_s28  ;;  %1660 = vrot.lane.b32.xlu0 %v6836_v27, %s6513_s10 }
 0x1a3   : > { %1663 = vrot.lane.b32.xlu1 %v6836_v27, %s6516_s13  ;;  %1666 = vrot.lane.b32.xlu0 %v6836_v27, %s6515_s12 }
 0x1a7   : > { %1675 = vrot.lane.b32.xlu0 %v6836_v27, %s6519_s29  ;;  %1669 = vrot.lane.b32.xlu1 %v6836_v27, %s6517_s7 }
 0x1ab   : > { %1678 = vrot.lane.b32.xlu0 %v6836_v27, %s6520_s8  ;;  %1672 = vrot.lane.b32.xlu1 %v6836_v27, %s6518_s6 }
 0x1af   : > { %1687 = vrot.lane.b32.xlu0 %v6836_v27, %s6523_s17  ;;  %1681 = vrot.lane.b32.xlu1 %v6836_v27, %s6521_s9 }
 0x1b3   : > { %1684 = vrot.lane.b32.xlu1 %v6836_v27, %s6522_s11 }
 0x1d5   : > { %v481_v34 = vpop.permute.xlu0 %480  ;;  %v478_v35 = vpop.permute.xlu1 %477 }
 0x1d6   : > { %v522_v38 = vcombine.low %v6770_v19, %v481_v34  ;;  %v523_v39 = vcombine.high %v6770_v19, %v481_v34 }
 0x1d8   : > { %v530_v45 = vrot.slane %v522_v38, %v6861_v37  ;;  %v537_v46 = vrot.slane %v523_v39, %v6861_v37 }
 0x1d9   : > { %v487_v40 = vpop.permute.xlu0 %486  ;;  %v484_v41 = vpop.permute.xlu1 %483 }
 0x1da   : > { %v538_v42 = vcombine.low %v478_v35, %v484_v41  ;;  %v539_v43 = vcombine.high %v478_v35, %v484_v41 }
 0x1dc   : > { %v546_v47 = vrot.slane %v538_v42, %v6861_v37  ;;  %v553_v48 = vrot.slane %v539_v43, %v6861_v37 }
 0x1dd   : > { %v1068_v49 = vpop.permute.xlu0 %1067  ;;  %v490_v50 = vpop.permute.xlu1 %489 }
 0x1de   : > { %v586_v51 = vcombine.low %v530_v45, %v546_v47  ;;  %v587_v52 = vcombine.high %v530_v45, %v546_v47  ;;  %v602_v53 = vcombine.low %v537_v46, %v553_v48  ;;  %v603_v54 = vcombine.high %v537_v46, %v553_v48 }
 0x1e0   : > { %v594_v55 = vrot.slane %v586_v51, %v6866_v44  ;;  %v601_v56 = vrot.slane %v587_v52, %v6866_v44  ;;  %v610_v57 = vrot.slane %v602_v53, %v6866_v44  ;;  %v617_v58 = vrot.slane %v603_v54, %v6866_v44 }
 0x1e1   : > { %v1071_v59 = vpop.permute.xlu0 %1070  ;;  %v1074_v60 = vpop.permute.xlu1 %1073 }
 0x1e2   : > { %v5665_v61 = vcombine.low %v594_v55, %v601_v56  ;;  %v5667_v62 = vcombine.high %v594_v55, %v601_v56  ;;  %v5669_v63 = vcombine.low %v610_v57, %v617_v58  ;;  %v5671_v2 = vcombine.high %v610_v57, %v617_v58 }
 0x1e3   : > { %v1112_v3 = vcombine.low %v6781_v23, %v1071_v59  ;;  %v1113_v4 = vcombine.high %v6781_v23, %v1071_v59  ;;  %v1128_v5 = vcombine.low %v1068_v49, %v1074_v60  ;;  %v1129_v6 = vcombine.high %v1068_v49, %v1074_v60 }
 0x1e4   : > { %v6879_v7 = vrot.slane %v5665_v61, %v6861_v37  ;;  %v6882_v8 = vrot.slane %v5667_v62, %v6861_v37  ;;  %v6885_v9 = vrot.slane %v5669_v63, %v6861_v37  ;;  %v6888_v10 = vrot.slane %v5671_v2, %v6861_v37 }
 0x1e5   : > { %v1120_v11 = vrot.slane %v1112_v3, %v6861_v37  ;;  %v1127_v12 = vrot.slane %v1113_v4, %v6861_v37  ;;  %v1136_v13 = vrot.slane %v1128_v5, %v6861_v37  ;;  %v1143_v14 = vrot.slane %v1129_v6, %v6861_v37  ;;  %v493_v15 = vpop.permute.xlu0 %492  ;;  %v496_v16 = vpop.permute.xlu1 %495 }
 0x1e6   : > { %v858_v17 = vcombine.low %v6879_v7, %v6882_v8  ;;  %v890_v18 = vcombine.low %v6885_v9, %v6888_v10  ;;  %v554_v23 = vcombine.low %v487_v40, %v493_v15  ;;  %v555_v24 = vcombine.high %v487_v40, %v493_v15 }
 0x1e7   : > { %v1176_v19 = vcombine.low %v1120_v11, %v1136_v13  ;;  %v1177_v20 = vcombine.high %v1120_v11, %v1136_v13  ;;  %v1192_v21 = vcombine.low %v1127_v12, %v1143_v14  ;;  %v1193_v22 = vcombine.high %v1127_v12, %v1143_v14 }
 0x1e8   : > { %v570_v25 = vcombine.low %v490_v50, %v496_v16  ;;  %v571_v26 = vcombine.high %v490_v50, %v496_v16  ;;  %v562_v34 = vrot.slane %v554_v23, %v6861_v37  ;;  %v569_v35 = vrot.slane %v555_v24, %v6861_v37 }
 0x1e9   : > { %v1184_v28 = vrot.slane %v1176_v19, %v6866_v44  ;;  %v1191_v29 = vrot.slane %v1177_v20, %v6866_v44  ;;  %v1200_v30 = vrot.slane %v1192_v21, %v6866_v44  ;;  %v1207_v31 = vrot.slane %v1193_v22, %v6866_v44  ;;  %v6902_v32 = vpop.permute.xlu0 %498  ;;  %v6904_v33 = vpop.permute.xlu1 %501 }
 0x1ea   : > { %v578_v36 = vrot.slane %v570_v25, %v6861_v37  ;;  %v585_v38 = vrot.slane %v571_v26, %v6861_v37  ;;  %v859_v58 = vcombine.high %v6879_v7, %v6882_v8  ;;  %v891_v59 = vcombine.high %v6885_v9, %v6888_v10 }
 0x1eb   : > { %v5681_v39 = vcombine.low %v1184_v28, %v1191_v29  ;;  %v5683_v40 = vcombine.high %v1184_v28, %v1191_v29  ;;  %v5685_v41 = vcombine.low %v1200_v30, %v1207_v31  ;;  %v5687_v42 = vcombine.high %v1200_v30, %v1207_v31 }
 0x1ec   : > { %v618_v43 = vcombine.low %v562_v34, %v578_v36  ;;  %v619_v45 = vcombine.high %v562_v34, %v578_v36  ;;  %v634_v46 = vcombine.low %v569_v35, %v585_v38  ;;  %v635_v47 = vcombine.high %v569_v35, %v585_v38 }
 0x1ed   : > { %v6911_v48 = vrot.slane %v5681_v39, %v6861_v37  ;;  %v6914_v49 = vrot.slane %v5683_v40, %v6861_v37  ;;  %v6917_v50 = vrot.slane %v5685_v41, %v6861_v37  ;;  %v6920_v51 = vrot.slane %v5687_v42, %v6861_v37  ;;  %v1077_v52 = vpop.permute.xlu0 %1076  ;;  %v1080_v53 = vpop.permute.xlu1 %1079 }
 0x1ee   : > { %v626_v54 = vrot.slane %v618_v43, %v6866_v44  ;;  %v633_v55 = vrot.slane %v619_v45, %v6866_v44  ;;  %v642_v56 = vrot.slane %v634_v46, %v6866_v44  ;;  %v649_v57 = vrot.slane %v635_v47, %v6866_v44 }
 0x1ef   : > { %v1448_v60 = vcombine.low %v6911_v48, %v6914_v49  ;;  %v1480_v61 = vcombine.low %v6917_v50, %v6920_v51  ;;  %v1449_v4 = vcombine.high %v6911_v48, %v6914_v49  ;;  %v1481_v5 = vcombine.high %v6917_v50, %v6920_v51 }
 0x1f0   : > { %v5666_v62 = vcombine.low %v626_v54, %v633_v55  ;;  %v5668_v63 = vcombine.high %v626_v54, %v633_v55  ;;  %v5670_v2 = vcombine.low %v642_v56, %v649_v57  ;;  %v5672_v3 = vcombine.high %v642_v56, %v649_v57 }
 0x1f1   : > { %v1083_v6 = vpop.permute.xlu0 %1082  ;;  %v1086_v11 = vpop.permute.xlu1 %1085  ;;  %v6939_v12 = vrot.slane %v1448_v60, %v6866_v44  ;;  %v6942_v13 = vrot.slane %v1480_v61, %v6866_v44  ;;  %v6951_v16 = vrot.slane %v858_v17, %v6866_v44  ;;  %v6954_v19 = vrot.slane %v890_v18, %v6866_v44 }
 0x1f2   : > { %v6945_v14 = vrot.slane %v5666_v62, %v6861_v37  ;;  %v6948_v15 = vrot.slane %v5668_v63, %v6861_v37  ;;  %v1144_v20 = vcombine.low %v1077_v52, %v1083_v6  ;;  %v1145_v21 = vcombine.high %v1077_v52, %v1083_v6 }
 0x1f3   : > { %v1160_v22 = vcombine.low %v1080_v53, %v1086_v11  ;;  %v1161_v23 = vcombine.high %v1080_v53, %v1086_v11  ;;  %v6957_v24 = vrot.slane %v5670_v2, %v6861_v37  ;;  %v6960_v25 = vrot.slane %v5672_v3, %v6861_v37 }
 0x1f4   : > { %v874_v26 = vcombine.low %v6945_v14, %v6948_v15  ;;  %v875_v17 = vcombine.high %v6945_v14, %v6948_v15  ;;  %v1152_v28 = vrot.slane %v1144_v20, %v6861_v37  ;;  %v1159_v18 = vrot.slane %v1145_v21, %v6861_v37 }
 0x1f5   : > { %v1168_v29 = vrot.slane %v1160_v22, %v6861_v37  ;;  %v1175_v30 = vrot.slane %v1161_v23, %v6861_v37  ;;  %v505_v31 = vpop.permute.xlu0 %504  ;;  %v508_v34 = vpop.permute.xlu1 %507  ;;  %v1512_v35 = vcombine.low %v6939_v12, %v6942_v13  ;;  %v922_v62 = vcombine.low %v6951_v16, %v6954_v19 }
 0x1f6   : > { %v658_v36 = vcombine.low %v6902_v32, %v505_v31  ;;  %v659_v38 = vcombine.high %v6902_v32, %v505_v31  ;;  %v674_v39 = vcombine.low %v6904_v33, %v508_v34  ;;  %v675_v47 = vcombine.high %v6904_v33, %v508_v34 }
 0x1f7   : > { %v1208_v40 = vcombine.low %v1152_v28, %v1168_v29  ;;  %v1209_v41 = vcombine.high %v1152_v28, %v1168_v29  ;;  %v1224_v42 = vcombine.low %v1159_v18, %v1175_v30  ;;  %v1225_v43 = vcombine.high %v1159_v18, %v1175_v30  ;;  %5916 = vmatpush3.xpose.msk.msra.mxu1 %vm2246_vm1, %v1512_v35 }
 0x1f8   : > { %v666_v45 = vrot.slane %v658_v36, %v6861_v37  ;;  %v673_v46 = vrot.slane %v659_v38, %v6861_v37  ;;  %v682_v52 = vrot.slane %v674_v39, %v6861_v37  ;;  %5920 = vmatprep.subr.mxu1 %v6510_v0  ;;  %v689_v60 = vrot.slane %v675_v47, %v6861_v37 }
 0x1f9   : > { %v1216_v53 = vrot.slane %v1208_v40, %v6866_v44  ;;  %v1223_v32 = vrot.slane %v1209_v41, %v6866_v44  ;;  %v1232_v54 = vrot.slane %v1224_v42, %v6866_v44  ;;  %v1239_v55 = vrot.slane %v1225_v43, %v6866_v44  ;;  %v6985_v56 = vpop.permute.xlu0 %510  ;;  %v6987_v57 = vpop.permute.xlu1 %513 }
 0x1fa   : > { %v722_v61 = vcombine.low %v666_v45, %v682_v52  ;;  %v723_v33 = vcombine.high %v666_v45, %v682_v52  ;;  %v738_v21 = vcombine.low %v673_v46, %v689_v60  ;;  %v739_v22 = vcombine.high %v673_v46, %v689_v60  ;;  %5918 = vmatmul.mubr.msk.f32.vlgmr.msra.gmra.mrb[2].mxu1 %vm2246_vm1, %v922_v62 }
 0x1fb   : > { %v5682_v63 = vcombine.low %v1216_v53, %v1223_v32  ;;  %v5684_v2 = vcombine.high %v1216_v53, %v1223_v32  ;;  %v5686_v3 = vcombine.low %v1232_v54, %v1239_v55  ;;  %v5688_v6 = vcombine.high %v1232_v54, %v1239_v55  ;;  %5922 = vmatprep.mubr.msk.f32.mxu1 %vm6512_vm0, %v6510_v0 }
 0x1fc   : > { %v730_v11 = vrot.slane %v722_v61, %v6866_v44  ;;  %v737_v20 = vrot.slane %v723_v33, %v6866_v44  ;;  %v746_v34 = vrot.slane %v738_v21, %v6866_v44  ;;  %v753_v35 = vrot.slane %v739_v22, %v6866_v44 }
 0x1fd   : > { %v6996_v23 = vrot.slane %v5682_v63, %v6861_v37  ;;  %v6999_v28 = vrot.slane %v5684_v2, %v6861_v37  ;;  %v7002_v18 = vrot.slane %v5686_v3, %v6861_v37  ;;  %v7005_v29 = vrot.slane %v5688_v6, %v6861_v37  ;;  %v1089_v30 = vpop.permute.xlu0 %1088  ;;  %v1092_v31 = vpop.permute.xlu1 %1091 }
 0x1fe   : > { %v5673_v36 = vcombine.low %v730_v11, %v737_v20  ;;  %v5675_v38 = vcombine.high %v730_v11, %v737_v20  ;;  %v906_v39 = vcombine.low %v6957_v24, %v6960_v25  ;;  %v907_v40 = vcombine.high %v6957_v24, %v6960_v25 }
 0x1ff   : > { %v1464_v41 = vcombine.low %v6996_v23, %v6999_v28  ;;  %v1465_v42 = vcombine.high %v6996_v23, %v6999_v28  ;;  %v5677_v46 = vcombine.low %v746_v34, %v753_v35  ;;  %v5679_v47 = vcombine.high %v746_v34, %v753_v35 }
 0x200   : > { %v7020_v43 = vrot.slane %v5673_v36, %v6861_v37  ;;  %v7023_v45 = vrot.slane %v5675_v38, %v6861_v37  ;;  %v1496_v52 = vcombine.low %v7002_v18, %v7005_v29  ;;  %v1513_v53 = vcombine.high %v6939_v12, %v6942_v13 }
 0x201   : > { %v1463_v32 = vrot.slane %v1449_v4, %v6866_v44  ;;  %v1495_v54 = vrot.slane %v1481_v5, %v6866_v44  ;;  %v1095_v55 = vpop.permute.xlu0 %1094  ;;  %v1098_v60 = vpop.permute.xlu1 %1097  ;;  %v1497_v61 = vcombine.high %v7002_v18, %v7005_v29  ;;  %v7040_v33 = vrot.slane %v5677_v46, %v6861_v37 }
 0x202   : > { %v7043_v12 = vrot.slane %v5679_v47, %v6861_v37  ;;  %v923_v48 = vcombine.high %v6951_v16, %v6954_v19  ;;  %v994_v49 = vcombine.low %v7020_v43, %v7023_v45  ;;  %v995_v50 = vcombine.high %v7020_v43, %v7023_v45  ;;  %5921 = vmatpush3.xpose.msk.msra.mxu1 %vm2246_vm1, %v1513_v53 }
 0x203   : > { %v873_v51 = vrot.slane %v859_v58, %v6866_v44  ;;  %v905_v4 = vrot.slane %v891_v59, %v6866_v44  ;;  %5925 = vmatprep.subr.mxu1 %v6510_v0  ;;  %v1514_v5 = vcombine.low %v1463_v32, %v1495_v54  ;;  %v1515_v13 = vcombine.high %v1463_v32, %v1495_v54 }
 0x204   : > { %v1248_v16 = vcombine.low %v1089_v30, %v1095_v55  ;;  %v1249_v19 = vcombine.high %v1089_v30, %v1095_v55  ;;  %v1026_v62 = vcombine.low %v7040_v33, %v7043_v12  ;;  %v1027_v63 = vcombine.high %v7040_v33, %v7043_v12 }
 0x205   : > { %v1264_v2 = vcombine.low %v1092_v31, %v1098_v60  ;;  %v1265_v7 = vcombine.high %v1092_v31, %v1098_v60  ;;  %v1101_v8 = vpop.permute.xlu0 %1100  ;;  %v1104_v58 = vpop.permute.xlu1 %1103  ;;  %5923 = vmatmul.mubr.msk.f32.vlgmr.msra.gmra.mrb[4].mxu1 %vm2246_vm1, %v923_v48  ;;  %v7069_v59 = vrot.slane %v1464_v41, %v6866_v44  ;;  %v7072_v3 = vrot.slane %v1496_v52, %v6866_v44 }
 0x206   : > { %v1256_v9 = vrot.slane %v1248_v16, %v6861_v37  ;;  %v1263_v10 = vrot.slane %v1249_v19, %v6861_v37  ;;  %5926 = vmatpush3.xpose.msk.msra.mxu1 %vm2246_vm1, %v1514_v5  ;;  %5927 = vmatprep.mubr.msk.f32.mxu1 %vm6512_vm0, %v6510_v0  ;;  %v924_v6 = vcombine.low %v873_v51, %v905_v4 }
 0x207   : > { %v1272_v11 = vrot.slane %v1264_v2, %v6861_v37  ;;  %v1279_v20 = vrot.slane %v1265_v7, %v6861_v37  ;;  %5930 = vmatprep.subr.mxu1 %v6510_v0  ;;  %v925_v21 = vcombine.high %v873_v51, %v905_v4  ;;  %v1516_v22 = vcombine.low %v7069_v59, %v7072_v3 }
 0x208   : > { %v7086_v30 = vrot.slane %v874_v26, %v6866_v44  ;;  %v7089_v31 = vrot.slane %v906_v39, %v6866_v44  ;;  %v1517_v47 = vcombine.high %v7069_v59, %v7072_v3  ;;  %v7128_v59 = vrot.slane %v1497_v61, %v6866_v44 }
 0x209   : > { %v1312_v34 = vcombine.low %v1256_v9, %v1272_v11  ;;  %v1313_v35 = vcombine.high %v1256_v9, %v1272_v11  ;;  %v1328_v36 = vcombine.low %v1263_v10, %v1279_v20  ;;  %v1329_v38 = vcombine.high %v1263_v10, %v1279_v20  ;;  %v1107_v41 = vpop.permute.xlu0 %1106  ;;  %v1110_v46 = vpop.permute.xlu1 %1109  ;;  %5928 = vmatmul.mubr.msk.f32.vlgmr.msra.gmra.mrb[6].mxu1 %vm2246_vm1, %v924_v6 }
 0x20a   : > { %v1280_v52 = vcombine.low %v1101_v8, %v1107_v41  ;;  %v1281_v53 = vcombine.high %v1101_v8, %v1107_v41  ;;  %v1296_v32 = vcombine.low %v1104_v58, %v1110_v46  ;;  %5931 = vmatpush3.xpose.msk.msra.mxu1 %vm2246_vm1, %v1515_v13  ;;  %5932 = vmatprep.mubr.msk.f32.mxu1 %vm6512_vm0, %v6510_v0 }
 0x20b   : > { %v1320_v26 = vrot.slane %v1312_v34, %v6866_v44  ;;  %v1327_v39 = vrot.slane %v1313_v35, %v6866_v44  ;;  %v1336_v54 = vrot.slane %v1328_v36, %v6866_v44  ;;  %v1343_v55 = vrot.slane %v1329_v38, %v6866_v44  ;;  %5935 = vmatprep.subr.mxu1 %v6510_v0 }
 0x20c   : > { %v1288_v60 = vrot.slane %v1280_v52, %v6861_v37  ;;  %v1295_v48 = vrot.slane %v1281_v53, %v6861_v37  ;;  %v1297_v51 = vcombine.high %v1104_v58, %v1110_v46  ;;  %v926_v19 = vcombine.low %v7086_v30, %v7089_v31 }
 0x20d   : > { %v5689_v4 = vcombine.low %v1320_v26, %v1327_v39  ;;  %v5691_v5 = vcombine.high %v1320_v26, %v1327_v39  ;;  %v5693_v13 = vcombine.low %v1336_v54, %v1343_v55  ;;  %v5695_v16 = vcombine.high %v1336_v54, %v1343_v55  ;;  %5933 = vmatmul.mubr.msk.f32.vlgmr.msra.gmra.mrb[8].mxu1 %vm2246_vm1, %v925_v21  ;;  %v517_v3 = vpop.permute.xlu0 %516  ;;  %v520_v61 = vpop.permute.xlu1 %519 }
 0x20e   : > { %v1304_v2 = vrot.slane %v1296_v32, %v6861_v37  ;;  %v1311_v7 = vrot.slane %v1297_v51, %v6861_v37  ;;  %v7113_v8 = vrot.slane %v1465_v42, %v6866_v44  ;;  %5936 = vmatpush3.xpose.msk.msra.mxu1 %vm2246_vm1, %v1516_v22  ;;  %v927_v10 = vcombine.high %v7086_v30, %v7089_v31 }
 0x20f   : > { %v7116_v58 = vrot.slane %v5689_v4, %v6861_v37  ;;  %v7119_v9 = vrot.slane %v5691_v5, %v6861_v37  ;;  %5937 = vmatprep.mubr.msk.f32.mxu1 %vm6512_vm0, %v6510_v0  ;;  %5940 = vmatprep.subr.mxu1 %v6510_v0  ;;  %v7134_v6 = vrot.slane %v5693_v13, %v6861_v37 }
 0x210   : > { %v1344_v23 = vcombine.low %v1288_v60, %v1304_v2  ;;  %v1345_v28 = vcombine.high %v1288_v60, %v1304_v2  ;;  %v1360_v42 = vcombine.low %v1295_v48, %v1311_v7  ;;  %v7137_v11 = vrot.slane %v5695_v16, %v6861_v37 }
 0x211   : > { %v1584_v18 = vcombine.low %v7116_v58, %v7119_v9  ;;  %v1585_v29 = vcombine.high %v7116_v58, %v7119_v9  ;;  %5938 = vmatmul.mubr.msk.f32.vlgmr.msra.gmra.mrb[10].mxu1 %vm2246_vm1, %v926_v19  ;;  %v1361_v22 = vcombine.high %v1295_v48, %v1311_v7  ;;  %v1518_v31 = vcombine.low %v7113_v8, %v7128_v59 }
 0x212   : > { %v1352_v20 = vrot.slane %v1344_v23, %v6866_v44  ;;  %v1359_v21 = vrot.slane %v1345_v28, %v6866_v44  ;;  %v1368_v30 = vrot.slane %v1360_v42, %v6866_v44  ;;  %5941 = vmatpush3.xpose.msk.msra.mxu1 %vm2246_vm1, %v1517_v47  ;;  %5942 = vmatprep.mubr.msk.f32.mxu1 %vm6512_vm0, %v6510_v0 }
 0x213   : > { %v690_v34 = vcombine.low %v6985_v56, %v517_v3  ;;  %v691_v35 = vcombine.high %v6985_v56, %v517_v3  ;;  %v1375_v36 = vrot.slane %v1361_v22, %v6866_v44  ;;  %5945 = vmatprep.subr.mxu1 %v6510_v0  ;;  %v706_v46 = vcombine.low %v6987_v57, %v520_v61 }
 0x214   : > { %v5690_v38 = vcombine.low %v1352_v20, %v1359_v21  ;;  %v5692_v41 = vcombine.high %v1352_v20, %v1359_v21  ;;  %v707_v53 = vcombine.high %v6987_v57, %v520_v61  ;;  %v889_v32 = vrot.slane %v875_v17, %v6866_v44 }
 0x215   : > { %v698_v47 = vrot.slane %v690_v34, %v6861_v37  ;;  %v705_v52 = vrot.slane %v691_v35, %v6861_v37  ;;  %v5694_v39 = vcombine.low %v1368_v30, %v1375_v36  ;;  %v5696_v54 = vcombine.high %v1368_v30, %v1375_v36  ;;  %5943 = vmatmul.mubr.msk.f32.vlgmr.msra.gmra.mrb[12].mxu1 %vm2246_vm1, %v927_v10 }
 0x216   : > { %v7165_v56 = vrot.slane %v5690_v38, %v6861_v37  ;;  %v7168_v26 = vrot.slane %v5692_v41, %v6861_v37  ;;  %5946 = vmatpush3.xpose.msk.msra.mxu1 %vm2246_vm1, %v1518_v31  ;;  %v714_v55 = vrot.slane %v706_v46, %v6861_v37  ;;  %v721_v57 = vrot.slane %v707_v53, %v6861_v37 }
 0x217   : > { %5947 = vmatprep.mubr.msk.f32.mxu1 %vm6512_vm0, %v6510_v0  ;;  %v921_v14 = vrot.slane %v907_v40, %v6866_v44  ;;  %v1616_v15 = vcombine.low %v7134_v6, %v7137_v11  ;;  %v1617_v17 = vcombine.high %v7134_v6, %v7137_v11  ;;  %v7185_v60 = vrot.slane %v5694_v39, %v6861_v37 }
 0x218   : > { %v7188_v48 = vrot.slane %v5696_v54, %v6861_v37  ;;  %5950 = vmatprep.subr.mxu1 %v6510_v0  ;;  %v754_v51 = vcombine.low %v698_v47, %v714_v55  ;;  %v755_v4 = vcombine.high %v698_v47, %v714_v55  ;;  %v770_v5 = vcombine.low %v705_v52, %v721_v57 }
 0x219   : > { %v771_v13 = vcombine.high %v705_v52, %v721_v57  ;;  %v1600_v24 = vcombine.low %v7165_v56, %v7168_v26  ;;  %v928_v40 = vcombine.low %v889_v32, %v921_v14  ;;  %v1519_v16 = vcombine.high %v7113_v8, %v7128_v59 }
 0x21a   : > { %v1632_v25 = vcombine.low %v7185_v60, %v7188_v48  ;;  %v762_v19 = vrot.slane %v754_v51, %v6866_v44  ;;  %v769_v2 = vrot.slane %v755_v4, %v6866_v44  ;;  %v778_v7 = vrot.slane %v770_v5, %v6866_v44  ;;  %v1658_v51 = vpop.permute.xlu1 %1657  ;;  %v1661_v4 = vpop.permute.xlu0 %1660 }
 0x21b   : > { %v785_v10 = vrot.slane %v771_v13, %v6866_v44  ;;  %5948 = vmatmul.mubr.msk.f32.vlgmr.msra.gmra.mrb[14].mxu1 %vm2246_vm1, %v928_v40  ;;  %v929_v23 = vcombine.high %v889_v32, %v921_v14  ;;  %v1592_v28 = vrot.slane %v1584_v18, %v6866_v44  ;;  %v1624_v42 = vrot.slane %v1616_v15, %v6866_v44 }
 0x21c   : > { %v1002_v8 = vrot.slane %v994_v49, %v6866_v44  ;;  %v5674_v59 = vcombine.low %v762_v19, %v769_v2  ;;  %v5676_v3 = vcombine.high %v762_v19, %v769_v2  ;;  %5951 = vmatpush3.xpose.msk.msra.mxu1 %vm2246_vm1, %v1519_v16  ;;  %5952 = vmatprep.mubr.msk.f32.mxu1 %vm6512_vm0, %v6510_v0 }
 0x21d   : > { %v5678_v6 = vcombine.low %v778_v7, %v785_v10  ;;  %v5680_v11 = vcombine.high %v778_v7, %v785_v10  ;;  %5960 = vmatprep.subr.mxu1 %v6510_v0  ;;  %v1648_v61 = vcombine.low %v1592_v28, %v1624_v42  ;;  %v1649_v18 = vcombine.high %v1592_v28, %v1624_v42 }
 0x21e   : > { %v1034_v20 = vrot.slane %v1026_v62, %v6866_v44  ;;  %v945_v49 = vrot.slane %v5674_v59, %v6861_v37  ;;  %v961_v21 = vrot.slane %v5676_v3, %v6861_v37  ;;  %v1599_v31 = vrot.slane %v1585_v29, %v6866_v44 }
 0x21f   : > { %v977_v22 = vrot.slane %v5678_v6, %v6861_v37  ;;  %v993_v30 = vrot.slane %v5680_v11, %v6861_v37  ;;  %5953 = vmatmul.mubr.msk.f32.vlgmr.msra.gmra.mrb[16].mxu1 %vm2246_vm1, %v929_v23  ;;  %5956 = vmatpush3.xpose.msk.msra.mxu0 %vm2246_vm1, %v1648_v61  ;;  %v1601_v62 = vcombine.high %v7165_v56, %v7168_v26 }
 0x220   : > { %v1010_v34 = vcombine.low %v945_v49, %v961_v21  ;;  %5961 = vmatpush3.xpose.msk.msra.mxu1 %vm2246_vm1, %v1649_v18  ;;  %v1058_v36 = vcombine.low %v1002_v8, %v1034_v20  ;;  %5962 = vmatprep.mubr.msk.f32.mxu1 %vm6512_vm0, %v6510_v0  ;;  %v1059_v38 = vcombine.high %v1002_v8, %v1034_v20 }
 0x221   : > { %v1042_v35 = vcombine.low %v977_v22, %v993_v30  ;;  %5965 = vmatprep.subr.mxu0 %v6510_v0  ;;  %v1631_v41 = vrot.slane %v1617_v17, %v6866_v44  ;;  %v1009_v58 = vrot.slane %v995_v50, %v6866_v44  ;;  %5970 = vmatprep.subr.mxu1 %v6510_v0 }
 0x222   : > { %5958 = vmatmul.mubr.msk.f32.vlgmr.msra.gmra.mrb[2].mxu0 %vm2246_vm1, %v1058_v36  ;;  %v1041_v9 = vrot.slane %v1027_v63, %v6866_v44  ;;  %v1608_v29 = vrot.slane %v1600_v24, %v6866_v44  ;;  %v1640_v46 = vrot.slane %v1632_v25, %v6866_v44  ;;  %v1633_v47 = vcombine.high %v7185_v60, %v7188_v48  ;;  %v1664_v24 = vpop.permute.xlu1 %1663 }
 0x223   : > { %5963 = vmatmul.mubr.msk.f32.vlgmr.msra.gmra.mrb[18].mxu1 %vm2246_vm1, %v1059_v38  ;;  %v1650_v43 = vcombine.low %v1599_v31, %v1631_v41  ;;  %v1651_v45 = vcombine.high %v1599_v31, %v1631_v41  ;;  %5967 = vmatprep.mubr.msk.f32.mxu0 %vm6512_vm0, %v6510_v0  ;;  %v1018_v33 = vrot.slane %v1010_v34, %v6866_v44 }
 0x224   : > { %5972 = vmatprep.mubr.msk.f32.mxu1 %vm6512_vm0, %v6510_v0  ;;  %v1050_v12 = vrot.slane %v1042_v35, %v6866_v44  ;;  %v1011_v50 = vcombine.high %v945_v49, %v961_v21  ;;  %v1652_v63 = vcombine.low %v1608_v29, %v1640_v46  ;;  %v1653_v52 = vcombine.high %v1608_v29, %v1640_v46 }
 0x225   : > { %5966 = vmatpush3.xpose.msk.msra.mxu0 %vm2246_vm1, %v1650_v43  ;;  %5971 = vmatpush3.xpose.msk.msra.mxu1 %vm2246_vm1, %v1651_v45  ;;  %v1043_v53 = vcombine.high %v977_v22, %v993_v30  ;;  %v1060_v32 = vcombine.low %v1009_v58, %v1041_v9  ;;  %v1061_v56 = vcombine.high %v1009_v58, %v1041_v9  ;;  %v1667_v43 = vpop.permute.xlu0 %1666 }
 0x226   : > { %5975 = vmatprep.subr.mxu0 %v6510_v0  ;;  %5980 = vmatprep.subr.mxu1 %v6510_v0  ;;  %v1615_v26 = vrot.slane %v1601_v62, %v6866_v44  ;;  %v1647_v39 = vrot.slane %v1633_v47, %v6866_v44  ;;  %v1062_v54 = vcombine.low %v1018_v33, %v1050_v12  ;;  %v1670_v45 = vpop.permute.xlu1 %1669 }
 0x227   : > { %v1063_v55 = vcombine.high %v1018_v33, %v1050_v12  ;;  %v1025_v57 = vrot.slane %v1011_v50, %v6866_v44  ;;  %v1057_v14 = vrot.slane %v1043_v53, %v6866_v44  ;;  %v1702_v5 = vcombine.low %v6836_v27, %v1661_v4 }
 0x228   : > { %5968 = vmatmul.mubr.msk.f32.vlgmr.msra.gmra.mrb[4].mxu0 %vm2246_vm1, %v1060_v32  ;;  %5973 = vmatmul.mubr.msk.f32.vlgmr.msra.gmra.mrb[20].mxu1 %vm2246_vm1, %v1061_v56  ;;  %v1654_v15 = vcombine.low %v1615_v26, %v1647_v39  ;;  %v1655_v17 = vcombine.high %v1615_v26, %v1647_v39  ;;  %v1703_v13 = vcombine.high %v6836_v27, %v1661_v4 }
 0x229   : > { %5976 = vmatpush3.xpose.msk.msra.mxu0 %vm2246_vm1, %v1652_v63  ;;  %5981 = vmatpush3.xpose.msk.msra.mxu1 %vm2246_vm1, %v1653_v52  ;;  %v1064_v60 = vcombine.low %v1025_v57, %v1057_v14  ;;  %v1065_v48 = vcombine.high %v1025_v57, %v1057_v14  ;;  %v1710_v25 = vrot.slane %v1702_v5, %v6861_v37  ;;  %v1676_v33 = vpop.permute.xlu0 %1675 }
 0x22a   : > { %5977 = vmatprep.mubr.msk.f32.mxu0 %vm6512_vm0, %v6510_v0  ;;  %5982 = vmatprep.mubr.msk.f32.mxu1 %vm6512_vm0, %v6510_v0  ;;  %v1717_v40 = vrot.slane %v1703_v13, %v6861_v37  ;;  %v1718_v16 = vcombine.low %v1658_v51, %v1664_v24  ;;  %v1719_v19 = vcombine.high %v1658_v51, %v1664_v24  ;;  %v1673_v12 = vpop.permute.xlu1 %1672 }
 0x22b   : > { %5985 = vmatprep.subr.mxu0 %v6510_v0  ;;  %5990 = vmatprep.subr.mxu1 %v6510_v0  ;;  %v1750_v50 = vcombine.low %v1670_v45, %v1676_v33  ;;  %v1751_v63 = vcombine.high %v1670_v45, %v1676_v33  ;;  %v1734_v52 = vcombine.low %v1667_v43, %v1673_v12 }
 0x22c   : > { %5978 = vmatmul.mubr.msk.f32.vlgmr.msra.gmra.mrb[6].mxu0 %vm2246_vm1, %v1062_v54  ;;  %5983 = vmatmul.mubr.msk.f32.vlgmr.msra.gmra.mrb[22].mxu1 %vm2246_vm1, %v1063_v55  ;;  %v1726_v2 = vrot.slane %v1718_v16, %v6861_v37  ;;  %v1733_v7 = vrot.slane %v1719_v19, %v6861_v37  ;;  %v1735_v53 = vcombine.high %v1667_v43, %v1673_v12 }
 0x22d   : > { %5986 = vmatpush3.xpose.msk.msra.mxu0 %vm2246_vm1, %v1654_v15  ;;  %5991 = vmatpush3.xpose.msk.msra.mxu1 %vm2246_vm1, %v1655_v17  ;;  %v1758_v32 = vrot.slane %v1750_v50, %v6861_v37  ;;  %v1765_v56 = vrot.slane %v1751_v63, %v6861_v37  ;;  %v1742_v26 = vrot.slane %v1734_v52, %v6861_v37  ;;  %v1679_v54 = vpop.permute.xlu0 %1678 }
 0x22e   : > { %5987 = vmatprep.mubr.msk.f32.mxu0 %vm6512_vm0, %v6510_v0  ;;  %5992 = vmatprep.mubr.msk.f32.mxu1 %vm6512_vm0, %v6510_v0  ;;  %v1766_v10 = vcombine.low %v1710_v25, %v1726_v2  ;;  %v1767_v23 = vcombine.high %v1710_v25, %v1726_v2  ;;  %v1782_v28 = vcombine.low %v1717_v40, %v1733_v7  ;;  %v1682_v55 = vpop.permute.xlu1 %1681 }
 0x22f   : > { %5995 = vmatprep.subr.mxu0 %v6510_v0  ;;  %6000 = vmatprep.subr.mxu1 %v6510_v0  ;;  %v1783_v42 = vcombine.high %v1717_v40, %v1733_v7  ;;  %v1749_v39 = vrot.slane %v1735_v53, %v6861_v37  ;;  %v1798_v57 = vcombine.low %v1742_v26, %v1758_v32 }
 0x230   : > { %5988 = vmatmul.mubr.msk.f32.vlgmr.msra.gmra.mrb[8].mxu0 %vm2246_vm1, %v1064_v60  ;;  %5993 = vmatmul.mubr.msk.f32.vlgmr.msra.gmra.mrb[24].mxu1 %vm2246_vm1, %v1065_v48  ;;  %v1774_v8 = vrot.slane %v1766_v10, %v6866_v44  ;;  %v1781_v59 = vrot.slane %v1767_v23, %v6866_v44  ;;  %v1790_v3 = vrot.slane %v1782_v28, %v6866_v44 }
 0x231   : > { %5997 = vmatprep.mubr.msk.f32.mxu0 %vm6512_vm0, %v6510_v0  ;;  %6002 = vmatprep.mubr.msk.f32.mxu1 %vm6512_vm0, %v6510_v0  ;;  %v1797_v6 = vrot.slane %v1783_v42, %v6866_v44  ;;  %v1799_v14 = vcombine.high %v1742_v26, %v1758_v32  ;;  %v1814_v15 = vcombine.low %v1749_v39, %v1765_v56  ;;  %v1688_v5 = vpop.permute.xlu0 %1687 }
 0x232   : > { %v5697_v11 = vcombine.low %v1774_v8, %v1781_v59  ;;  %v5699_v61 = vcombine.high %v1774_v8, %v1781_v59  ;;  %v1815_v17 = vcombine.high %v1749_v39, %v1765_v56  ;;  %v1806_v60 = vrot.slane %v1798_v57, %v6866_v44  ;;  %v1685_v13 = vpop.permute.xlu1 %1684 }
 0x233   : > { %v5701_v18 = vcombine.low %v1790_v3, %v1797_v6  ;;  %v5703_v20 = vcombine.high %v1790_v3, %v1797_v6  ;;  %v1813_v48 = vrot.slane %v1799_v14, %v6866_v44  ;;  %v1822_v51 = vrot.slane %v1814_v15, %v6866_v44 }
 0x234   : > { %v1982_v49 = vrot.slane %v5697_v11, %v6861_v37  ;;  %v1998_v21 = vrot.slane %v5699_v61, %v6861_v37  ;;  %v1829_v4 = vrot.slane %v1815_v17, %v6866_v44  ;;  %v1854_v19 = vcombine.low %v1682_v55, %v1688_v5 }
 0x235   : > { %v2014_v22 = vrot.slane %v5701_v18, %v6861_v37  ;;  %v2030_v30 = vrot.slane %v5703_v20, %v6861_v37  ;;  %v5698_v24 = vcombine.low %v1806_v60, %v1813_v48  ;;  %v5700_v25 = vcombine.high %v1806_v60, %v1813_v48 }
 0x236   : > { %v2038_v31 = vcombine.low %v1982_v49, %v1998_v21  ;;  %v2039_v41 = vcombine.high %v1982_v49, %v1998_v21  ;;  %v5702_v40 = vcombine.low %v1822_v51, %v1829_v4  ;;  %v5704_v16 = vcombine.high %v1822_v51, %v1829_v4 }
 0x237   : > { %v2070_v62 = vcombine.low %v2014_v22, %v2030_v30  ;;  %v2071_v58 = vcombine.high %v2014_v22, %v2030_v30  ;;  %v1855_v2 = vcombine.high %v1682_v55, %v1688_v5  ;;  %v1838_v7 = vcombine.low %v1679_v54, %v1685_v13 }
 0x238   : > { %v2046_v34 = vrot.slane %v2038_v31, %v6866_v44  ;;  %v7307_v9 = vrot.slane %v2039_v41, %v6866_v44  ;;  %v1839_v10 = vcombine.high %v1679_v54, %v1685_v13  ;;  %v1862_v23 = vrot.slane %v1854_v19, %v6861_v37 }
 0x239   : > { %v2078_v35 = vrot.slane %v2070_v62, %v6866_v44  ;;  %v7310_v29 = vrot.slane %v2071_v58, %v6866_v44  ;;  %v1869_v28 = vrot.slane %v1855_v2, %v6861_v37  ;;  %v1846_v42 = vrot.slane %v1838_v7, %v6861_v37 }
 0x23a   : > { %v1853_v8 = vrot.slane %v1839_v10, %v6861_v37  ;;  %v2005_v41 = vrot.slane %v5700_v25, %v6861_v37  ;;  %v2021_v58 = vrot.slane %v5702_v40, %v6861_v37  ;;  %v2037_v43 = vrot.slane %v5704_v16, %v6861_v37 }
 0x23b   : > { %v2102_v36 = vcombine.low %v2046_v34, %v2078_v35  ;;  %v2103_v38 = vcombine.high %v2046_v34, %v2078_v35  ;;  %v2104_v46 = vcombine.low %v7307_v9, %v7310_v29  ;;  %v2105_v47 = vcombine.high %v7307_v9, %v7310_v29 }
 0x23c   : > { %v1902_v59 = vcombine.low %v1846_v42, %v1862_v23  ;;  %v1903_v3 = vcombine.high %v1846_v42, %v1862_v23  ;;  %v1918_v6 = vcombine.low %v1853_v8, %v1869_v28  ;;  %v1919_v11 = vcombine.high %v1853_v8, %v1869_v28 }
 0x23d   : > { %5996 = vmatpush3.msra.mxu0 %v2102_v36  ;;  %6001 = vmatpush3.msra.mxu1 %v2103_v38  ;;  %v1989_v38 = vrot.slane %v5698_v24, %v6861_v37  ;;  %v2086_v32 = vcombine.low %v2021_v58, %v2037_v43  ;;  %v2087_v26 = vcombine.high %v2021_v58, %v2037_v43 }
 0x23e   : > { %6005 = vmatprep.subr.mxu0 %v6510_v0  ;;  %6010 = vmatprep.subr.mxu1 %v6510_v0  ;;  %v1910_v61 = vrot.slane %v1902_v59, %v6866_v44  ;;  %v1917_v18 = vrot.slane %v1903_v3, %v6866_v44  ;;  %v1926_v20 = vrot.slane %v1918_v6, %v6866_v44 }
 0x23f   : > { %v1933_v49 = vrot.slane %v1919_v11, %v6866_v44  ;;  %v2054_v53 = vcombine.low %v1989_v38, %v2005_v41  ;;  %v2055_v56 = vcombine.high %v1989_v38, %v2005_v41  ;;  %v7348_v15 = vrot.slane %v2086_v32, %v6866_v44 }
 0x240   : > { %v5705_v21 = vcombine.low %v1910_v61, %v1917_v18  ;;  %v5707_v22 = vcombine.high %v1910_v61, %v1917_v18  ;;  %v7354_v60 = vrot.slane %v2087_v26, %v6866_v44 }
 0x241   : > { %v5709_v30 = vcombine.low %v1926_v20, %v1933_v49  ;;  %v5711_v31 = vcombine.high %v1926_v20, %v1933_v49  ;;  %v7345_v14 = vrot.slane %v2054_v53, %v6866_v44  ;;  %v7351_v17 = vrot.slane %v2055_v56, %v6866_v44 }
 0x242   : > { %v2118_v45 = vrot.slane %v5705_v21, %v6861_v37  ;;  %v2134_v33 = vrot.slane %v5707_v22, %v6861_v37 }
 0x243   : > { %v2150_v12 = vrot.slane %v5709_v30, %v6861_v37  ;;  %v2166_v50 = vrot.slane %v5711_v31, %v6861_v37  ;;  %v2106_v24 = vcombine.low %v7345_v14, %v7348_v15  ;;  %v2107_v25 = vcombine.high %v7345_v14, %v7348_v15 }
 0x244   : > { %v2174_v39 = vcombine.low %v2118_v45, %v2134_v33  ;;  %v2175_v55 = vcombine.high %v2118_v45, %v2134_v33  ;;  %v2108_v40 = vcombine.low %v7351_v17, %v7354_v60  ;;  %v2109_v16 = vcombine.high %v7351_v17, %v7354_v60 }
 0x245   : > { %v2206_v54 = vcombine.low %v2150_v12, %v2166_v50  ;;  %v2207_v10 = vcombine.high %v2150_v12, %v2166_v50 }
 0x246   : > { %v7359_v4 = vrot.slane %v2174_v39, %v6866_v44  ;;  %v7365_v13 = vrot.slane %v2175_v55, %v6866_v44 }
 0x247   : > { %v7362_v5 = vrot.slane %v2206_v54, %v6866_v44  ;;  %v7384_v8 = vrot.slane %v2207_v10, %v6866_v44 }
 0x249   : > { %v2238_v2 = vcombine.low %v7359_v4, %v7362_v5  ;;  %v2239_v7 = vcombine.high %v7359_v4, %v7362_v5  ;;  %v2240_v3 = vcombine.low %v7365_v13, %v7384_v8  ;;  %v2241_v6 = vcombine.high %v7365_v13, %v7384_v8 }
 0x2cd   : > { %v2319_v62 = vpop.f32.mrb[2].mxu1 }
 0x2ce   : > { %v7332_v34 = vmul.f32 0.35355338, %v2319_v62  ;;  %v5919_v35 = vpop.f32.mrb[3].mxu1 }
 0x2d0   : > { %v3479_v36 = vsel %vm2246_vm1, %v7332_v34, -inf }
 0x2d1   : > { %3480 = vmax.xlane.f32.xlu0 %v3479_v36 }
 0x2d8   : > { %v2395_v63 = vpop.f32.mrb[4].mxu1 }
 0x2d9   : > { %v5924_v52 = vpop.f32.mrb[5].mxu1  ;;  %v7402_v45 = vmul.f32 0.35355338, %v2395_v63 }
 0x2db   : > { %v3482_v56 = vsel %vm2246_vm1, %v7402_v45, -inf }
 0x2dc   : > { %v2471_v57 = vpop.f32.mrb[6].mxu1 }
 0x2dd   : > { %v7356_v48 = vmul.f32 0.35355338, %v2471_v57  ;;  %v5929_v51 = vpop.f32.mrb[7].mxu1 }
 0x2df   : > { %v3485_v19 = vsel %vm2246_vm1, %v7356_v48, -inf }
 0x2e0   : > { %3486 = vmax.xlane.f32.xlu0 %v3485_v19  ;;  %v2547_v23 = vpop.f32.mrb[8].mxu1 }
 0x2e1   : > { %v7381_v28 = vmul.f32 0.35355338, %v2547_v23  ;;  %v5934_v42 = vpop.f32.mrb[9].mxu1 }
 0x2e3   : > { %v3488_v59 = vsel %vm2246_vm1, %v7381_v28, -inf }
 0x2e4   : > { %3489 = vmax.xlane.f32.xlu0 %v3488_v59  ;;  %v2623_v11 = vpop.f32.mrb[10].mxu1 }
 0x2e5   : > { %v5939_v61 = vpop.f32.mrb[11].mxu1 }
 0x2e8   : > { %v2699_v18 = vpop.f32.mrb[12].mxu1 }
 0x2e9   : > { %v7392_v20 = vmul.f32 0.35355338, %v2699_v18  ;;  %v5944_v49 = vpop.f32.mrb[13].mxu1 }
 0x2eb   : > { %v3494_v21 = vsel %vm2246_vm1, %v7392_v20, -inf }
 0x2ec   : > { %3495 = vmax.xlane.f32.xlu0 %v3494_v21 }
 0x2ee   : > { %v2775_v22 = vpop.f32.mrb[14].mxu1 }
 0x2ef   : > { %v5949_v30 = vpop.f32.mrb[15].mxu1 }
 0x2f2   : > { %v2851_v31 = vpop.f32.mrb[16].mxu1 }
 0x2f3   : > { %v7396_v62 = vmul.f32 0.35355338, %v2851_v31  ;;  %v5954_v35 = vpop.f32.mrb[17].mxu1 }
 0x2f5   : > { %v3500_v36 = vsel %vm2246_vm1, %v7396_v62, -inf  ;;  %v2927_v38 = vpop.f32.mrb[2].mxu0 }
 0x2f6   : > { %3501 = vmax.xlane.f32.xlu0 %v3500_v36  ;;  %v7400_v41 = vmul.f32 0.35355338, %v2927_v38  ;;  %v3003_v58 = vpop.f32.mrb[18].mxu1  ;;  %v5959_v43 = vpop.f32.mrb[3].mxu0 }
 0x2f7   : > { %v7404_v33 = vmul.f32 0.35355338, %v3003_v58  ;;  %v5964_v12 = vpop.f32.mrb[19].mxu1  ;;  %v7431_v58 = vmul.f32 0.35355338, %v2623_v11 }
 0x2f8   : > { %v3503_v50 = vsel %vm2246_vm1, %v7400_v41, -inf  ;;  %v7435_v12 = vmul.f32 0.35355338, %v2775_v22 }
 0x2f9   : > { %v3506_v52 = vsel %vm2246_vm1, %v7404_v33, -inf  ;;  %3504 = vmax.xlane.f32.xlu1 %v3503_v50  ;;  %v3491_v50 = vsel %vm2246_vm1, %v7431_v58, -inf }
 0x2fa   : > { %3507 = vmax.xlane.f32.xlu0 %v3506_v52  ;;  %v3497_v52 = vsel %vm2246_vm1, %v7435_v12, -inf }
 0x2fb   : > { %v3155_v53 = vpop.f32.mrb[20].mxu1  ;;  %v3079_v32 = vpop.f32.mrb[4].mxu0 }
 0x2fc   : > { %v7412_v26 = vmul.f32 0.35355338, %v3155_v53  ;;  %v7414_v63 = vmul.f32 0.35355338, %v3079_v32  ;;  %v5969_v39 = vpop.f32.mrb[5].mxu0  ;;  %v5974_v54 = vpop.f32.mrb[21].mxu1 }
 0x2fd   : > { %3483 = vmax.xlane.f32.xlu1 %v3482_v56 }
 0x2fe   : > { %v3512_v55 = vsel %vm2246_vm1, %v7412_v26, -inf  ;;  %v3509_v19 = vsel %vm2246_vm1, %v7414_v63, -inf }
 0x2ff   : > { %3513 = vmax.xlane.f32.xlu0 %v3512_v55  ;;  %v3231_v57 = vpop.f32.mrb[6].mxu0  ;;  %v3307_v51 = vpop.f32.mrb[22].mxu1 }
 0x300   : > { %v3475_v10 = vmul.f32 0.35355338, %v3231_v57  ;;  %v7420_v23 = vmul.f32 0.35355338, %v3307_v51  ;;  %v5979_v42 = vpop.f32.mrb[7].mxu0  ;;  %v5984_v59 = vpop.f32.mrb[23].mxu1 }
 0x301   : > { %3510 = vmax.xlane.f32.xlu1 %v3509_v19 }
 0x302   : > { %v3518_v61 = vsel %vm2246_vm1, %v7420_v23, -inf  ;;  %v3515_v21 = vsel %vm2246_vm1, %v3475_v10, -inf }
 0x303   : > { %3519 = vmax.xlane.f32.xlu0 %v3518_v61  ;;  %v3383_v18 = vpop.f32.mrb[8].mxu0  ;;  %v3459_v49 = vpop.f32.mrb[24].mxu1 }
 0x304   : > { %v7425_v30 = vmul.f32 0.35355338, %v3383_v18  ;;  %v7427_v31 = vmul.f32 0.35355338, %v3459_v49  ;;  %v5989_v35 = vpop.f32.mrb[9].mxu0  ;;  %v5994_v36 = vpop.f32.mrb[25].mxu1 }
 0x305   : > { %3516 = vmax.xlane.f32.xlu1 %v3515_v21 }
 0x306   : > { %v3524_v38 = vsel %vm2246_vm1, %v7427_v31, -inf  ;;  %v3521_v43 = vsel %vm2246_vm1, %v7425_v30, -inf }
 0x307   : > { %3525 = vmax.xlane.f32.xlu0 %v3524_v38 }
 0x309   : > { %3522 = vmax.xlane.f32.xlu1 %v3521_v43 }
 0x30d   : > { %3492 = vmax.xlane.f32.xlu1 %v3491_v50 }
 0x311   : > { %3498 = vmax.xlane.f32.xlu1 %v3497_v52 }
 0x31d   : > { %1690 = vrot.lane.b32.xlu0 %v6836_v27, %s6524_s23 }
 0x322   : > { %1693 = vrot.lane.b32.xlu1 %v6836_v27, %s6525_s24 }
 0x35e   : > { %v3481_v11 = vpop.xlane.xlu0 %3480 }
 0x35f   : > { %v3527_v53 = vsub.f32 %v7332_v34, %v3481_v11 }
 0x361   : > { %v3543_v32 = vmul.f32 1.442695, %v3527_v53 }
 0x363   : > { %6281 = vpow2.f32 %v3543_v32 }
 0x36d   : > { %v7446_v22 = vpop.eup %6281  ;;  %v3487_v39 = vpop.xlane.xlu0 %3486 }
 0x36e   : > { %v3575_v56 = vsel %vm2246_vm1, %v7446_v22, 0.0  ;;  %v3529_v57 = vsub.f32 %v7356_v48, %v3487_v39 }
 0x36f   : > { %3576 = vadd.xlane.f32.xlu1 %v3575_v56 }
 0x370   : > { %v3547_v59 = vmul.f32 1.442695, %v3529_v57 }
 0x371   : > { %v3490_v54 = vpop.xlane.xlu0 %3489 }
 0x372   : > { %v3530_v21 = vsub.f32 %v7381_v28, %v3490_v54 }
 0x374   : > { %v3549_v48 = vmul.f32 1.442695, %v3530_v21 }
 0x379   : > { %v3496_v55 = vpop.xlane.xlu0 %3495 }
 0x383   : > { %v3502_v51 = vpop.xlane.xlu0 %3501 }
 0x384   : > { %v3534_v57 = vsub.f32 %v7396_v62, %v3502_v51 }
 0x386   : > { %v3505_v19 = vpop.xlane.xlu1 %3504 }
 0x387   : > { %v3535_v42 = vsub.f32 %v7400_v41, %v3505_v19  ;;  %v3508_v49 = vpop.xlane.xlu0 %3507 }
 0x389   : > { %v3559_v61 = vmul.f32 1.442695, %v3535_v42 }
 0x38a   : > { %v3484_v34 = vpop.xlane.xlu1 %3483 }
 0x38b   : > { %6283 = vpow2.f32 %v3559_v61  ;;  %v3528_v18 = vsub.f32 %v7402_v45, %v3484_v34  ;;  %v3532_v45 = vsub.f32 %v7392_v20, %v3496_v55  ;;  %v3557_v34 = vmul.f32 1.442695, %v3534_v57 }
 0x38c   : > { %6285 = vpow2.f32 %v3547_v59  ;;  %v3514_v50 = vpop.xlane.xlu0 %3513 }
 0x38d   : > { %v3545_v35 = vmul.f32 1.442695, %v3528_v18  ;;  %v3538_v62 = vsub.f32 %v7412_v26, %v3514_v50 }
 0x38e   : > { %v3511_v36 = vpop.xlane.xlu1 %3510 }
 0x38f   : > { %6287 = vpow2.f32 %v3545_v35  ;;  %v3537_v38 = vsub.f32 %v7414_v63, %v3511_v36 }
 0x390   : > { %v3520_v39 = vpop.xlane.xlu0 %3519 }
 0x391   : > { %v3563_v43 = vmul.f32 1.442695, %v3537_v38 }
 0x392   : > { %v3517_v52 = vpop.xlane.xlu1 %3516 }
 0x393   : > { %6289 = vpow2.f32 %v3563_v43  ;;  %v3539_v41 = vsub.f32 %v3475_v10, %v3517_v52  ;;  %v3553_v10 = vmul.f32 1.442695, %v3532_v45 }
 0x394   : > { %6291 = vpow2.f32 %v3549_v48  ;;  %v3526_v18 = vpop.xlane.xlu0 %3525  ;;  %v3565_v48 = vmul.f32 1.442695, %v3538_v62 }
 0x395   : > { %v7455_v11 = vpop.eup %6283  ;;  %v3567_v53 = vmul.f32 1.442695, %v3539_v41  ;;  %v3542_v26 = vsub.f32 %v7427_v31, %v3526_v18 }
 0x396   : > { %v3523_v32 = vpop.xlane.xlu1 %3522  ;;  %v3599_v28 = vsel %vm2246_vm1, %v7455_v11, 0.0  ;;  %v7460_v56 = vpop.eup %6285 }
 0x397   : > { %6293 = vpow2.f32 %v3567_v53  ;;  %v3541_v63 = vsub.f32 %v7425_v30, %v3523_v32  ;;  %3600 = vadd.xlane.f32.xlu1 %v3599_v28  ;;  %v3581_v20 = vsel %vm2246_vm1, %v7460_v56, 0.0  ;;  %v3536_v30 = vsub.f32 %v7404_v33, %v3508_v49 }
 0x398   : > { %v3540_v33 = vsub.f32 %v7420_v23, %v3520_v39  ;;  %v3573_v23 = vmul.f32 1.442695, %v3542_v26 }
 0x399   : > { %v7463_v54 = vpop.eup %6287  ;;  %v3571_v19 = vmul.f32 1.442695, %v3541_v63  ;;  %v3561_v38 = vmul.f32 1.442695, %v3536_v30 }
 0x39a   : > { %v3493_v42 = vpop.xlane.xlu1 %3492  ;;  %v3578_v55 = vsel %vm2246_vm1, %v7463_v54, 0.0 }
 0x39b   : > { %6295 = vpow2.f32 %v3571_v19  ;;  %v3531_v59 = vsub.f32 %v7431_v58, %v3493_v42  ;;  %3582 = vadd.xlane.f32.xlu1 %v3581_v20  ;;  %3579 = vadd.xlane.f32.xlu0 %v3578_v55 }
 0x39c   : > { %6297 = vpow2.f32 %v3553_v10 }
 0x39d   : > { %v7472_v61 = vpop.eup %6289  ;;  %v3551_v51 = vmul.f32 1.442695, %v3531_v59 }
 0x39e   : > { %v3499_v21 = vpop.xlane.xlu1 %3498  ;;  %v3605_v35 = vsel %vm2246_vm1, %v7472_v61, 0.0  ;;  %v7477_v36 = vpop.eup %6291 }
 0x39f   : > { %6299 = vpow2.f32 %v3551_v51  ;;  %v3533_v58 = vsub.f32 %v7435_v12, %v3499_v21  ;;  %3606 = vadd.xlane.f32.xlu0 %v3605_v35  ;;  %v3584_v50 = vsel %vm2246_vm1, %v7477_v36, 0.0  ;;  %v3569_v12 = vmul.f32 1.442695, %v3540_v33 }
 0x3a0   : > { %6301 = vpow2.f32 %v3557_v34 }
 0x3a1   : > { %v7481_v49 = vpop.eup %6293  ;;  %v3555_v43 = vmul.f32 1.442695, %v3533_v58  ;;  %v7538_v58 = vpop.permute.xlu0 %1690 }
 0x3a2   : > { %v3611_v52 = vsel %vm2246_vm1, %v7481_v49, 0.0  ;;  %v7528_v51 = vpop.permute.xlu1 %1693 }
 0x3a3   : > { %6303 = vpow2.f32 %v3555_v43  ;;  %3585 = vadd.xlane.f32.xlu0 %v3584_v50  ;;  %3612 = vadd.xlane.f32.xlu1 %v3611_v52 }
 0x3a4   : > { %6305 = vpow2.f32 %v3561_v38 }
 0x3a5   : > { %v7488_v41 = vpop.eup %6295  ;;  %6307 = vpow2.f32 %v3565_v48 }
 0x3a6   : > { %v3617_v45 = vsel %vm2246_vm1, %v7488_v41, 0.0  ;;  %v7492_v31 = vpop.eup %6297  ;;  %6309 = vpow2.f32 %v3569_v12 }
 0x3a7   : > { %3618 = vadd.xlane.f32.xlu0 %v3617_v45  ;;  %6311 = vpow2.f32 %v3573_v23  ;;  %v3590_v32 = vsel %vm2246_vm1, %v7492_v31, 0.0 }
 0x3a9   : > { %v7494_v53 = vpop.eup %6299 }
 0x3aa   : > { %v3587_v28 = vsel %vm2246_vm1, %v7494_v53, 0.0  ;;  %v7500_v63 = vpop.eup %6301 }
 0x3ab   : > { %3591 = vadd.xlane.f32.xlu0 %v3590_v32  ;;  %3588 = vadd.xlane.f32.xlu1 %v3587_v28  ;;  %v3596_v57 = vsel %vm2246_vm1, %v7500_v63, 0.0 }
 0x3ad   : > { %v7502_v39 = vpop.eup %6303 }
 0x3ae   : > { %v7504_v10 = vpop.eup %6305  ;;  %v3593_v19 = vsel %vm2246_vm1, %v7502_v39, 0.0 }
 0x3af   : > { %v7510_v42 = vpop.eup %6307  ;;  %3597 = vadd.xlane.f32.xlu1 %v3596_v57  ;;  %3594 = vadd.xlane.f32.xlu0 %v3593_v19  ;;  %v3602_v59 = vsel %vm2246_vm1, %v7504_v10, 0.0 }
 0x3b0   : > { %v7512_v20 = vpop.eup %6309  ;;  %v3608_v55 = vsel %vm2246_vm1, %v7510_v42, 0.0 }
 0x3b1   : > { %v7518_v30 = vpop.eup %6311  ;;  %v3614_v62 = vsel %vm2246_vm1, %v7512_v20, 0.0 }
 0x3b2   : > { %v3620_v34 = vsel %vm2246_vm1, %v7518_v30, 0.0 }
 0x3b3   : > { %3609 = vadd.xlane.f32.xlu1 %v3608_v55  ;;  %3603 = vadd.xlane.f32.xlu0 %v3602_v59 }
 0x3b7   : > { %3621 = vadd.xlane.f32.xlu1 %v3620_v34  ;;  %3615 = vadd.xlane.f32.xlu0 %v3614_v62 }
 0x3c8   : > { %1696 = vrot.lane.b32.xlu1 %v6836_v27, %s6526_s26 }
 0x3cd   : > { %1699 = vrot.lane.b32.xlu0 %v6836_v27, %s6527_s15 }
 0x3fc   : > { %v3577_v18 = vpop.xlane.xlu1 %3576 }
 0x3fd   : > { %6313 = vrcp.f32 %v3577_v18 }
 0x407   : > { %v6314_v21 = vpop.eup %6313 }
 0x408   : > { %v3639_v35 = vmul.f32 %v6314_v21, %v7446_v22 }
 0x40a   : > { %5998 = vmatmul.mubr.msk.f32.vlgmr.msra.gmra.mrb[10].mxu0 %vm2246_vm1, %v3639_v35 }
 0x40b   : > { %6006 = vmatpush3.msra.mxu0 %v2104_v46  ;;  %6007 = vmatprep.mubr.msk.f32.mxu0 %vm6512_vm0, %v6510_v0 }
 0x40c   : > { %6015 = vmatprep.subr.mxu0 %v6510_v0 }
 0x424   : > { %v3601_v27 = vpop.xlane.xlu1 %3600 }
 0x428   : > { %v3580_v38 = vpop.xlane.xlu0 %3579  ;;  %v3583_v33 = vpop.xlane.xlu1 %3582 }
 0x429   : > { %6315 = vrcp.f32 %v3580_v38 }
 0x42a   : > { %6317 = vrcp.f32 %v3583_v33 }
 0x42c   : > { %v3607_v48 = vpop.xlane.xlu0 %3606 }
 0x430   : > { %v3586_v22 = vpop.xlane.xlu0 %3585  ;;  %v7541_v46 = vpop.xlane.xlu1 %3612 }
 0x431   : > { %6319 = vrcp.f32 %v3586_v22 }
 0x433   : > { %v6316_v26 = vpop.eup %6315 }
 0x434   : > { %v6318_v43 = vpop.eup %6317  ;;  %v3640_v50 = vmul.f32 %v6316_v26, %v7463_v54  ;;  %v7543_v52 = vpop.xlane.xlu0 %3618 }
 0x435   : > { %v3641_v12 = vmul.f32 %v6318_v43, %v7460_v56 }
 0x436   : > { %6003 = vmatmul.mubr.msk.f32.vlgmr.msra.gmra.mrb[26].mxu1 %vm2246_vm1, %v3640_v50 }
 0x437   : > { %6008 = vmatmul.mubr.msk.f32.vlgmr.msra.gmra.mrb[12].mxu0 %vm2246_vm1, %v3641_v12  ;;  %6011 = vmatpush3.msra.mxu1 %v2105_v47 }
 0x438   : > { %6016 = vmatpush3.msra.mxu0 %v2106_v24  ;;  %v3592_v23 = vpop.xlane.xlu0 %3591  ;;  %v3589_v54 = vpop.xlane.xlu1 %3588  ;;  %6012 = vmatprep.mubr.msk.f32.mxu1 %vm6512_vm0, %v6510_v0 }
 0x439   : > { %6321 = vrcp.f32 %v3592_v23  ;;  %6020 = vmatprep.subr.mxu1 %v6510_v0  ;;  %6017 = vmatprep.mubr.msk.f32.mxu0 %vm6512_vm0, %v6510_v0 }
 0x43a   : > { %6323 = vrcp.f32 %v3589_v54  ;;  %6025 = vmatprep.subr.mxu0 %v6510_v0 }
 0x43b   : > { %v6320_v9 = vpop.eup %6319 }
 0x43c   : > { %v3642_v29 = vmul.f32 %v6320_v9, %v7477_v36  ;;  %v3595_v47 = vpop.xlane.xlu0 %3594  ;;  %v3598_v56 = vpop.xlane.xlu1 %3597 }
 0x43d   : > { %6325 = vrcp.f32 %v3595_v47 }
 0x43e   : > { %6327 = vrcp.f32 %v3598_v56  ;;  %6013 = vmatmul.mubr.msk.f32.vlgmr.msra.gmra.mrb[28].mxu1 %vm2246_vm1, %v3642_v29 }
 0x43f   : > { %6021 = vmatpush3.msra.mxu1 %v2107_v25  ;;  %6022 = vmatprep.mubr.msk.f32.mxu1 %vm6512_vm0, %v6510_v0  ;;  %6329 = vrcp.f32 %v3601_v27 }
 0x440   : > { %v3604_v24 = vpop.xlane.xlu0 %3603  ;;  %v3610_v45 = vpop.xlane.xlu1 %3609  ;;  %6030 = vmatprep.subr.mxu1 %v6510_v0 }
 0x441   : > { %6331 = vrcp.f32 %v3604_v24 }
 0x442   : > { %6333 = vrcp.f32 %v3607_v48 }
 0x443   : > { %v6322_v36 = vpop.eup %6321  ;;  %6335 = vrcp.f32 %v3610_v45 }
 0x444   : > { %v6324_v32 = vpop.eup %6323  ;;  %v3644_v28 = vmul.f32 %v6322_v36, %v7492_v31  ;;  %v3616_v57 = vpop.xlane.xlu0 %3615  ;;  %6337 = vrcp.f32 %v7541_v46 }
 0x445   : > { %v3622_v19 = vpop.xlane.xlu1 %3621  ;;  %v3643_v14 = vmul.f32 %v6324_v32, %v7494_v53  ;;  %6339 = vrcp.f32 %v3616_v57 }
 0x446   : > { %6023 = vmatmul.mubr.msk.f32.vlgmr.msra.gmra.mrb[30].mxu1 %vm2246_vm1, %v3644_v28  ;;  %6341 = vrcp.f32 %v7543_v52 }
 0x447   : > { %v6326_v15 = vpop.eup %6325  ;;  %6018 = vmatmul.mubr.msk.f32.vlgmr.msra.gmra.mrb[14].mxu0 %vm2246_vm1, %v3643_v14  ;;  %6031 = vmatpush3.msra.mxu1 %v2109_v16  ;;  %6343 = vrcp.f32 %v3622_v19 }
 0x448   : > { %v6328_v25 = vpop.eup %6327  ;;  %v3645_v55 = vmul.f32 %v6326_v15, %v7502_v39  ;;  %6026 = vmatpush3.msra.mxu0 %v2108_v40  ;;  %v1700_v31 = vpop.permute.xlu0 %1699  ;;  %6027 = vmatprep.mubr.msk.f32.mxu0 %vm6512_vm0, %v6510_v0 }
 0x449   : > { %v1697_v59 = vpop.permute.xlu1 %1696  ;;  %v3646_v53 = vmul.f32 %v6328_v25, %v7500_v63  ;;  %v1886_v34 = vcombine.low %v7528_v51, %v1700_v31  ;;  %v1887_v62 = vcombine.high %v7528_v51, %v1700_v31  ;;  %6032 = vmatprep.mubr.msk.f32.mxu1 %vm6512_vm0, %v6510_v0  ;;  %v6330_v39 = vpop.eup %6329  ;;  %6035 = vmatprep.subr.mxu0 %v6510_v0 }
 0x44a   : > { %v1870_v16 = vcombine.low %v7538_v58, %v1697_v59  ;;  %v1871_v17 = vcombine.high %v7538_v58, %v1697_v59  ;;  %6040 = vmatprep.subr.mxu1 %v6510_v0  ;;  %v3647_v58 = vmul.f32 %v6330_v39, %v7455_v11 }
 0x44b   : > { %v6332_v60 = vpop.eup %6331  ;;  %v1894_v40 = vrot.slane %v1886_v34, %v6861_v37  ;;  %v1901_v63 = vrot.slane %v1887_v62, %v6861_v37  ;;  %6028 = vmatmul.mubr.msk.f32.vlgmr.msra.gmra.mrb[16].mxu0 %vm2246_vm1, %v3645_v55  ;;  %6033 = vmatmul.mubr.msk.f32.vlgmr.msra.gmra.mrb[32].mxu1 %vm2246_vm1, %v3646_v53 }
 0x44c   : > { %v1878_v18 = vrot.slane %v1870_v16, %v6861_v37  ;;  %v3648_v51 = vmul.f32 %v6332_v60, %v7504_v10  ;;  %v1885_v21 = vrot.slane %v1871_v17, %v6861_v37  ;;  %6036 = vmatpush3.msra.mxu0 %v2238_v2  ;;  %6041 = vmatpush3.msra.mxu1 %v2239_v7  ;;  %v6334_v35 = vpop.eup %6333 }
 0x44d   : > { %6037 = vmatprep.mubr.msk.f32.mxu0 %vm6512_vm0, %v6510_v0  ;;  %6042 = vmatprep.mubr.msk.f32.mxu1 %vm6512_vm0, %v6510_v0  ;;  %v6336_v10 = vpop.eup %6335  ;;  %v3649_v7 = vmul.f32 %v6334_v35, %v7472_v61 }
 0x44e   : > { %v1934_v27 = vcombine.low %v1878_v18, %v1894_v40  ;;  %v1935_v38 = vcombine.high %v1878_v18, %v1894_v40  ;;  %v1950_v2 = vcombine.low %v1885_v21, %v1901_v63  ;;  %v1951_v33 = vcombine.high %v1885_v21, %v1901_v63  ;;  %6045 = vmatprep.subr.mxu0 %v6510_v0  ;;  %v6338_v23 = vpop.eup %6337 }
 0x44f   : > { %6050 = vmatprep.subr.mxu1 %v6510_v0  ;;  %6038 = vmatmul.mubr.msk.f32.vlgmr.msra.gmra.mrb[18].mxu0 %vm2246_vm1, %v3647_v58  ;;  %v3650_v22 = vmul.f32 %v6336_v10, %v7510_v42  ;;  %v6340_v9 = vpop.eup %6339  ;;  %v3651_v32 = vmul.f32 %v6338_v23, %v7481_v49 }
 0x450   : > { %v1942_v4 = vrot.slane %v1934_v27, %v6866_v44  ;;  %v1949_v5 = vrot.slane %v1935_v38, %v6866_v44  ;;  %6043 = vmatmul.mubr.msk.f32.vlgmr.msra.gmra.mrb[34].mxu1 %vm2246_vm1, %v3648_v51  ;;  %v1958_v11 = vrot.slane %v1950_v2, %v6866_v44  ;;  %v1965_v48 = vrot.slane %v1951_v33, %v6866_v44  ;;  %v6342_v36 = vpop.eup %6341 }
 0x451   : > { %6046 = vmatpush3.msra.mxu0 %v2240_v3  ;;  %6051 = vmatpush3.msra.mxu1 %v2241_v6  ;;  %v3652_v28 = vmul.f32 %v6340_v9, %v7512_v20  ;;  %v6344_v57 = vpop.eup %6343  ;;  %v3653_v15 = vmul.f32 %v6342_v36, %v7488_v41 }
 0x452   : > { %v5706_v26 = vcombine.low %v1942_v4, %v1949_v5  ;;  %v5708_v43 = vcombine.high %v1942_v4, %v1949_v5  ;;  %6047 = vmatprep.mubr.msk.f32.mxu0 %vm6512_vm0, %v6510_v0  ;;  %6052 = vmatprep.mubr.msk.f32.mxu1 %vm6512_vm0, %v6510_v0  ;;  %v5710_v61 = vcombine.low %v1958_v11, %v1965_v48 }
 0x453   : > { %v5712_v50 = vcombine.high %v1958_v11, %v1965_v48  ;;  %6055 = vmatprep.subr.mxu0 %v6510_v0  ;;  %6060 = vmatprep.subr.mxu1 %v6510_v0  ;;  %v3654_v25 = vmul.f32 %v6344_v57, %v7518_v30 }
 0x454   : > { %v2125_v13 = vrot.slane %v5706_v26, %v6861_v37  ;;  %v2141_v8 = vrot.slane %v5708_v43, %v6861_v37  ;;  %6048 = vmatmul.mubr.msk.f32.vlgmr.msra.gmra.mrb[20].mxu0 %vm2246_vm1, %v3649_v7  ;;  %6053 = vmatmul.mubr.msk.f32.vlgmr.msra.gmra.mrb[36].mxu1 %vm2246_vm1, %v3650_v22  ;;  %v2157_v3 = vrot.slane %v5710_v61, %v6861_v37  ;;  %v5456_v22 = vld [vmem:[#allocation7] sm:$0xff]  ;;  %v5457_v26 = vld [vmem:[#allocation7 + $0x8] sm:$0xff] }
 0x455   : > { %v2173_v6 = vrot.slane %v5712_v50, %v6861_v37  ;;  %6057 = vmatprep.mubr.msk.f32.mxu0 %vm6512_vm0, %v6510_v0  ;;  %6062 = vmatprep.mubr.msk.f32.mxu1 %vm6512_vm0, %v6510_v0 }
 0x456   : > { %v2190_v42 = vcombine.low %v2125_v13, %v2141_v8  ;;  %v2191_v46 = vcombine.high %v2125_v13, %v2141_v8  ;;  %v6167_v8 = vpack.c.bf16 %v5457_v26, %v5456_v22 }
 0x457   : > { %v2222_v52 = vcombine.low %v2157_v3, %v2173_v6  ;;  %v2223_v12 = vcombine.high %v2157_v3, %v2173_v6 }
 0x458   : > { %v2198_v54 = vrot.slane %v2190_v42, %v6866_v44  ;;  %v2205_v47 = vrot.slane %v2191_v46, %v6866_v44 }
 0x459   : > { %v2230_v29 = vrot.slane %v2222_v52, %v6866_v44  ;;  %v2237_v56 = vrot.slane %v2223_v12, %v6866_v44 }
 0x45b   : > { %v2242_v24 = vcombine.low %v2198_v54, %v2230_v29  ;;  %v2243_v45 = vcombine.high %v2198_v54, %v2230_v29  ;;  %v2244_v19 = vcombine.low %v2205_v47, %v2237_v56  ;;  %v2245_v14 = vcombine.high %v2205_v47, %v2237_v56 }
 0x45d   : > { %6056 = vmatpush3.msra.mxu0 %v2242_v24  ;;  %6061 = vmatpush3.msra.mxu1 %v2243_v45 }
 0x45e   : > { %6058 = vmatmul.mubr.msk.f32.vlgmr.msra.gmra.mrb[22].mxu0 %vm2246_vm1, %v3651_v32  ;;  %6063 = vmatmul.mubr.msk.f32.vlgmr.msra.gmra.mrb[38].mxu1 %vm2246_vm1, %v3652_v28 }
 0x45f   : > { %6065 = vmatprep.subr.mxu0 %v6510_v0  ;;  %6070 = vmatprep.subr.mxu1 %v6510_v0 }
 0x460   : > { %6066 = vmatpush3.msra.mxu0 %v2244_v19  ;;  %6071 = vmatpush3.msra.mxu1 %v2245_v14 }
 0x461   : > { %6067 = vmatprep.mubr.msk.f32.mxu0 %vm6512_vm0, %v6510_v0  ;;  %6072 = vmatprep.mubr.msk.f32.mxu1 %vm6512_vm0, %v6510_v0 }
 0x462   : > { %6068 = vmatmul.mubr.msk.f32.vlgmr.msra.gmra.mrb[24].mxu0 %vm2246_vm1, %v3653_v15  ;;  %6073 = vmatmul.mubr.msk.f32.vlgmr.msra.gmra.mrb[40].mxu1 %vm2246_vm1, %v3654_v25 }
 0x463   : > { %6166 = vmatprep.subr.bf16.mxu0 %v6511_v1  ;;  %6107 = vmatprep.mubr.msk.f32.mxu0 %vm6512_vm0, %v6510_v0 }
 0x464   : > { %6168 = vmatpush3.bf16.msra.mxu0 %v6167_v8 }
 0x465   : > { %6169 = vmatprep.subr.bf16.mxu0 %v6511_v1 }
 0x4dd   : > { %v3724_v49 = vpop.f32.mrb[10].mxu0 }
 0x4de   : > { %v5999_v41 = vpop.f32.mrb[11].mxu0 }
 0x509   : > { %v3797_v20 = vpop.f32.mrb[26].mxu1 }
 0x50a   : > { %v3870_v30 = vpop.f32.mrb[12].mxu0  ;;  %v6004_v55 = vpop.f32.mrb[27].mxu1 }
 0x50b   : > { %v4823_v31 = vcombine.low %v3724_v49, %v3870_v30  ;;  %v4824_v59 = vcombine.high %v3724_v49, %v3870_v30  ;;  %v6009_v53 = vpop.f32.mrb[13].mxu0 }
 0x50d   : > { %v4831_v17 = vrot.slane %v4823_v31, %v6861_v37  ;;  %v4838_v60 = vrot.slane %v4824_v59, %v6861_v37 }
 0x511   : > { %v3943_v34 = vpop.f32.mrb[28].mxu1 }
 0x512   : > { %v4839_v62 = vcombine.low %v3797_v20, %v3943_v34  ;;  %v4840_v16 = vcombine.high %v3797_v20, %v3943_v34  ;;  %v6014_v39 = vpop.f32.mrb[29].mxu1 }
 0x514   : > { %v4847_v40 = vrot.slane %v4839_v62, %v6861_v37  ;;  %v4854_v0 = vrot.slane %v4840_v16, %v6861_v37 }
 0x516   : > { %v4887_v63 = vcombine.low %v4831_v17, %v4847_v40  ;;  %v4888_v18 = vcombine.high %v4831_v17, %v4847_v40  ;;  %v4903_v51 = vcombine.low %v4838_v60, %v4854_v0  ;;  %v4904_v21 = vcombine.high %v4838_v60, %v4854_v0  ;;  %v5458_v40 = vld [vmem:[#allocation7 + $0x10] sm:$0xff]  ;;  %v5459_v0 = vld [vmem:[#allocation7 + $0x18] sm:$0xff] }
 0x518   : > { %v4895_v35 = vrot.slane %v4887_v63, %v6866_v44  ;;  %v4902_v58 = vrot.slane %v4888_v18, %v6866_v44  ;;  %v4911_v27 = vrot.slane %v4903_v51, %v6866_v44  ;;  %v4918_v38 = vrot.slane %v4904_v21, %v6866_v44 }
 0x519   : > { %v4089_v10 = vpop.f32.mrb[30].mxu1  ;;  %v6170_v51 = vpack.c.bf16 %v5459_v0, %v5458_v40 }
 0x51a   : > { %v5761_v2 = vcombine.low %v4895_v35, %v4902_v58  ;;  %v5763_v33 = vcombine.high %v4895_v35, %v4902_v58  ;;  %v5765_v4 = vcombine.low %v4911_v27, %v4918_v38  ;;  %v5767_v5 = vcombine.high %v4911_v27, %v4918_v38  ;;  %v4016_v7 = vpop.f32.mrb[14].mxu0  ;;  %v6024_v11 = vpop.f32.mrb[31].mxu1 }
 0x51b   : > { %v6019_v48 = vpop.f32.mrb[15].mxu0  ;;  %6171 = vmatpush3.bf16.msra.mxu0 %v6170_v51 }
 0x51c   : > { %v5103_v43 = vrot.slane %v5761_v2, %v6861_v37  ;;  %v5119_v61 = vrot.slane %v5763_v33, %v6861_v37  ;;  %v5135_v50 = vrot.slane %v5765_v4, %v6861_v37  ;;  %v5151_v13 = vrot.slane %v5767_v5, %v6861_v37  ;;  %6172 = vmatprep.subr.bf16.mxu0 %v6511_v1 }
 0x51e   : > { %v4162_v3 = vpop.f32.mrb[16].mxu0  ;;  %v4235_v6 = vpop.f32.mrb[32].mxu1  ;;  %v5160_v42 = vcombine.high %v5103_v43, %v5119_v61  ;;  %v5192_v46 = vcombine.high %v5135_v50, %v5151_v13  ;;  %v5159_v52 = vcombine.low %v5103_v43, %v5119_v61  ;;  %v5191_v12 = vcombine.low %v5135_v50, %v5151_v13 }
 0x51f   : > { %v4855_v23 = vcombine.low %v4016_v7, %v4162_v3  ;;  %v4856_v54 = vcombine.high %v4016_v7, %v4162_v3  ;;  %v4871_v9 = vcombine.low %v4089_v10, %v4235_v6  ;;  %v4872_v29 = vcombine.high %v4089_v10, %v4235_v6  ;;  %v6029_v47 = vpop.f32.mrb[17].mxu0  ;;  %v6034_v56 = vpop.f32.mrb[33].mxu1 }
 0x520   : > { %v5174_v24 = vrot.slane %v5160_v42, %v6866_v44  ;;  %v5206_v45 = vrot.slane %v5192_v46, %v6866_v44  ;;  %v7678_v36 = vrot.slane %v5159_v52, %v6866_v44  ;;  %v7681_v32 = vrot.slane %v5191_v12, %v6866_v44 }
 0x521   : > { %v4863_v28 = vrot.slane %v4855_v23, %v6861_v37  ;;  %v4870_v57 = vrot.slane %v4856_v54, %v6861_v37  ;;  %v4879_v19 = vrot.slane %v4871_v9, %v6861_v37  ;;  %v4886_v14 = vrot.slane %v4872_v29, %v6861_v37 }
 0x522   : > { %v4308_v15 = vpop.f32.mrb[18].mxu0  ;;  %v5225_v49 = vcombine.low %v5174_v24, %v5206_v45  ;;  %v5224_v41 = vcombine.high %v7678_v36, %v7681_v32  ;;  %v5226_v20 = vcombine.high %v5174_v24, %v5206_v45  ;;  %v5223_v30 = vcombine.low %v7678_v36, %v7681_v32 }
 0x523   : > { %v4381_v25 = vpop.f32.mrb[34].mxu1  ;;  %v4919_v55 = vcombine.low %v4863_v28, %v4879_v19  ;;  %v4920_v31 = vcombine.high %v4863_v28, %v4879_v19  ;;  %v4935_v59 = vcombine.low %v4870_v57, %v4886_v14  ;;  %v4936_v53 = vcombine.high %v4870_v57, %v4886_v14  ;;  %v6039_v34 = vpop.f32.mrb[19].mxu0  ;;  %v5460_v28 = vld [vmem:[#allocation7 + $0x20] sm:$0xff]  ;;  %v5461_v57 = vld [vmem:[#allocation7 + $0x28] sm:$0xff] }
 0x524   : > { %v6044_v62 = vpop.f32.mrb[35].mxu1  ;;  %5372 = vrot.lane.b32.xlu0 %v5225_v49, %s6526_s26  ;;  %5368 = vrot.lane.b32.xlu1 %v5224_v41, %s6527_s15  ;;  %v5463_v34 = vld [vmem:[#allocation7 + $0x38] sm:$0xff] }
 0x525   : > { %v4927_v16 = vrot.slane %v4919_v55, %v6866_v44  ;;  %v4934_v39 = vrot.slane %v4920_v31, %v6866_v44  ;;  %v4943_v17 = vrot.slane %v4935_v59, %v6866_v44  ;;  %v4950_v60 = vrot.slane %v4936_v53, %v6866_v44  ;;  %v5462_v53 = vld [vmem:[#allocation7 + $0x30] sm:$0xff] }
 0x526   : > { %v6176_v51 = vpack.c.bf16 %v5463_v34, %v5462_v53 }
 0x527   : > { %v4454_v63 = vpop.f32.mrb[20].mxu0  ;;  %v4527_v18 = vpop.f32.mrb[36].mxu1  ;;  %v5762_v21 = vcombine.low %v4927_v16, %v4934_v39  ;;  %v5764_v35 = vcombine.high %v4927_v16, %v4934_v39  ;;  %v5766_v58 = vcombine.low %v4943_v17, %v4950_v60  ;;  %v5768_v27 = vcombine.high %v4943_v17, %v4950_v60 }
 0x528   : > { %v6049_v38 = vpop.f32.mrb[21].mxu0  ;;  %v6054_v10 = vpop.f32.mrb[37].mxu1  ;;  %v4959_v2 = vcombine.low %v4308_v15, %v4454_v63  ;;  %v4960_v33 = vcombine.high %v4308_v15, %v4454_v63  ;;  %v4975_v4 = vcombine.low %v4381_v25, %v4527_v18  ;;  %v4976_v5 = vcombine.high %v4381_v25, %v4527_v18  ;;  %5376 = vrot.lane.b32.xlu1 %v5226_v20, %s6525_s24  ;;  %v5464_v63 = vld [vmem:[#allocation7 + $0x40] sm:$0xff]  ;;  %v5465_v18 = vld [vmem:[#allocation7 + $0x48] sm:$0xff] }
 0x529   : > { %v5110_v7 = vrot.slane %v5762_v21, %v6861_v37  ;;  %v5126_v11 = vrot.slane %v5764_v35, %v6861_v37  ;;  %v5142_v48 = vrot.slane %v5766_v58, %v6861_v37  ;;  %v5158_v22 = vrot.slane %v5768_v27, %v6861_v37 }
 0x52a   : > { %v4967_v26 = vrot.slane %v4959_v2, %v6861_v37  ;;  %v4974_v43 = vrot.slane %v4960_v33, %v6861_v37  ;;  %v4983_v61 = vrot.slane %v4975_v4, %v6861_v37  ;;  %v4990_v50 = vrot.slane %v4976_v5, %v6861_v37 }
 0x52b   : > { %v5175_v13 = vcombine.low %v5110_v7, %v5126_v11  ;;  %v5207_v8 = vcombine.low %v5142_v48, %v5158_v22  ;;  %v5176_v3 = vcombine.high %v5110_v7, %v5126_v11  ;;  %v5208_v6 = vcombine.high %v5142_v48, %v5158_v22 }
 0x52c   : > { %v5023_v42 = vcombine.low %v4967_v26, %v4983_v61  ;;  %v5024_v46 = vcombine.high %v4967_v26, %v4983_v61  ;;  %v5039_v52 = vcombine.low %v4974_v43, %v4990_v50  ;;  %v5040_v12 = vcombine.high %v4974_v43, %v4990_v50 }
 0x52d   : > { %v5183_v23 = vrot.slane %v5175_v13, %v6866_v44  ;;  %v5215_v54 = vrot.slane %v5207_v8, %v6866_v44  ;;  %v5190_v9 = vrot.slane %v5176_v3, %v6866_v44  ;;  %v5222_v29 = vrot.slane %v5208_v6, %v6866_v44  ;;  %v5466_v6 = vld [vmem:[#allocation7 + $0x50] sm:$0xff] }
 0x52e   : > { %v5031_v47 = vrot.slane %v5023_v42, %v6866_v44  ;;  %v5038_v56 = vrot.slane %v5024_v46, %v6866_v44  ;;  %v5047_v24 = vrot.slane %v5039_v52, %v6866_v44  ;;  %v5054_v45 = vrot.slane %v5040_v12, %v6866_v44  ;;  %v5467_v42 = vld [vmem:[#allocation7 + $0x58] sm:$0xff] }
 0x52f   : > { %v5228_v19 = vcombine.high %v5183_v23, %v5215_v54  ;;  %v5227_v14 = vcombine.low %v5183_v23, %v5215_v54  ;;  %v5230_v15 = vcombine.high %v5190_v9, %v5222_v29  ;;  %v5229_v25 = vcombine.low %v5190_v9, %v5222_v29 }
 0x530   : > { %v5769_v49 = vcombine.low %v5031_v47, %v5038_v56  ;;  %v5771_v41 = vcombine.high %v5031_v47, %v5038_v56  ;;  %v5773_v20 = vcombine.low %v5047_v24, %v5054_v45  ;;  %v5775_v55 = vcombine.high %v5047_v24, %v5054_v45 }
 0x531   : > { %v4600_v31 = vpop.f32.mrb[22].mxu0  ;;  %v4673_v59 = vpop.f32.mrb[38].mxu1  ;;  %5384 = vrot.lane.b32.xlu1 %v5228_v19, %s6523_s17  ;;  %5380 = vrot.lane.b32.xlu0 %v5227_v14, %s6524_s23  ;;  %v6173_v39 = vpack.c.bf16 %v5461_v57, %v5460_v28  ;;  %v6179_v21 = vpack.c.bf16 %v5465_v18, %v5464_v63  ;;  %v6182_v56 = vpack.c.bf16 %v5467_v42, %v5466_v6  ;;  %v5468_v19 = vld [vmem:[#allocation7 + $0x60] sm:$0xff]  ;;  %v5469_v14 = vld [vmem:[#allocation7 + $0x68] sm:$0xff] }
 0x532   : > { %v6059_v62 = vpop.f32.mrb[23].mxu0  ;;  %v6064_v16 = vpop.f32.mrb[39].mxu1  ;;  %v5239_v17 = vrot.slane %v5769_v49, %v6861_v37  ;;  %v5255_v60 = vrot.slane %v5771_v41, %v6861_v37  ;;  %v5271_v40 = vrot.slane %v5773_v20, %v6861_v37  ;;  %v5287_v0 = vrot.slane %v5775_v55, %v6861_v37 }
 0x533   : > { %6174 = vmatpush3.bf16.msra.mxu0 %v6173_v39  ;;  %v6185_v20 = vpack.c.bf16 %v5469_v14, %v5468_v19 }
 0x534   : > { %v5295_v27 = vcombine.low %v5239_v17, %v5255_v60  ;;  %v5327_v38 = vcombine.low %v5271_v40, %v5287_v0  ;;  %v5296_v10 = vcombine.high %v5239_v17, %v5255_v60  ;;  %v5328_v2 = vcombine.high %v5271_v40, %v5287_v0  ;;  %6175 = vmatprep.subr.bf16.mxu0 %v6511_v1  ;;  %v5470_v17 = vld [vmem:[#allocation7 + $0x70] sm:$0xff]  ;;  %v5471_v60 = vld [vmem:[#allocation7 + $0x78] sm:$0xff] }
 0x535   : > { %v4746_v35 = vpop.f32.mrb[24].mxu0  ;;  %v4819_v58 = vpop.f32.mrb[40].mxu1  ;;  %5392 = vrot.lane.b32.xlu1 %v5230_v15, %s6521_s9  ;;  %5388 = vrot.lane.b32.xlu0 %v5229_v25, %s6522_s11  ;;  %s5551_s9 = scalar_lea.sflag [#allocation4], %s6730_s14 }
 0x536   : > { %v4991_v33 = vcombine.low %v4600_v31, %v4746_v35  ;;  %v4992_v4 = vcombine.high %v4600_v31, %v4746_v35  ;;  %v5007_v5 = vcombine.low %v4673_v59, %v4819_v58  ;;  %v5008_v7 = vcombine.high %v4673_v59, %v4819_v58  ;;  %v6069_v11 = vpop.f32.mrb[25].mxu0  ;;  %v6074_v48 = vpop.f32.mrb[41].mxu1 }
 0x537   : > { %v5303_v22 = vrot.slane %v5295_v27, %v6866_v44  ;;  %v5335_v26 = vrot.slane %v5327_v38, %v6866_v44  ;;  %v5310_v43 = vrot.slane %v5296_v10, %v6866_v44  ;;  %v5342_v61 = vrot.slane %v5328_v2, %v6866_v44  ;;  %6177 = vmatpush3.bf16.msra.mxu0 %v6176_v51 }
 0x538   : > { %v4999_v50 = vrot.slane %v4991_v33, %v6861_v37  ;;  %v5006_v13 = vrot.slane %v4992_v4, %v6861_v37  ;;  %v5015_v8 = vrot.slane %v5007_v5, %v6861_v37  ;;  %v5022_v3 = vrot.slane %v5008_v7, %v6861_v37  ;;  %6178 = vmatprep.subr.bf16.mxu0 %v6511_v1 }
 0x539   : > { %v5360_v46 = vcombine.high %v5303_v22, %v5335_v26  ;;  %v5359_v52 = vcombine.low %v5303_v22, %v5335_v26  ;;  %v5362_v12 = vcombine.high %v5310_v43, %v5342_v61  ;;  %v5361_v23 = vcombine.low %v5310_v43, %v5342_v61 }
 0x53a   : > { %v5055_v54 = vcombine.low %v4999_v50, %v5015_v8  ;;  %v5056_v9 = vcombine.high %v4999_v50, %v5015_v8  ;;  %v5071_v29 = vcombine.low %v5006_v13, %v5022_v3  ;;  %v5072_v47 = vcombine.high %v5006_v13, %v5022_v3 }
 0x53b   : > { %5400 = vrot.lane.b32.xlu1 %v5360_v46, %s6519_s29  ;;  %5396 = vrot.lane.b32.xlu0 %v5359_v52, %s6520_s8 }
 0x53c   : > { %v5063_v24 = vrot.slane %v5055_v54, %v6866_v44  ;;  %v5070_v45 = vrot.slane %v5056_v9, %v6866_v44  ;;  %v5079_v28 = vrot.slane %v5071_v29, %v6866_v44  ;;  %v5086_v57 = vrot.slane %v5072_v47, %v6866_v44  ;;  %6180 = vmatpush3.bf16.msra.mxu0 %v6179_v21  ;;  %v5777_v9 = vld [vmem:[%s7818_s4] ss:$0 sm:$0xff] }
 0x53d   : > { %6181 = vmatprep.subr.bf16.mxu0 %v6511_v1 }
 0x53e   : > { %v5770_v15 = vcombine.low %v5063_v24, %v5070_v45  ;;  %v5772_v25 = vcombine.high %v5063_v24, %v5070_v45  ;;  %v5774_v49 = vcombine.low %v5079_v28, %v5086_v57  ;;  %v5776_v41 = vcombine.high %v5079_v28, %v5086_v57 }
 0x53f   : > { %5408 = vrot.lane.b32.xlu1 %v5362_v12, %s6517_s7  ;;  %5404 = vrot.lane.b32.xlu0 %v5361_v23, %s6518_s6 }
 0x540   : > { %v5246_v55 = vrot.slane %v5770_v15, %v6861_v37  ;;  %v5262_v31 = vrot.slane %v5772_v25, %v6861_v37  ;;  %v5278_v59 = vrot.slane %v5774_v49, %v6861_v37  ;;  %v5294_v53 = vrot.slane %v5776_v41, %v6861_v37  ;;  %6183 = vmatpush3.bf16.msra.mxu0 %v6182_v56 }
 0x541   : > { %6184 = vmatprep.subr.bf16.mxu0 %v6511_v1  ;;  %v6188_v37 = vpack.c.bf16 %v5471_v60, %v5470_v17 }
 0x542   : > { %v5311_v34 = vcombine.low %v5246_v55, %v5262_v31  ;;  %v5343_v62 = vcombine.low %v5278_v59, %v5294_v53  ;;  %v5312_v16 = vcombine.high %v5246_v55, %v5262_v31  ;;  %v5344_v39 = vcombine.high %v5278_v59, %v5294_v53 }
 0x544   : > { %v5319_v40 = vrot.slane %v5311_v34, %v6866_v44  ;;  %v5351_v0 = vrot.slane %v5343_v62, %v6866_v44  ;;  %v5326_v63 = vrot.slane %v5312_v16, %v6866_v44  ;;  %v5358_v18 = vrot.slane %v5344_v39, %v6866_v44  ;;  %6186 = vmatpush3.bf16.msra.mxu0 %v6185_v20 }
 0x545   : > { %6187 = vmatprep.subr.bf16.mxu0 %v6511_v1 }
 0x546   : > { %v5364_v51 = vcombine.high %v5319_v40, %v5351_v0  ;;  %v5363_v21 = vcombine.low %v5319_v40, %v5351_v0  ;;  %v5366_v35 = vcombine.high %v5326_v63, %v5358_v18  ;;  %v5365_v58 = vcombine.low %v5326_v63, %v5358_v18 }
 0x548   : > { %5416 = vrot.lane.b32.xlu1 %v5364_v51, %s6516_s13  ;;  %5412 = vrot.lane.b32.xlu0 %v5363_v21, %s6515_s12  ;;  %s7834_s12 = sshll.u32 %s6730_s14, 3 }
 0x549   : > { %6189 = vmatpush3.bf16.msra.mxu0 %v6188_v37  ;;  %s268_s13 = scalar_lea.vmem [#allocation8], %s7834_s12 }
 0x54a   : > { %s5564_s7 = sshll.u32 %s268_s13, 4  ;;  %s7772_s7 = int_to_ptr.vmem [resolvable:$true] %s5564_s7 }
 0x54b   : > { %s6431_s11 = scalar_lea.vmem %s7772_s7, 128 }
 0x54c   : > { %5424 = vrot.lane.b32.xlu1 %v5366_v35, %s6514_s28  ;;  %5420 = vrot.lane.b32.xlu0 %v5365_v58, %s6513_s10  ;;  %s5779_s28 = sshll.u32 %s6582_s22, 7  ;;  %p6432_p11 = scmp.ne.s32.totalorder %s7772_s7, %s6431_s11 }
 0x54d   : > { %s7770_s8 = scalar_lea.hbm %s7819_s5, %s5779_s28  ;;  %s6530_s22 = smov [#allocation8]  }
 0x54e   : > { %p6433_p1 = pnand %p6432_p11, %p7835_p0  ;;  %s6435_s17 = sshll.u32 %s6530_s22, 4  ;;  %s6436_s17 = int_to_ptr.vmem [resolvable:$false] %s6435_s17 }
 0x54f   : > { %s6437_s23 = scalar_lea.vmem %s6436_s17, 256  ;;  %p6438_p5 = scmp.lt.s32.totalorder %s7772_s7, %s6436_s17 }
 0x550   : > { %p6434_p3 = pneg %p6433_p1  ;;  %p6439_p9 = scmp.lt.s32.totalorder %s6437_s23, %s6431_s11 }
 0x552   : > { %p6440_p12 = por %p6439_p9, %p6438_p5 }
 0x554   : > { %p6441_p2 = pnand %p6440_p12, %p6434_p3 }
 0x596   : > { %v5369_v27 = vpop.permute.xlu1 %5368  ;;  %v5373_v38 = vpop.permute.xlu0 %5372 }
 0x597   : > { %v5427_v1 = vsel %vm2246_vm1, %v5223_v30, %v5369_v27 }
 0x598   : > { %v5429_v33 = vsel %vm5428_vm2, %v5427_v1, %v5373_v38 }
 0x59a   : > { %v5377_v44 = vpop.permute.xlu1 %5376 }
 0x59b   : > { %v5431_v5 = vsel %vm5430_vm3, %v5429_v33, %v5377_v44 }
 0x5a3   : > { %v5381_v10 = vpop.permute.xlu0 %5380  ;;  %v5385_v2 = vpop.permute.xlu1 %5384 }
 0x5a4   : > { %v5433_v11 = vsel %vm5432_vm4, %v5431_v5, %v5381_v10 }
 0x5a5   : > { %v5435_v48 = vsel %vm5434_vm5, %v5433_v11, %v5385_v2 }
 0x5a7   : > { %v5389_v4 = vpop.permute.xlu0 %5388  ;;  %v5393_v7 = vpop.permute.xlu1 %5392 }
 0x5a8   : > { %v5437_v26 = vsel %vm5436_vm6, %v5435_v48, %v5389_v4 }
 0x5a9   : > { %v5439_v61 = vsel %vm5438_vm7, %v5437_v26, %v5393_v7 }
 0x5ad   : > { %v5397_v22 = vpop.permute.xlu0 %5396  ;;  %v5401_v43 = vpop.permute.xlu1 %5400 }
 0x5ae   : > { %v5441_v36 = vsel %vm5440_vm8, %v5439_v61, %v5397_v22 }
 0x5af   : > { %v5443_v30 = vsel %vm5442_vm9, %v5441_v36, %v5401_v43 }
 0x5b1   : > { %v5405_v32 = vpop.permute.xlu0 %5404  ;;  %v5409_v50 = vpop.permute.xlu1 %5408 }
 0x5b2   : > { %v5445_v13 = vsel %vm5444_vm10, %v5443_v30, %v5405_v32 }
 0x5b3   : > { %v5447_v8 = vsel %vm5446_vm11, %v5445_v13, %v5409_v50 }
 0x5ba   : > { %v5413_v3 = vpop.permute.xlu0 %5412  ;;  %v5417_v6 = vpop.permute.xlu1 %5416 }
 0x5bb   : > { %v5449_v42 = vsel %vm5448_vm12, %v5447_v8, %v5413_v3 }
 0x5bc   : > { %v5451_v46 = vsel %vm5450_vm13, %v5449_v42, %v5417_v6 }
 0x5be   : > { %v5421_v52 = vpop.permute.xlu0 %5420  ;;  %v5425_v12 = vpop.permute.xlu1 %5424 }
 0x5bf   : > { %v5453_v23 = vsel %vm5452_vm14, %v5451_v46, %v5421_v52 }
 0x5c0   : > { %v5455_v54 = vsel %vm5454_vm15, %v5453_v23, %v5425_v12 }
 0x5c1   : > { %6108 = vmatmul.mubr.f32.vlgmr.msra.gmra.mrb[26].mxu0 %v5455_v54 }
 0x694   : > { %v5545_v29 = vpop.f32.mrb[26].mxu0 }
 0x695   : > { %v5546_v47 = vadd.f32 %v5777_v9, %v5545_v29  ;;  %v6109_v56 = vpop.f32.mrb[27].mxu0 }
 0x697   : > { %5549 = vst [vmem:[%s268_s13] sm:$0xff] %v5546_v47 }
 0x698   : > { %6444 = shalt.err (!%p6441_p2)
}
 0x699   : > { %s6445_s14 = scalar_lea.hbm %s7770_s8, 128  ;;  %s6449_s15 = scalar_lea.hbm %s7819_s5, 256 }
 0x69a   : > { %p6446_p13 = scmp.ne.s32.totalorder %s7770_s8, %s6445_s14  ;;  %p6450_p4 = scmp.lt.u32.totalorder %s7770_s8, %s7819_s5 }
 0x69b   : > { %p6451_p7 = scmp.lt.u32.totalorder %s6449_s15, %s6445_s14  ;;  %p6453_p11 = scmp.lt.u32.totalorder %s6445_s14, %s7770_s8 }
 0x69c   : > { %p6447_p6 = pnand %p6446_p13, %p7835_p0 }
 0x69d   : > { %p6452_p8 = por %p6451_p7, %p6450_p4 }
 0x69e   : > { %p6448_p10 = pneg %p6447_p6 }
 0x69f   : > { %p6454_p1 = por %p6453_p11, %p6452_p8 }
 0x6a1   : > { %p6455_p3 = pnand %p6454_p1, %p6448_p10 }
 0x6a3   : > { %6458 = shalt.err (!%p6455_p3)
}
 0x6a4   : > { %6200 = dma.vmem_to_hbm [thread:$0]  (%p7835_p0), %s7772_s7, 128, %s7770_s8, %s5551_s9  }
 0x6a5 PF: > { %s5576_s12 = sand.u32 1, %s6489_s18   ;;  %p7836_p5 = scmp.ne.s32.totalorder %s7825_s25, 0 }
 0x6a6   : > { %p7837_p9 = scmp.ge.s32.totalorder %s6501_s21, 2  ;;  %s5577_s13 = scalar_lea.sflag [#allocation4], %s5576_s12 }
 0x6a8   : > { %p6214_p12 = pnand %p7837_p9, %p7836_p5 }
 0x6aa   : > { %6484 = dma.done.wait (!%p6214_p12), %s5577_s13, 128  }
 0x6ab   : > { %6486 = vsyncadd (!%p6214_p12), %s5577_s13, 4294967168  ;;  %p19_p2 = scmp.ge.s32.totalorder %s6671_s16, 4   ;;  %s7838_s18 = smov %s6493_s19 }
 0x6ac   : > { %s7839_s19 = smov %s6497_s20  ;;  %s7840_s20 = smov %s6680_s27 }
 0x6ad   : > { %s7841_s21 = smov %s6671_s16  ;;  %21 = sbr.rel (!%p19_p2) target bundleno = 6 (0x6), region = 93 }
 0x6b4   :  { %5582 = vsyncpa [#allocation3], 1 }
 0x6b5   :  { %5584 = vsyncpa [#allocation3 + $0x1], 1 }
 0x6b6   :  { %5585 = vsyncpa [#allocation6], 1 }
 0x6b7   :  { %5586 = vsyncpa [#allocation4], 1 }
 0x6b8   :  { %5588 = vsyncpa [#allocation4 + $0x1], 1 }

</bundles_post_ra>
